<compile_context>
chip_gen: v6e
topology: v6e:2x2x1
jax: 0.10.0
libtpu: 0.0.40
codegen_flags: <defaults>
</compile_context>

<pallas_src>
import jax
import jax.numpy as jnp
from jax.experimental import pallas as pl
from jax.experimental.pallas import tpu as pltpu

LATENT = 100
EMB_DIM = 10
N_CLASSES = 10
K_IN = LATENT + EMB_DIM      # 110 (logical)
K_PAD = 128                  # lane-dense K for layer 1
H1 = 512
H2 = 1024
OUT = 28 * 28                # 784 (logical output width, stored directly)


def generator_mlp_kernel(x_ref, w1_ref, b1_ref, w2_ref, b2_ref, w3_ref, b3_ref,
                         o_ref):
    """One batch tile of the full MLP; all weights resident in VMEM.

    x_ref : [TILE_B, 128]   bf16, zero-padded (latent ++ label-emb ++ 0s)
    w1    : [128, 512]  bf16   b1 : [1, 512]  f32
    w2    : [512, 1024] bf16   b2 : [1, 1024] f32
    w3    : [1024, 784] bf16   b3 : [1, 784]  f32
    o_ref : [TILE_B, 784] f32
    """
    x = x_ref[...]                                                   # bf16

    # layer1: Linear(110->512) + LeakyReLU(0.2)   (fp32 accumulate / activate)
    h1 = jnp.dot(x, w1_ref[...], preferred_element_type=jnp.float32) + b1_ref[...]
    h1 = jnp.maximum(h1, 0.2 * h1).astype(jnp.bfloat16)

    # layer2: Linear(512->1024) + LeakyReLU(0.2)
    h2 = jnp.dot(h1, w2_ref[...], preferred_element_type=jnp.float32) + b2_ref[...]
    h2 = jnp.maximum(h2, 0.2 * h2).astype(jnp.bfloat16)

    # layer3: Linear(1024->784) + Sigmoid.  exp and reciprocal both go to the
    # EUP slot; result stored in f32 at the logical 784 width (no pad columns).
    h3 = jnp.dot(h2, w3_ref[...], preferred_element_type=jnp.float32) + b3_ref[...]
    o_ref[...] = pl.reciprocal(1.0 + jnp.exp(-h3), approx=True)


def init_params(key):
    """PyTorch-style U(-1/sqrt(fan_in), 1/sqrt(fan_in)) init, bf16 weights.

    Only w1's K dim is padded (110 -> 128, pad rows exact zeros); w3/b3 stay
    at the logical 784 output width.
    """
    ks = jax.random.split(key, 7)

    def lin(kw, kb, fan_in, fan_out):
        bound = 1.0 / jnp.sqrt(fan_in)
        w = jax.random.uniform(kw, (fan_in, fan_out), jnp.float32, -bound, bound)
        b = jax.random.uniform(kb, (1, fan_out), jnp.float32, -bound, bound)
        return w, b

    emb = jax.random.normal(ks[0], (N_CLASSES, EMB_DIM), jnp.float32)
    w1, b1 = lin(ks[1], ks[2], K_IN, H1)
    w2, b2 = lin(ks[3], ks[4], H1, H2)
    w3, b3 = lin(ks[5], ks[6], H2, OUT)

    w1 = jnp.pad(w1, ((0, K_PAD - K_IN), (0, 0)))          # [128, 512]

    return dict(
        emb=emb,
        w1=w1.astype(jnp.bfloat16), b1=b1,
        w2=w2.astype(jnp.bfloat16), b2=b2,
        w3=w3.astype(jnp.bfloat16), b3=b3,
    )


def _pick_tile_b(B):
    """Static batch-tile choice.

    * minimum 16 rows (bf16 packs 16 rows per sublane group),
    * >= 2 grid steps whenever B > 16 so both v7x TensorCores get work,
    * tile cap 256 (512 for B >= 1024) to amortize per-step overhead while
      staying well inside scoped VMEM with single-buffered weights.
    """
    if B <= 16:
        return 16
    cap = 512 if B >= 1024 else 256
    half = ((-(-B // 2)) + 15) // 16 * 16   # round_up(cdiv(B, 2), 16)
    return min(cap, half)


@jax.jit
def generator_forward(x, labels, params):
    B = x.shape[0]

    # Embedding lookup + concat are glue (gather); done in plain JAX.
    # TODO(synk): could fuse the gather via PrefetchScalarGridSpec(labels) to
    # drop the x_cat round-trip; skipped — bytes saved are negligible.
    c = params["emb"][labels]                                # [B, 10]
    x_cat = jnp.concatenate([x, c], axis=1)                  # [B, 110]
    x_cat = jnp.pad(x_cat, ((0, 0), (0, K_PAD - K_IN)))      # [B, 128]
    x_cat = x_cat.astype(jnp.bfloat16)

    tile_b = _pick_tile_b(B)
    num_tiles = pl.cdiv(B, tile_b)
    b_pad = num_tiles * tile_b
    if b_pad != B:
        x_cat = jnp.pad(x_cat, ((0, b_pad - B), (0, 0)))

    flops = 2 * b_pad * (K_PAD * H1 + H1 * H2 + H2 * OUT)
    bytes_accessed = (
        2 * (K_PAD * H1 + H1 * H2 + H2 * OUT)                # bf16 weights
        + 4 * (H1 + H2 + OUT)                                # f32 biases
        + 2 * b_pad * K_PAD                                  # bf16 input tile
        + 4 * b_pad * OUT                                    # f32 output
    )
    cost = pl.CostEstimate(flops=flops, transcendentals=2 * b_pad * OUT,
                           bytes_accessed=bytes_accessed)

    const = lambda i: (0, 0)          # weights / biases stay VMEM-resident
    single = pl.Buffered(1)           # constant index -> no second buffer
    vmem_limit = (32 << 20) if tile_b >= 512 else (16 << 20)

    out_flat = pl.pallas_call(
        generator_mlp_kernel,
        out_shape=jax.ShapeDtypeStruct((b_pad, OUT), jnp.float32),
        grid=(num_tiles,),
        in_specs=[
            pl.BlockSpec((tile_b, K_PAD), lambda i: (i, 0)),
            pl.BlockSpec((K_PAD, H1), const, pipeline_mode=single),
            pl.BlockSpec((1, H1), const, pipeline_mode=single),
            pl.BlockSpec((H1, H2), const, pipeline_mode=single),
            pl.BlockSpec((1, H2), const, pipeline_mode=single),
            pl.BlockSpec((H2, OUT), const, pipeline_mode=single),
            pl.BlockSpec((1, OUT), const, pipeline_mode=single),
        ],
        out_specs=pl.BlockSpec((tile_b, OUT), lambda i: (i, 0)),
        compiler_params=pltpu.CompilerParams(
            dimension_semantics=("parallel",),
            vmem_limit_bytes=vmem_limit,
        ),
        cost_estimate=cost,
    )(x_cat, params["w1"], params["b1"], params["w2"], params["b2"],
      params["w3"], params["b3"])

    # Drop batch padding (no-op when b_pad == B), reshape to NCHW like
    # torch's x.view(B, 1, 28, 28).  No lane slicing needed anymore.
    return out_flat[:B].reshape(B, 1, 28, 28)


def reference_forward(x, labels, params):
    """Pure-JAX reference mirroring the kernel's bf16-in / fp32-accumulate math
    (exact sigmoid; the kernel's approx reciprocal differs by <~1e-3)."""
    c = params["emb"][labels]
    h = jnp.concatenate([x, c], axis=1)
    h = jnp.pad(h, ((0, 0), (0, K_PAD - K_IN))).astype(jnp.bfloat16)
    h = jnp.dot(h, params["w1"], preferred_element_type=jnp.float32) + params["b1"]
    h = jnp.maximum(h, 0.2 * h).astype(jnp.bfloat16)
    h = jnp.dot(h, params["w2"], preferred_element_type=jnp.float32) + params["b2"]
    h = jnp.maximum(h, 0.2 * h).astype(jnp.bfloat16)
    h = jnp.dot(h, params["w3"], preferred_element_type=jnp.float32) + params["b3"]
    return jax.nn.sigmoid(h).reshape(x.shape[0], 1, 28, 28)


if __name__ == "__main__":
    key = jax.random.PRNGKey(0)
    k_param, k_x, k_lab = jax.random.split(key, 3)

    B = 8
    params = init_params(k_param)
    x = jax.random.normal(k_x, (B, LATENT), jnp.float32)
    labels = jax.random.randint(k_lab, (B,), 0, N_CLASSES, dtype=jnp.int32)

    out = generator_forward(x, labels, params)
    jax.block_until_ready(out)

    ref = reference_forward(x, labels, params)
    assert out.shape == (B, 1, 28, 28), out.shape
    # bf16 matmul inputs + approx (EUP) reciprocal in the sigmoid: allow ~1e-3
    # slack vs the exact-sigmoid reference.  Fidelity vs the fp32 PyTorch
    # module is ~1e-2-level (bf16 weights), which is expected and acceptable.
    assert jnp.allclose(out, ref, atol=2e-3, rtol=2e-3), "mismatch vs reference"

    print("KERNEL_OK")
</pallas_src>

<mosaic_0001>
module attributes {stable_mosaic.version = 11 : i64} {
  func.func @generator_mlp_kernel(%arg0: i32, %arg1: memref<16x128xbf16, #tpu.memory_space<vmem>>, %arg2: memref<128x512xbf16, #tpu.memory_space<vmem>>, %arg3: memref<1x512xf32, #tpu.memory_space<vmem>>, %arg4: memref<512x1024xbf16, #tpu.memory_space<vmem>>, %arg5: memref<1x1024xf32, #tpu.memory_space<vmem>>, %arg6: memref<1024x784xbf16, #tpu.memory_space<vmem>>, %arg7: memref<1x784xf32, #tpu.memory_space<vmem>>, %arg8: memref<16x784xf32, #tpu.memory_space<vmem>>) attributes {dimension_semantics = [#tpu.dimension_semantics<parallel>], iteration_bounds = array<i64: 1>, scalar_prefetch = 0 : i64, scratch_operands = 0 : i64, tpu.core_type = #tpu.core_type<tc>, window_params = [{transform_indices = @transform_0, window_bounds = array<i64: 16, 128>}, {pipeline_mode = #tpu.pipeline_mode<synchronous>, transform_indices = @transform_1, window_bounds = array<i64: 128, 512>}, {pipeline_mode = #tpu.pipeline_mode<synchronous>, transform_indices = @transform_2, window_bounds = array<i64: 1, 512>}, {pipeline_mode = #tpu.pipeline_mode<synchronous>, transform_indices = @transform_3, window_bounds = array<i64: 512, 1024>}, {pipeline_mode = #tpu.pipeline_mode<synchronous>, transform_indices = @transform_4, window_bounds = array<i64: 1, 1024>}, {pipeline_mode = #tpu.pipeline_mode<synchronous>, transform_indices = @transform_5, window_bounds = array<i64: 1024, 784>}, {pipeline_mode = #tpu.pipeline_mode<synchronous>, transform_indices = @transform_6, window_bounds = array<i64: 1, 784>}, {transform_indices = @transform_7, window_bounds = array<i64: 16, 784>}]} {
    %c0 = arith.constant 0 : index
    %c0_0 = arith.constant 0 : index
    %0 = vector.load %arg1[%c0, %c0_0] : memref<16x128xbf16, #tpu.memory_space<vmem>>, vector<16x128xbf16>
    %c0_1 = arith.constant 0 : index
    %c0_2 = arith.constant 0 : index
    %1 = vector.load %arg2[%c0_1, %c0_2] : memref<128x512xbf16, #tpu.memory_space<vmem>>, vector<128x512xbf16>
    %cst = arith.constant dense<0.000000e+00> : vector<16x512xf32>
    %2 = tpu.matmul %0, %1, %cst {dimension_numbers = #tpu.dot_dimension_numbers<[1], [0], [0], [1], [0, 0, 1, 1], [], []>} : vector<16x128xbf16>, vector<128x512xbf16>, vector<16x512xf32> -> vector<16x512xf32>
    %c0_3 = arith.constant 0 : index
    %c0_4 = arith.constant 0 : index
    %3 = vector.load %arg3[%c0_3, %c0_4] : memref<1x512xf32, #tpu.memory_space<vmem>>, vector<1x512xf32>
    %4 = vector.broadcast %3 : vector<1x512xf32> to vector<16x512xf32>
    %5 = arith.addf %2, %4 : vector<16x512xf32>
    %cst_5 = arith.constant 2.000000e-01 : f32
    %6 = vector.broadcast %cst_5 : f32 to vector<16x512xf32>
    %7 = arith.mulf %6, %5 : vector<16x512xf32>
    %8 = arith.maximumf %5, %7 : vector<16x512xf32>
    %9 = arith.truncf %8 : vector<16x512xf32> to vector<16x512xbf16>
    %c0_6 = arith.constant 0 : index
    %c0_7 = arith.constant 0 : index
    %10 = vector.load %arg4[%c0_6, %c0_7] : memref<512x1024xbf16, #tpu.memory_space<vmem>>, vector<512x1024xbf16>
    %cst_8 = arith.constant dense<0.000000e+00> : vector<16x1024xf32>
    %11 = tpu.matmul %9, %10, %cst_8 {dimension_numbers = #tpu.dot_dimension_numbers<[1], [0], [0], [1], [0, 0, 1, 1], [], []>} : vector<16x512xbf16>, vector<512x1024xbf16>, vector<16x1024xf32> -> vector<16x1024xf32>
    %c0_9 = arith.constant 0 : index
    %c0_10 = arith.constant 0 : index
    %12 = vector.load %arg5[%c0_9, %c0_10] : memref<1x1024xf32, #tpu.memory_space<vmem>>, vector<1x1024xf32>
    %13 = vector.broadcast %12 : vector<1x1024xf32> to vector<16x1024xf32>
    %14 = arith.addf %11, %13 : vector<16x1024xf32>
    %cst_11 = arith.constant 2.000000e-01 : f32
    %15 = vector.broadcast %cst_11 : f32 to vector<16x1024xf32>
    %16 = arith.mulf %15, %14 : vector<16x1024xf32>
    %17 = arith.maximumf %14, %16 : vector<16x1024xf32>
    %18 = arith.truncf %17 : vector<16x1024xf32> to vector<16x1024xbf16>
    %c0_12 = arith.constant 0 : index
    %c0_13 = arith.constant 0 : index
    %19 = vector.load %arg6[%c0_12, %c0_13] : memref<1024x784xbf16, #tpu.memory_space<vmem>>, vector<1024x784xbf16>
    %cst_14 = arith.constant dense<0.000000e+00> : vector<16x784xf32>
    %20 = tpu.matmul %18, %19, %cst_14 {dimension_numbers = #tpu.dot_dimension_numbers<[1], [0], [0], [1], [0, 0, 1, 1], [], []>} : vector<16x1024xbf16>, vector<1024x784xbf16>, vector<16x784xf32> -> vector<16x784xf32>
    %c0_15 = arith.constant 0 : index
    %c0_16 = arith.constant 0 : index
    %21 = vector.load %arg7[%c0_15, %c0_16] : memref<1x784xf32, #tpu.memory_space<vmem>>, vector<1x784xf32>
    %22 = vector.broadcast %21 : vector<1x784xf32> to vector<16x784xf32>
    %23 = arith.addf %20, %22 : vector<16x784xf32>
    %cst_17 = arith.constant 0.000000e+00 : f32
    %24 = vector.broadcast %cst_17 : f32 to vector<16x784xf32>
    %25 = arith.subf %24, %23 : vector<16x784xf32>
    %26 = math.exp %25 : vector<16x784xf32>
    %cst_18 = arith.constant 1.000000e+00 : f32
    %27 = vector.broadcast %cst_18 : f32 to vector<16x784xf32>
    %28 = arith.addf %27, %26 : vector<16x784xf32>
    %29 = tpu.reciprocal %28 {approx = true} : vector<16x784xf32> -> vector<16x784xf32>
    %c0_19 = arith.constant 0 : index
    %c0_20 = arith.constant 0 : index
    %30 = vector.load %arg8[%c0_19, %c0_20] : memref<16x784xf32, #tpu.memory_space<vmem>>, vector<16x784xf32>
    tpu.vector_store %arg8[%c0_19, %c0_20], %29 {strides = array<i32>} : memref<16x784xf32, #tpu.memory_space<vmem>>, vector<16x784xf32>,
    return
  }
  func.func @transform_0(%arg0: i32) -> (i32, i32) {
    %c0_i32 = arith.constant 0 : i32
    %c0_i32_0 = arith.constant 0 : i32
    return %arg0, %c0_i32 : i32, i32
  }
  func.func @transform_1(%arg0: i32) -> (i32, i32) {
    %c0_i32 = arith.constant 0 : i32
    %c0_i32_0 = arith.constant 0 : i32
    %c0_i32_1 = arith.constant 0 : i32
    return %c0_i32, %c0_i32_0 : i32, i32
  }
  func.func @transform_2(%arg0: i32) -> (i32, i32) {
    %c0_i32 = arith.constant 0 : i32
    %c0_i32_0 = arith.constant 0 : i32
    %c0_i32_1 = arith.constant 0 : i32
    return %c0_i32, %c0_i32_0 : i32, i32
  }
  func.func @transform_3(%arg0: i32) -> (i32, i32) {
    %c0_i32 = arith.constant 0 : i32
    %c0_i32_0 = arith.constant 0 : i32
    %c0_i32_1 = arith.constant 0 : i32
    return %c0_i32, %c0_i32_0 : i32, i32
  }
  func.func @transform_4(%arg0: i32) -> (i32, i32) {
    %c0_i32 = arith.constant 0 : i32
    %c0_i32_0 = arith.constant 0 : i32
    %c0_i32_1 = arith.constant 0 : i32
    return %c0_i32, %c0_i32_0 : i32, i32
  }
  func.func @transform_5(%arg0: i32) -> (i32, i32) {
    %c0_i32 = arith.constant 0 : i32
    %c0_i32_0 = arith.constant 0 : i32
    %c0_i32_1 = arith.constant 0 : i32
    return %c0_i32, %c0_i32_0 : i32, i32
  }
  func.func @transform_6(%arg0: i32) -> (i32, i32) {
    %c0_i32 = arith.constant 0 : i32
    %c0_i32_0 = arith.constant 0 : i32
    %c0_i32_1 = arith.constant 0 : i32
    return %c0_i32, %c0_i32_0 : i32, i32
  }
  func.func @transform_7(%arg0: i32) -> (i32, i32) {
    %c0_i32 = arith.constant 0 : i32
    %c0_i32_0 = arith.constant 0 : i32
    return %arg0, %c0_i32 : i32, i32
  }
}

</mosaic_0001>

<bundles_post_ra>
// kernel: generator_forward.1
= control target key start
LH: loop header
LB: loop body
LE: loop exit
PB: predicated region body
PF: predicated region fallthrough
CT: control target
= control target key end

     0   :  { %v7511_v1 = vmov 0   ;;  %vm5926_vm0 = vcmask 130048   ;;  %s9986_s1 = inlined_call_operand.vmem [shape: bf16[128,512], index: 1, kind: input, shape index: {}]   ;;  %s9987_s0 = inlined_call_operand.vmem [shape: bf16[16,128], index: 0, kind: input, shape index: {}]   ;;  %s9988_s3 = inlined_call_operand.vmem [shape: bf16[512,1024], index: 3, kind: input, shape index: {}]   ;;  %s9989_s2 = inlined_call_operand.vmem [shape: f32[1,512], index: 2, kind: input, shape index: {}]   ;;  %s9990_s5 = inlined_call_operand.vmem [shape: bf16[1024,784], index: 5, kind: input, shape index: {}]   ;;  %s9991_s4 = inlined_call_operand.vmem [shape: f32[1,1024], index: 4, kind: input, shape index: {}]   ;;  %s9992_s6 = inlined_call_operand.vmem [shape: f32[1,784], index: 6, kind: input, shape index: {}]   ;;  %s9993_s7 = inlined_call_operand.vmem [shape: f32[16,784], index: 7, kind: output, shape index: {}]  }
   0x1   :  { %v6765_v0 = vld [vmem:[%s9986_s1 + $0xe4] ss:$16 sps:$4 sm:$0xff]   ;;  %281 = vmatprep.mubr.bf16.mxu0 %v7511_v1  ;;  %324 = vmatprep.mubr.bf16.mxu1 %v7511_v1  ;;  %v6767_v2 = vld [vmem:[%s9986_s1 + $0xec] ss:$16 sps:$4 sm:$0xff]   ;;  %v6769_v3 = vld [vmem:[%s9986_s1 + $0xe0] ss:$16 sps:$4 sm:$0xff]  }
   0x2   :  { %249 = vmatprep.subr.bf16.mxu0 %v6765_v0  ;;  %v6770_v4 = vld [vmem:[%s9986_s1 + $0xe8] ss:$16 sps:$4 sm:$0xff]   ;;  %292 = vmatprep.subr.bf16.mxu1 %v6767_v2  ;;  %v6771_v5 = vld [vmem:[%s9986_s1 + $0xc4] ss:$16 sps:$4 sm:$0xff]   ;;  %v6773_v6 = vld [vmem:[%s9986_s1 + $0xcc] ss:$16 sps:$4 sm:$0xff]  }
   0x3   :  { %250 = vmatpush1.bf16.msra.mxu0 %v6769_v3  ;;  %293 = vmatpush1.bf16.msra.mxu1 %v6770_v4  ;;  %v6775_v7 = vld [vmem:[%s9986_s1 + $0xc0] ss:$16 sps:$4 sm:$0xff]   ;;  %v6776_v8 = vld [vmem:[%s9986_s1 + $0xc8] ss:$16 sps:$4 sm:$0xff]   ;;  %v6777_v9 = vld [vmem:[%s9986_s1 + $0xa4] ss:$16 sps:$4 sm:$0xff]  }
   0x4   :  { %251 = vmatprep.subr.bf16.mxu0 %v6771_v5  ;;  %294 = vmatprep.subr.bf16.mxu1 %v6773_v6  ;;  %v6779_v10 = vld [vmem:[%s9986_s1 + $0xac] ss:$16 sps:$4 sm:$0xff]   ;;  %v6781_v11 = vld [vmem:[%s9986_s1 + $0xa0] ss:$16 sps:$4 sm:$0xff]   ;;  %v6782_v12 = vld [vmem:[%s9986_s1 + $0xa8] ss:$16 sps:$4 sm:$0xff]  }
   0x5   :  { %v6783_v13 = vld [vmem:[%s9986_s1 + $0x84] ss:$16 sps:$4 sm:$0xff]   ;;  %v6785_v14 = vld [vmem:[%s9986_s1 + $0x8c] ss:$16 sps:$4 sm:$0xff]   ;;  %v6787_v15 = vld [vmem:[%s9986_s1 + $0x80] ss:$16 sps:$4 sm:$0xff]  }
   0x6   :  { %v6788_v16 = vld [vmem:[%s9986_s1 + $0x88] ss:$16 sps:$4 sm:$0xff]   ;;  %v6789_v17 = vld [vmem:[%s9986_s1 + $0x64] ss:$16 sps:$4 sm:$0xff]   ;;  %v6791_v18 = vld [vmem:[%s9986_s1 + $0x6c] ss:$16 sps:$4 sm:$0xff]  }
   0x7   :  { %252 = vmatpush1.bf16.msra.mxu0 %v6775_v7  ;;  %295 = vmatpush1.bf16.msra.mxu1 %v6776_v8  ;;  %v6793_v19 = vld [vmem:[%s9986_s1 + $0x60] ss:$16 sps:$4 sm:$0xff]   ;;  %v6794_v20 = vld [vmem:[%s9986_s1 + $0x68] ss:$16 sps:$4 sm:$0xff]   ;;  %v6795_v21 = vld [vmem:[%s9986_s1 + $0x44] ss:$16 sps:$4 sm:$0xff]  }
   0x8   :  { %253 = vmatprep.subr.bf16.mxu0 %v6777_v9  ;;  %296 = vmatprep.subr.bf16.mxu1 %v6779_v10  ;;  %v6797_v22 = vld [vmem:[%s9986_s1 + $0x4c] ss:$16 sps:$4 sm:$0xff]   ;;  %v6799_v23 = vld [vmem:[%s9986_s1 + $0x40] ss:$16 sps:$4 sm:$0xff]   ;;  %v6800_v24 = vld [vmem:[%s9986_s1 + $0x48] ss:$16 sps:$4 sm:$0xff]  }
   0x9   :  { %v6801_v25 = vld [vmem:[%s9986_s1 + $0x24] ss:$16 sps:$4 sm:$0xff]   ;;  %v6803_v26 = vld [vmem:[%s9986_s1 + $0x2c] ss:$16 sps:$4 sm:$0xff]   ;;  %v6805_v27 = vld [vmem:[%s9986_s1 + $0x20] ss:$16 sps:$4 sm:$0xff]  }
   0xa   :  { %v6806_v28 = vld [vmem:[%s9986_s1 + $0x28] ss:$16 sps:$4 sm:$0xff]   ;;  %v6807_v29 = vld [vmem:[%s9986_s1 + $0x4] ss:$16 sps:$4 sm:$0xff]   ;;  %v6809_v30 = vld [vmem:[%s9986_s1 + $0xc] ss:$16 sps:$4 sm:$0xff]  }
   0xb   :  { %254 = vmatpush1.bf16.msra.mxu0 %v6781_v11  ;;  %297 = vmatpush1.bf16.msra.mxu1 %v6782_v12  ;;  %v411_v31 = vld [vmem:[%s9988_s3 + $0x1c0] sm:$0xff]  ;;  %v6812_v36 = vld [vmem:[%s9986_s1 + $0x8] ss:$16 sps:$4 sm:$0xff]  }
   0xc   :  { %255 = vmatprep.subr.bf16.mxu0 %v6783_v13  ;;  %298 = vmatprep.subr.bf16.mxu1 %v6785_v14  ;;  %v415_v32 = vld [vmem:[%s9988_s3 + $0x1e0] sm:$0xff] }
   0xd   :  { %v539_v33 = vld [vmem:[%s9988_s3 + $0x5c0] sm:$0xff]  ;;  %v6029_v37 = vcombine.high %v411_v31, %v415_v32  ;;  %v6028_v44 = vcombine.low %v411_v31, %v415_v32 }
   0xe   :  { %v543_v34 = vld [vmem:[%s9988_s3 + $0x5e0] sm:$0xff] }
   0xf   :  { %256 = vmatpush1.bf16.msra.mxu0 %v6787_v15  ;;  %299 = vmatpush1.bf16.msra.mxu1 %v6788_v16  ;;  %v6811_v35 = vld [vmem:[%s9986_s1] ss:$16 sps:$4 sm:$0xff]   ;;  %v6157_v38 = vcombine.high %v539_v33, %v543_v34  ;;  %v6156_v45 = vcombine.low %v539_v33, %v543_v34 }
  0x10   :  { %257 = vmatprep.subr.bf16.mxu0 %v6789_v17  ;;  %300 = vmatprep.subr.bf16.mxu1 %v6791_v18  ;;  %v403_v39 = vld [vmem:[%s9988_s3 + $0x180] sm:$0xff] }
  0x11   :  { %v407_v40 = vld [vmem:[%s9988_s3 + $0x1a0] sm:$0xff] }
  0x12   :  { %v531_v41 = vld [vmem:[%s9988_s3 + $0x580] sm:$0xff]  ;;  %v6021_v46 = vcombine.high %v403_v39, %v407_v40  ;;  %v6020_v52 = vcombine.low %v403_v39, %v407_v40 }
  0x13   :  { %258 = vmatpush1.bf16.msra.mxu0 %v6793_v19  ;;  %301 = vmatpush1.bf16.msra.mxu1 %v6794_v20  ;;  %v535_v42 = vld [vmem:[%s9988_s3 + $0x5a0] sm:$0xff] }
  0x14   :  { %259 = vmatprep.subr.bf16.mxu0 %v6795_v21  ;;  %302 = vmatprep.subr.bf16.mxu1 %v6797_v22  ;;  %v6813_v43 = vld [vmem:[%s9987_s0] sm:$0xff]   ;;  %v6149_v47 = vcombine.high %v531_v41, %v535_v42  ;;  %v6148_v53 = vcombine.low %v531_v41, %v535_v42 }
  0x15   :  { %v395_v48 = vld [vmem:[%s9988_s3 + $0x140] sm:$0xff] }
  0x16   :  { %v399_v49 = vld [vmem:[%s9988_s3 + $0x160] sm:$0xff] }
  0x17   :  { %260 = vmatpush1.bf16.msra.mxu0 %v6799_v23  ;;  %303 = vmatpush1.bf16.msra.mxu1 %v6800_v24  ;;  %v523_v50 = vld [vmem:[%s9988_s3 + $0x540] sm:$0xff]  ;;  %v6013_v54 = vcombine.high %v395_v48, %v399_v49  ;;  %v6012_v60 = vcombine.low %v395_v48, %v399_v49 }
  0x18   :  { %261 = vmatprep.subr.bf16.mxu0 %v6801_v25  ;;  %304 = vmatprep.subr.bf16.mxu1 %v6803_v26  ;;  %v527_v51 = vld [vmem:[%s9988_s3 + $0x560] sm:$0xff] }
  0x19   :  { %v6141_v55 = vcombine.high %v523_v50, %v527_v51  ;;  %v387_v56 = vld [vmem:[%s9988_s3 + $0x100] sm:$0xff]  ;;  %v6140_v61 = vcombine.low %v523_v50, %v527_v51 }
  0x1a   :  { %v391_v57 = vld [vmem:[%s9988_s3 + $0x120] sm:$0xff] }
  0x1b   :  { %262 = vmatpush1.bf16.msra.mxu0 %v6805_v27  ;;  %305 = vmatpush1.bf16.msra.mxu1 %v6806_v28  ;;  %v515_v58 = vld [vmem:[%s9988_s3 + $0x500] sm:$0xff]  ;;  %v6005_v62 = vcombine.high %v387_v56, %v391_v57  ;;  %v6004_v4 = vcombine.low %v387_v56, %v391_v57 }
  0x1c   :  { %263 = vmatprep.subr.bf16.mxu0 %v6807_v29  ;;  %306 = vmatprep.subr.bf16.mxu1 %v6809_v30  ;;  %v519_v59 = vld [vmem:[%s9988_s3 + $0x520] sm:$0xff] }
  0x1d   :  { %v6133_v63 = vcombine.high %v515_v58, %v519_v59  ;;  %v379_v0 = vld [vmem:[%s9988_s3 + $0xc0] sm:$0xff]  ;;  %v6132_v5 = vcombine.low %v515_v58, %v519_v59 }
  0x1e   :  { %v383_v1 = vld [vmem:[%s9988_s3 + $0xe0] sm:$0xff] }
  0x1f   :  { %264 = vmatpush1.bf16.msra.mxu0 %v6811_v35  ;;  %307 = vmatpush1.bf16.msra.mxu1 %v6812_v36  ;;  %v507_v2 = vld [vmem:[%s9988_s3 + $0x4c0] sm:$0xff]  ;;  %v5997_v6 = vcombine.high %v379_v0, %v383_v1  ;;  %v5996_v12 = vcombine.low %v379_v0, %v383_v1 }
  0x20   :  { %1933 = vmatprep.subr.bf16.mxu0 %v6029_v37  ;;  %1976 = vmatprep.subr.bf16.mxu1 %v6157_v38  ;;  %v511_v3 = vld [vmem:[%s9988_s3 + $0x4e0] sm:$0xff] }
  0x21   :  { %v6125_v7 = vcombine.high %v507_v2, %v511_v3  ;;  %v371_v8 = vld [vmem:[%s9988_s3 + $0x80] sm:$0xff]  ;;  %v6124_v13 = vcombine.low %v507_v2, %v511_v3 }
  0x22   :  { %282 = vmatmul.mubr.bf16.vlgmr.msra.gmra.mxu0 %v6813_v43  ;;  %325 = vmatmul.mubr.bf16.vlgmr.msra.gmra.mxu1 %v6813_v43  ;;  %v375_v9 = vld [vmem:[%s9988_s3 + $0xa0] sm:$0xff] }
  0x23   :  { %1934 = vmatpush1.bf16.msra.mxu0 %v6028_v44  ;;  %1977 = vmatpush1.bf16.msra.mxu1 %v6156_v45  ;;  %v499_v10 = vld [vmem:[%s9988_s3 + $0x480] sm:$0xff]  ;;  %v5989_v14 = vcombine.high %v371_v8, %v375_v9  ;;  %v5988_v20 = vcombine.low %v371_v8, %v375_v9 }
  0x24   :  { %1935 = vmatprep.subr.bf16.mxu0 %v6021_v46  ;;  %1978 = vmatprep.subr.bf16.mxu1 %v6149_v47  ;;  %v503_v11 = vld [vmem:[%s9988_s3 + $0x4a0] sm:$0xff] }
  0x25   :  { %v6117_v15 = vcombine.high %v499_v10, %v503_v11  ;;  %v363_v16 = vld [vmem:[%s9988_s3 + $0x40] sm:$0xff]  ;;  %v6116_v21 = vcombine.low %v499_v10, %v503_v11 }
  0x26   :  { %v367_v17 = vld [vmem:[%s9988_s3 + $0x60] sm:$0xff] }
  0x27   :  { %1936 = vmatpush1.bf16.msra.mxu0 %v6020_v52  ;;  %1979 = vmatpush1.bf16.msra.mxu1 %v6148_v53  ;;  %v491_v18 = vld [vmem:[%s9988_s3 + $0x440] sm:$0xff]  ;;  %v5981_v22 = vcombine.high %v363_v16, %v367_v17  ;;  %v5980_v28 = vcombine.low %v363_v16, %v367_v17 }
  0x28   :  { %1937 = vmatprep.subr.bf16.mxu0 %v6013_v54  ;;  %1980 = vmatprep.subr.bf16.mxu1 %v6141_v55  ;;  %v495_v19 = vld [vmem:[%s9988_s3 + $0x460] sm:$0xff] }
  0x29   :  { %v6109_v23 = vcombine.high %v491_v18, %v495_v19  ;;  %v355_v24 = vld [vmem:[%s9988_s3] sm:$0xff]  ;;  %v6108_v29 = vcombine.low %v491_v18, %v495_v19 }
  0x2a   :  { %v359_v25 = vld [vmem:[%s9988_s3 + $0x20] sm:$0xff] }
  0x2b   :  { %1938 = vmatpush1.bf16.msra.mxu0 %v6012_v60  ;;  %1981 = vmatpush1.bf16.msra.mxu1 %v6140_v61  ;;  %v483_v26 = vld [vmem:[%s9988_s3 + $0x400] sm:$0xff]  ;;  %v5973_v30 = vcombine.high %v355_v24, %v359_v25  ;;  %v5972_v36 = vcombine.low %v355_v24, %v359_v25 }
  0x2c   :  { %1939 = vmatprep.subr.bf16.mxu0 %v6005_v62  ;;  %1982 = vmatprep.subr.bf16.mxu1 %v6133_v63  ;;  %v487_v27 = vld [vmem:[%s9988_s3 + $0x420] sm:$0xff] }
  0x2d   :  { %v6101_v31 = vcombine.high %v483_v26, %v487_v27  ;;  %v475_v32 = vld [vmem:[%s9988_s3 + $0x3c0] sm:$0xff]  ;;  %v6100_v37 = vcombine.low %v483_v26, %v487_v27 }
  0x2e   :  { %v479_v33 = vld [vmem:[%s9988_s3 + $0x3e0] sm:$0xff] }
  0x2f   :  { %1940 = vmatpush1.bf16.msra.mxu0 %v6004_v4  ;;  %1983 = vmatpush1.bf16.msra.mxu1 %v6132_v5  ;;  %v603_v34 = vld [vmem:[%s9988_s3 + $0x7c0] sm:$0xff]  ;;  %v6093_v38 = vcombine.high %v475_v32, %v479_v33  ;;  %v6092_v44 = vcombine.low %v475_v32, %v479_v33 }
  0x30   :  { %1941 = vmatprep.subr.bf16.mxu0 %v5997_v6  ;;  %1984 = vmatprep.subr.bf16.mxu1 %v6125_v7  ;;  %v607_v35 = vld [vmem:[%s9988_s3 + $0x7e0] sm:$0xff] }
  0x31   :  { %v6221_v39 = vcombine.high %v603_v34, %v607_v35  ;;  %v467_v40 = vld [vmem:[%s9988_s3 + $0x380] sm:$0xff]  ;;  %v6220_v45 = vcombine.low %v603_v34, %v607_v35  ;;  %v7846_v34 = vld [vmem:[%s9988_s3 + $0x1c8] sm:$0xff] }
  0x32   :  { %v471_v41 = vld [vmem:[%s9988_s3 + $0x3a0] sm:$0xff]  ;;  %v7851_v35 = vld [vmem:[%s9988_s3 + $0x1e8] sm:$0xff] }
  0x33   :  { %1942 = vmatpush1.bf16.msra.mxu0 %v5996_v12  ;;  %1985 = vmatpush1.bf16.msra.mxu1 %v6124_v13  ;;  %v595_v42 = vld [vmem:[%s9988_s3 + $0x780] sm:$0xff]  ;;  %v6085_v46 = vcombine.high %v467_v40, %v471_v41  ;;  %v6084_v52 = vcombine.low %v467_v40, %v471_v41 }
  0x34   :  { %1943 = vmatprep.subr.bf16.mxu0 %v5989_v14  ;;  %1986 = vmatprep.subr.bf16.mxu1 %v6117_v15  ;;  %v599_v43 = vld [vmem:[%s9988_s3 + $0x7a0] sm:$0xff] }
  0x35   :  { %v6213_v47 = vcombine.high %v595_v42, %v599_v43  ;;  %v459_v48 = vld [vmem:[%s9988_s3 + $0x340] sm:$0xff]  ;;  %v6212_v53 = vcombine.low %v595_v42, %v599_v43  ;;  %v63_v42 = vlaneseq }
  0x36   :  { %v463_v49 = vld [vmem:[%s9988_s3 + $0x360] sm:$0xff] }
  0x37   :  { %1944 = vmatpush1.bf16.msra.mxu0 %v5988_v20  ;;  %1987 = vmatpush1.bf16.msra.mxu1 %v6116_v21  ;;  %v587_v50 = vld [vmem:[%s9988_s3 + $0x740] sm:$0xff]  ;;  %v6077_v54 = vcombine.high %v459_v48, %v463_v49  ;;  %v6076_v60 = vcombine.low %v459_v48, %v463_v49  ;;  %v7871_v43 = vshrl.u32 %v63_v42, 7 }
  0x38   :  { %1945 = vmatprep.subr.bf16.mxu0 %v5981_v22  ;;  %1988 = vmatprep.subr.bf16.mxu1 %v6109_v23  ;;  %v591_v51 = vld [vmem:[%s9988_s3 + $0x760] sm:$0xff] }
  0x39   :  { %v6205_v55 = vcombine.high %v587_v50, %v591_v51  ;;  %v451_v56 = vld [vmem:[%s9988_s3 + $0x300] sm:$0xff]  ;;  %v6204_v61 = vcombine.low %v587_v50, %v591_v51  ;;  %v7886_v48 = vsub.s32 2, %v7871_v43 }
  0x3a   :  { %v455_v57 = vld [vmem:[%s9988_s3 + $0x320] sm:$0xff] }
  0x3b   :  { %1946 = vmatpush1.bf16.msra.mxu0 %v5980_v28  ;;  %1989 = vmatpush1.bf16.msra.mxu1 %v6108_v29  ;;  %v579_v58 = vld [vmem:[%s9988_s3 + $0x700] sm:$0xff]  ;;  %v6069_v62 = vcombine.high %v451_v56, %v455_v57  ;;  %v6068_v4 = vcombine.low %v451_v56, %v455_v57 }
  0x3c   :  { %1947 = vmatprep.subr.bf16.mxu0 %v5973_v30  ;;  %1990 = vmatprep.subr.bf16.mxu1 %v6101_v31  ;;  %v583_v59 = vld [vmem:[%s9988_s3 + $0x720] sm:$0xff] }
  0x3d   :  { %v6197_v63 = vcombine.high %v579_v58, %v583_v59  ;;  %v443_v0 = vld [vmem:[%s9988_s3 + $0x2c0] sm:$0xff]  ;;  %v6196_v5 = vcombine.low %v579_v58, %v583_v59 }
  0x3e   :  { %v447_v1 = vld [vmem:[%s9988_s3 + $0x2e0] sm:$0xff] }
  0x3f   :  { %1948 = vmatpush1.bf16.msra.mxu0 %v5972_v36  ;;  %1991 = vmatpush1.bf16.msra.mxu1 %v6100_v37  ;;  %v571_v2 = vld [vmem:[%s9988_s3 + $0x6c0] sm:$0xff]  ;;  %v6061_v6 = vcombine.high %v443_v0, %v447_v1  ;;  %v6060_v8 = vcombine.low %v443_v0, %v447_v1  ;;  %v7856_v36 = vld [vmem:[%s9988_s3 + $0x5c8] sm:$0xff]  ;;  %v6031_v37 = vcombine.high %v7846_v34, %v7851_v35 }
  0x40   :  { %1949 = vmatprep.subr.bf16.mxu0 %v6093_v38  ;;  %1992 = vmatprep.subr.bf16.mxu1 %v6221_v39  ;;  %v575_v3 = vld [vmem:[%s9988_s3 + $0x6e0] sm:$0xff]  ;;  %v7863_v38 = vld [vmem:[%s9988_s3 + $0x5e8] sm:$0xff]  ;;  %v6030_v39 = vcombine.low %v7846_v34, %v7851_v35 }
  0x41   :  { %v6189_v7 = vcombine.high %v571_v2, %v575_v3  ;;  %v6188_v9 = vcombine.low %v571_v2, %v575_v3  ;;  %v435_v10 = vld [vmem:[%s9988_s3 + $0x280] sm:$0xff]  ;;  %v6158_v40 = vcombine.low %v7856_v36, %v7863_v38  ;;  %v6159_v41 = vcombine.high %v7856_v36, %v7863_v38  ;;  %v392_v34 = vld [vmem:[%s9988_s3 + $0x128] sm:$0xff] }
  0x42   :  { %v439_v11 = vld [vmem:[%s9988_s3 + $0x2a0] sm:$0xff]  ;;  %v516_v35 = vld [vmem:[%s9988_s3 + $0x508] sm:$0xff] }
  0x43   :  { %1950 = vmatpush2.bf16.msra.mxu0 %v6092_v44  ;;  %1993 = vmatpush2.bf16.msra.mxu1 %v6220_v45  ;;  %v563_v12 = vld [vmem:[%s9988_s3 + $0x680] sm:$0xff]  ;;  %v6053_v13 = vcombine.high %v435_v10, %v439_v11  ;;  %v6052_v15 = vcombine.low %v435_v10, %v439_v11  ;;  %v7874_v44 = vsub.s32 0, %v7871_v43  ;;  %v520_v36 = vld [vmem:[%s9988_s3 + $0x528] sm:$0xff] }
  0x44   :  { %1951 = vmatprep.subr.bf16.mxu0 %v6085_v46  ;;  %1994 = vmatprep.subr.bf16.mxu1 %v6213_v47  ;;  %v567_v14 = vld [vmem:[%s9988_s3 + $0x6a0] sm:$0xff]  ;;  %v7880_v46 = vsub.s32 1, %v7871_v43  ;;  %v7883_v47 = vsub.s32 3, %v7871_v43 }
  0x45   :  { %v6180_v16 = vcombine.low %v563_v12, %v567_v14  ;;  %v6181_v17 = vcombine.high %v563_v12, %v567_v14  ;;  %v427_v18 = vld [vmem:[%s9988_s3 + $0x240] sm:$0xff] }
  0x46   :  { %v431_v19 = vld [vmem:[%s9988_s3 + $0x260] sm:$0xff] }
  0x47   :  { %1952 = vmatpush2.bf16.msra.mxu0 %v6084_v52  ;;  %1995 = vmatpush2.bf16.msra.mxu1 %v6212_v53  ;;  %v555_v20 = vld [vmem:[%s9988_s3 + $0x640] sm:$0xff]  ;;  %v6045_v21 = vcombine.high %v427_v18, %v431_v19  ;;  %v6044_v23 = vcombine.low %v427_v18, %v431_v19  ;;  %v404_v19 = vld [vmem:[%s9988_s3 + $0x188] sm:$0xff] }
  0x48   :  { %1953 = vmatprep.subr.bf16.mxu0 %v6077_v54  ;;  %1996 = vmatprep.subr.bf16.mxu1 %v6205_v55  ;;  %v559_v22 = vld [vmem:[%s9988_s3 + $0x660] sm:$0xff] }
  0x49   :  { %v6172_v24 = vcombine.low %v555_v20, %v559_v22  ;;  %v6173_v25 = vcombine.high %v555_v20, %v559_v22  ;;  %v419_v26 = vld [vmem:[%s9988_s3 + $0x200] sm:$0xff]  ;;  %v408_v22 = vld [vmem:[%s9988_s3 + $0x1a8] sm:$0xff] }
  0x4a   :  { %v423_v27 = vld [vmem:[%s9988_s3 + $0x220] sm:$0xff] }
  0x4b   :  { %1954 = vmatpush2.bf16.msra.mxu0 %v6076_v60  ;;  %1997 = vmatpush2.bf16.msra.mxu1 %v6204_v61  ;;  %v547_v28 = vld [vmem:[%s9988_s3 + $0x600] sm:$0xff]  ;;  %v6037_v29 = vcombine.high %v419_v26, %v423_v27  ;;  %v6036_v31 = vcombine.low %v419_v26, %v423_v27 }
  0x4c   :  { %1955 = vmatprep.subr.bf16.mxu0 %v6069_v62  ;;  %1998 = vmatprep.subr.bf16.mxu1 %v6197_v63  ;;  %v551_v30 = vld [vmem:[%s9988_s3 + $0x620] sm:$0xff] }
  0x4d   :  { %v6164_v32 = vcombine.low %v547_v28, %v551_v30  ;;  %v6165_v33 = vcombine.high %v547_v28, %v551_v30  ;;  %v61_v45 = vld [vmem:[%s9989_s2] sm:$0xf]  ;;  %v6023_v30 = vcombine.high %v404_v19, %v408_v22 }
  0x4e   :  { %v66_v49 = vrot.slane %v61_v45, %v7874_v44  ;;  %v70_v50 = vrot.slane %v61_v45, %v7880_v46  ;;  %v78_v51 = vrot.slane %v61_v45, %v7883_v47  ;;  %v74_v53 = vrot.slane %v61_v45, %v7886_v48 }
  0x4f   :  { %1956 = vmatpush2.bf16.msra.mxu0 %v6068_v4  ;;  %1999 = vmatpush2.bf16.msra.mxu1 %v6196_v5 }
  0x50   :  { %1957 = vmatprep.subr.bf16.mxu0 %v6061_v6  ;;  %2000 = vmatprep.subr.bf16.mxu1 %v6189_v7 }
  0x53   :  { %1958 = vmatpush2.bf16.msra.mxu0 %v6060_v8  ;;  %2001 = vmatpush2.bf16.msra.mxu1 %v6188_v9 }
  0x54   :  { %1959 = vmatprep.subr.bf16.mxu0 %v6053_v13  ;;  %2002 = vmatprep.subr.bf16.mxu1 %v6181_v17 }
  0x57   :  { %1960 = vmatpush2.bf16.msra.mxu0 %v6052_v15  ;;  %2003 = vmatpush2.bf16.msra.mxu1 %v6180_v16 }
  0x58   :  { %1961 = vmatprep.subr.bf16.mxu0 %v6045_v21  ;;  %2004 = vmatprep.subr.bf16.mxu1 %v6173_v25 }
  0x5b   :  { %1962 = vmatpush2.bf16.msra.mxu0 %v6044_v23  ;;  %2005 = vmatpush2.bf16.msra.mxu1 %v6172_v24  ;;  %v532_v23 = vld [vmem:[%s9988_s3 + $0x588] sm:$0xff] }
  0x5c   :  { %1963 = vmatprep.subr.bf16.mxu0 %v6037_v29  ;;  %2006 = vmatprep.subr.bf16.mxu1 %v6165_v33  ;;  %v536_v24 = vld [vmem:[%s9988_s3 + $0x5a8] sm:$0xff] }
  0x5d   :  { %v396_v29 = vld [vmem:[%s9988_s3 + $0x148] sm:$0xff]  ;;  %v6150_v42 = vcombine.low %v532_v23, %v536_v24 }
  0x5e   :  { %v524_v33 = vld [vmem:[%s9988_s3 + $0x548] sm:$0xff] }
  0x5f   :  { %1964 = vmatpush2.bf16.msra.mxu0 %v6036_v31  ;;  %2007 = vmatpush2.bf16.msra.mxu1 %v6164_v32  ;;  %v6151_v31 = vcombine.high %v532_v23, %v536_v24  ;;  %v400_v32 = vld [vmem:[%s9988_s3 + $0x168] sm:$0xff] }
  0x60   :  { %2019 = vmatprep.subr.bf16.mxu0 %v6031_v37  ;;  %2062 = vmatprep.subr.bf16.mxu1 %v6159_v41  ;;  %v528_v37 = vld [vmem:[%s9988_s3 + $0x568] sm:$0xff]  ;;  %v6022_v41 = vcombine.low %v404_v19, %v408_v22  ;;  %v6015_v45 = vcombine.high %v396_v29, %v400_v32  ;;  %v6014_v38 = vcombine.low %v396_v29, %v400_v32 }
  0x61   :  { %v604_v22 = vld [vmem:[%s9988_s3 + $0x7c8] sm:$0xff] }
  0x62   :  { %v608_v23 = vld [vmem:[%s9988_s3 + $0x7e8] sm:$0xff] }
  0x63   :  { %v468_v32 = vld [vmem:[%s9988_s3 + $0x388] sm:$0xff] }
  0xe2   :  { %v283_v52 = vpop.f32.mrf.mxu0  ;;  %v326_v54 = vpop.f32.mrf.mxu1 }
  0xe3   :  { %v284_v55 = vadd.f32 %v283_v52, %v66_v49  ;;  %v327_v60 = vadd.f32 %v326_v54, %v74_v53  ;;  %v380_v52 = vld [vmem:[%s9988_s3 + $0xc8] sm:$0xff] }
  0xe4   :  { %v285_v56 = vpop.f32.mrf.mxu0  ;;  %v328_v57 = vpop.f32.mrf.mxu1  ;;  %v508_v54 = vld [vmem:[%s9988_s3 + $0x4c8] sm:$0xff] }
  0xe5   :  { %v286_v58 = vadd.f32 %v285_v56, %v70_v50  ;;  %v329_v59 = vadd.f32 %v328_v57, %v78_v51  ;;  %v335_v63 = vmul.f32 0.2, %v284_v55  ;;  %v337_v8 = vmul.f32 0.2, %v327_v60 }
  0xe6   :  { %v287_v61 = vpop.f32.mrf.mxu0  ;;  %v330_v62 = vpop.f32.mrf.mxu1  ;;  %v6134_v57 = vcombine.low %v516_v35, %v520_v36 }
  0xe7   :  { %v288_v0 = vadd.f32 %v287_v61, %v66_v49  ;;  %v331_v1 = vadd.f32 %v330_v62, %v74_v53  ;;  %v336_v4 = vmul.f32 0.2, %v286_v58  ;;  %v338_v5 = vmul.f32 0.2, %v329_v59  ;;  %v384_v53 = vld [vmem:[%s9988_s3 + $0xe8] sm:$0xff] }
  0xe8   :  { %v289_v2 = vpop.f32.mrf.mxu0  ;;  %v332_v3 = vpop.f32.mrf.mxu1  ;;  %v343_v20 = vmax.f32 %v284_v55, %v335_v63  ;;  %v345_v21 = vmax.f32 %v327_v60, %v337_v8  ;;  %v6143_v49 = vcombine.high %v524_v33, %v528_v37  ;;  %v512_v55 = vld [vmem:[%s9988_s3 + $0x4e8] sm:$0xff] }
  0xe9   :  { %v290_v6 = vadd.f32 %v289_v2, %v70_v50  ;;  %v333_v7 = vadd.f32 %v332_v3, %v78_v51  ;;  %v339_v9 = vmul.f32 0.2, %v288_v0  ;;  %v341_v10 = vmul.f32 0.2, %v331_v1  ;;  %v388_v50 = vld [vmem:[%s9988_s3 + $0x108] sm:$0xff] }
  0xea   :  { %v344_v15 = vmax.f32 %v286_v58, %v336_v4  ;;  %v346_v16 = vmax.f32 %v329_v59, %v338_v5  ;;  %v6135_v51 = vcombine.high %v516_v35, %v520_v36  ;;  %v6006_v56 = vcombine.low %v388_v50, %v392_v34  ;;  %v372_v60 = vld [vmem:[%s9988_s3 + $0x88] sm:$0xff] }
  0xeb   :  { %v340_v11 = vmul.f32 0.2, %v290_v6  ;;  %v342_v12 = vmul.f32 0.2, %v333_v7  ;;  %v347_v13 = vmax.f32 %v288_v0, %v339_v9  ;;  %v349_v14 = vmax.f32 %v331_v1, %v341_v10  ;;  %v376_v61 = vld [vmem:[%s9988_s3 + $0xa8] sm:$0xff] }
  0xec   :  { %v5999_v58 = vcombine.high %v380_v52, %v384_v53  ;;  %v6127_v59 = vcombine.high %v508_v54, %v512_v55  ;;  %v500_v62 = vld [vmem:[%s9988_s3 + $0x488] sm:$0xff]  ;;  %v5998_v0 = vcombine.low %v380_v52, %v384_v53  ;;  %v6126_v1 = vcombine.low %v508_v54, %v512_v55 }
  0xed   :  { %v348_v17 = vmax.f32 %v290_v6, %v340_v11  ;;  %v350_v18 = vmax.f32 %v333_v7, %v342_v12  ;;  %v7908_v27 = vpack.c.bf16 %v347_v13, %v343_v20  ;;  %v7910_v28 = vpack.c.bf16 %v349_v14, %v345_v21  ;;  %v504_v63 = vld [vmem:[%s9988_s3 + $0x4a8] sm:$0xff] }
  0xee   :  { %v5991_v2 = vcombine.high %v372_v60, %v376_v61  ;;  %v6119_v3 = vcombine.high %v500_v62, %v504_v63  ;;  %v364_v4 = vld [vmem:[%s9988_s3 + $0x48] sm:$0xff]  ;;  %v5990_v8 = vcombine.low %v372_v60, %v376_v61  ;;  %v6118_v9 = vcombine.low %v500_v62, %v504_v63 }
  0xef   :  { %v7904_v25 = vpack.c.bf16 %v348_v17, %v344_v15  ;;  %v7906_v26 = vpack.c.bf16 %v350_v18, %v346_v16  ;;  %v368_v5 = vld [vmem:[%s9988_s3 + $0x68] sm:$0xff] }
  0xf0   :  { %v492_v6 = vld [vmem:[%s9988_s3 + $0x448] sm:$0xff]  ;;  %v5983_v10 = vcombine.high %v364_v4, %v368_v5  ;;  %v5982_v16 = vcombine.low %v364_v4, %v368_v5 }
  0xf1   :  { %1965 = vmatprep.mubr.bf16.mxu0 %v7904_v25  ;;  %2008 = vmatprep.mubr.bf16.mxu1 %v7906_v26  ;;  %v496_v7 = vld [vmem:[%s9988_s3 + $0x468] sm:$0xff] }
  0xf2   :  { %1966 = vmatmul.mubr.bf16.vlgmr.msra.gmra.mxu0 %v7908_v27  ;;  %2009 = vmatmul.mubr.bf16.vlgmr.msra.gmra.mxu1 %v7910_v28  ;;  %v6111_v11 = vcombine.high %v492_v6, %v496_v7  ;;  %v356_v12 = vld [vmem:[%s9988_s3 + $0x8] sm:$0xff]  ;;  %v6110_v17 = vcombine.low %v492_v6, %v496_v7 }
  0xf3   :  { %2020 = vmatpush1.bf16.msra.mxu0 %v6030_v39  ;;  %2063 = vmatpush1.bf16.msra.mxu1 %v6158_v40  ;;  %v6142_v39 = vcombine.low %v524_v33, %v528_v37  ;;  %v6007_v40 = vcombine.high %v388_v50, %v392_v34  ;;  %v360_v13 = vld [vmem:[%s9988_s3 + $0x28] sm:$0xff] }
  0xf4   :  { %2051 = vmatprep.mubr.bf16.mxu0 %v7904_v25  ;;  %2094 = vmatprep.mubr.bf16.mxu1 %v7906_v26  ;;  %v484_v14 = vld [vmem:[%s9988_s3 + $0x408] sm:$0xff]  ;;  %v5975_v18 = vcombine.high %v356_v12, %v360_v13  ;;  %v5974_v24 = vcombine.low %v356_v12, %v360_v13 }
  0xf5   :  { %2021 = vmatprep.subr.bf16.mxu0 %v6023_v30  ;;  %2064 = vmatprep.subr.bf16.mxu1 %v6151_v31  ;;  %v488_v15 = vld [vmem:[%s9988_s3 + $0x428] sm:$0xff]  ;;  %v6223_v31 = vcombine.high %v604_v22, %v608_v23 }
  0xf6   :  { %v6103_v19 = vcombine.high %v484_v14, %v488_v15  ;;  %v476_v20 = vld [vmem:[%s9988_s3 + $0x3c8] sm:$0xff]  ;;  %v6102_v29 = vcombine.low %v484_v14, %v488_v15 }
  0xf7   :  { %2022 = vmatpush1.bf16.msra.mxu0 %v6022_v41  ;;  %2065 = vmatpush1.bf16.msra.mxu1 %v6150_v42  ;;  %v480_v21 = vld [vmem:[%s9988_s3 + $0x3e8] sm:$0xff] }
  0xf8   :  { %2023 = vmatprep.subr.bf16.mxu0 %v6015_v45  ;;  %2066 = vmatprep.subr.bf16.mxu1 %v6143_v49  ;;  %v6095_v30 = vcombine.high %v476_v20, %v480_v21  ;;  %v472_v33 = vld [vmem:[%s9988_s3 + $0x3a8] sm:$0xff]  ;;  %v6094_v42 = vcombine.low %v476_v20, %v480_v21  ;;  %v6222_v45 = vcombine.low %v604_v22, %v608_v23 }
  0xf9   :  { %v596_v37 = vld [vmem:[%s9988_s3 + $0x788] sm:$0xff]  ;;  %v6087_v49 = vcombine.high %v468_v32, %v472_v33 }
  0xfa   :  { %v600_v41 = vld [vmem:[%s9988_s3 + $0x7a8] sm:$0xff] }
  0xfb   :  { %2024 = vmatpush1.bf16.msra.mxu0 %v6014_v38  ;;  %2067 = vmatpush1.bf16.msra.mxu1 %v6142_v39  ;;  %v6215_v50 = vcombine.high %v596_v37, %v600_v41  ;;  %v460_v34 = vld [vmem:[%s9988_s3 + $0x348] sm:$0xff]  ;;  %v6086_v39 = vcombine.low %v468_v32, %v472_v33  ;;  %v413_v33 = vld [vmem:[%s9988_s3 + $0x1d0] sm:$0xff] }
  0xfc   :  { %2025 = vmatprep.subr.bf16.mxu0 %v6007_v40  ;;  %2068 = vmatprep.subr.bf16.mxu1 %v6135_v51  ;;  %v464_v35 = vld [vmem:[%s9988_s3 + $0x368] sm:$0xff]  ;;  %v6214_v40 = vcombine.low %v596_v37, %v600_v41  ;;  %v417_v37 = vld [vmem:[%s9988_s3 + $0x1f0] sm:$0xff] }
  0xfd   :  { %v588_v36 = vld [vmem:[%s9988_s3 + $0x748] sm:$0xff]  ;;  %v6079_v51 = vcombine.high %v460_v34, %v464_v35  ;;  %v541_v41 = vld [vmem:[%s9988_s3 + $0x5d0] sm:$0xff] }
  0xfe   :  { %v592_v38 = vld [vmem:[%s9988_s3 + $0x768] sm:$0xff] }
  0xff   :  { %2026 = vmatpush1.bf16.msra.mxu0 %v6006_v56  ;;  %2069 = vmatpush1.bf16.msra.mxu1 %v6134_v57  ;;  %v6207_v52 = vcombine.high %v588_v36, %v592_v38  ;;  %v452_v53 = vld [vmem:[%s9988_s3 + $0x308] sm:$0xff]  ;;  %v6078_v57 = vcombine.low %v460_v34, %v464_v35  ;;  %v405_v35 = vld [vmem:[%s9988_s3 + $0x190] sm:$0xff] }
 0x100   :  { %2027 = vmatprep.subr.bf16.mxu0 %v5999_v58  ;;  %2070 = vmatprep.subr.bf16.mxu1 %v6127_v59  ;;  %v456_v54 = vld [vmem:[%s9988_s3 + $0x328] sm:$0xff]  ;;  %v6206_v58 = vcombine.low %v588_v36, %v592_v38  ;;  %v409_v36 = vld [vmem:[%s9988_s3 + $0x1b0] sm:$0xff] }
 0x101   :  { %v580_v55 = vld [vmem:[%s9988_s3 + $0x708] sm:$0xff]  ;;  %v6071_v59 = vcombine.high %v452_v53, %v456_v54  ;;  %v533_v38 = vld [vmem:[%s9988_s3 + $0x590] sm:$0xff] }
 0x102   :  { %v584_v56 = vld [vmem:[%s9988_s3 + $0x728] sm:$0xff] }
 0x103   :  { %2028 = vmatpush1.bf16.msra.mxu0 %v5998_v0  ;;  %2071 = vmatpush1.bf16.msra.mxu1 %v6126_v1  ;;  %v6199_v60 = vcombine.high %v580_v55, %v584_v56  ;;  %v444_v61 = vld [vmem:[%s9988_s3 + $0x2c8] sm:$0xff]  ;;  %v6070_v1 = vcombine.low %v452_v53, %v456_v54  ;;  %v397_v54 = vld [vmem:[%s9988_s3 + $0x150] sm:$0xff] }
 0x104   :  { %2029 = vmatprep.subr.bf16.mxu0 %v5991_v2  ;;  %2072 = vmatprep.subr.bf16.mxu1 %v6119_v3  ;;  %v448_v62 = vld [vmem:[%s9988_s3 + $0x2e8] sm:$0xff]  ;;  %v6198_v2 = vcombine.low %v580_v55, %v584_v56  ;;  %v401_v55 = vld [vmem:[%s9988_s3 + $0x170] sm:$0xff] }
 0x105   :  { %v572_v63 = vld [vmem:[%s9988_s3 + $0x6c8] sm:$0xff]  ;;  %v6063_v3 = vcombine.high %v444_v61, %v448_v62  ;;  %v525_v56 = vld [vmem:[%s9988_s3 + $0x550] sm:$0xff] }
 0x106   :  { %v576_v0 = vld [vmem:[%s9988_s3 + $0x6e8] sm:$0xff] }
 0x107   :  { %2030 = vmatpush1.bf16.msra.mxu0 %v5990_v8  ;;  %2073 = vmatpush1.bf16.msra.mxu1 %v6118_v9  ;;  %v6191_v4 = vcombine.high %v572_v63, %v576_v0  ;;  %v436_v5 = vld [vmem:[%s9988_s3 + $0x288] sm:$0xff]  ;;  %v6062_v9 = vcombine.low %v444_v61, %v448_v62  ;;  %v6017_v62 = vcombine.high %v397_v54, %v401_v55 }
 0x108   :  { %2031 = vmatprep.subr.bf16.mxu0 %v5983_v10  ;;  %2074 = vmatprep.subr.bf16.mxu1 %v6111_v11  ;;  %v440_v6 = vld [vmem:[%s9988_s3 + $0x2a8] sm:$0xff]  ;;  %v6190_v10 = vcombine.low %v572_v63, %v576_v0  ;;  %v517_v63 = vld [vmem:[%s9988_s3 + $0x510] sm:$0xff] }
 0x109   :  { %v564_v7 = vld [vmem:[%s9988_s3 + $0x688] sm:$0xff]  ;;  %v6055_v11 = vcombine.high %v436_v5, %v440_v6 }
 0x10a   :  { %v568_v8 = vld [vmem:[%s9988_s3 + $0x6a8] sm:$0xff] }
 0x10b   :  { %2032 = vmatpush1.bf16.msra.mxu0 %v5982_v16  ;;  %2075 = vmatpush1.bf16.msra.mxu1 %v6110_v17  ;;  %v6183_v12 = vcombine.high %v564_v7, %v568_v8  ;;  %v428_v13 = vld [vmem:[%s9988_s3 + $0x248] sm:$0xff]  ;;  %v6054_v17 = vcombine.low %v436_v5, %v440_v6 }
 0x10c   :  { %2033 = vmatprep.subr.bf16.mxu0 %v5975_v18  ;;  %2076 = vmatprep.subr.bf16.mxu1 %v6103_v19  ;;  %v432_v14 = vld [vmem:[%s9988_s3 + $0x268] sm:$0xff]  ;;  %v6182_v18 = vcombine.low %v564_v7, %v568_v8  ;;  %v509_v7 = vld [vmem:[%s9988_s3 + $0x4d0] sm:$0xff] }
 0x10d   :  { %v556_v15 = vld [vmem:[%s9988_s3 + $0x648] sm:$0xff]  ;;  %v6047_v19 = vcombine.high %v428_v13, %v432_v14 }
 0x10e   :  { %v560_v16 = vld [vmem:[%s9988_s3 + $0x668] sm:$0xff] }
 0x10f   :  { %2034 = vmatpush1.bf16.msra.mxu0 %v5974_v24  ;;  %2077 = vmatpush1.bf16.msra.mxu1 %v6102_v29  ;;  %v6175_v20 = vcombine.high %v556_v15, %v560_v16  ;;  %v420_v21 = vld [vmem:[%s9988_s3 + $0x208] sm:$0xff]  ;;  %v6046_v29 = vcombine.low %v428_v13, %v432_v14 }
 0x110   :  { %2035 = vmatprep.subr.bf16.mxu0 %v6095_v30  ;;  %2078 = vmatprep.subr.bf16.mxu1 %v6223_v31  ;;  %v424_v22 = vld [vmem:[%s9988_s3 + $0x228] sm:$0xff]  ;;  %v6174_v30 = vcombine.low %v556_v15, %v560_v16  ;;  %v501_v15 = vld [vmem:[%s9988_s3 + $0x490] sm:$0xff] }
 0x111   :  { %v548_v23 = vld [vmem:[%s9988_s3 + $0x608] sm:$0xff]  ;;  %v6039_v31 = vcombine.high %v420_v21, %v424_v22 }
 0x112   :  { %v552_v24 = vld [vmem:[%s9988_s3 + $0x628] sm:$0xff] }
 0x113   :  { %2036 = vmatpush2.bf16.msra.mxu0 %v6094_v42  ;;  %2079 = vmatpush2.bf16.msra.mxu1 %v6222_v45  ;;  %v6167_v32 = vcombine.high %v548_v23, %v552_v24  ;;  %v545_v42 = vld [vmem:[%s9988_s3 + $0x5f0] sm:$0xff]  ;;  %v6038_v45 = vcombine.low %v420_v21, %v424_v22 }
 0x114   :  { %2037 = vmatprep.subr.bf16.mxu0 %v6087_v49  ;;  %2080 = vmatprep.subr.bf16.mxu1 %v6215_v50  ;;  %v6166_v49 = vcombine.low %v548_v23, %v552_v24  ;;  %v6033_v50 = vcombine.high %v413_v33, %v417_v37  ;;  %v6161_v34 = vcombine.high %v541_v41, %v545_v42  ;;  %v493_v24 = vld [vmem:[%s9988_s3 + $0x450] sm:$0xff] }
 0x117   :  { %2038 = vmatpush2.bf16.msra.mxu0 %v6086_v39  ;;  %2081 = vmatpush2.bf16.msra.mxu1 %v6214_v40  ;;  %v537_v39 = vld [vmem:[%s9988_s3 + $0x5b0] sm:$0xff]  ;;  %v6032_v40 = vcombine.low %v413_v33, %v417_v37 }
 0x118   :  { %2039 = vmatprep.subr.bf16.mxu0 %v6079_v51  ;;  %2082 = vmatprep.subr.bf16.mxu1 %v6207_v52  ;;  %v6160_v51 = vcombine.low %v541_v41, %v545_v42  ;;  %v6025_v52 = vcombine.high %v405_v35, %v409_v36  ;;  %v6153_v53 = vcombine.high %v533_v38, %v537_v39  ;;  %v485_v41 = vld [vmem:[%s9988_s3 + $0x410] sm:$0xff] }
 0x119   :  { %v6152_v61 = vcombine.low %v533_v38, %v537_v39  ;;  %v489_v42 = vld [vmem:[%s9988_s3 + $0x430] sm:$0xff] }
 0x11a   :  { %v605_v38 = vld [vmem:[%s9988_s3 + $0x7d0] sm:$0xff] }
 0x11b   :  { %2040 = vmatpush2.bf16.msra.mxu0 %v6078_v57  ;;  %2083 = vmatpush2.bf16.msra.mxu1 %v6206_v58  ;;  %v529_v57 = vld [vmem:[%s9988_s3 + $0x570] sm:$0xff]  ;;  %v6024_v58 = vcombine.low %v405_v35, %v409_v36 }
 0x11c   :  { %2041 = vmatprep.subr.bf16.mxu0 %v6071_v59  ;;  %2084 = vmatprep.subr.bf16.mxu1 %v6199_v60  ;;  %v389_v59 = vld [vmem:[%s9988_s3 + $0x110] sm:$0xff]  ;;  %v6145_v0 = vcombine.high %v525_v56, %v529_v57  ;;  %v6144_v5 = vcombine.low %v525_v56, %v529_v57 }
 0x11d   :  { %v393_v60 = vld [vmem:[%s9988_s3 + $0x130] sm:$0xff] }
 0x11e   :  { %v6009_v6 = vcombine.high %v389_v59, %v393_v60  ;;  %v609_v39 = vld [vmem:[%s9988_s3 + $0x7f0] sm:$0xff] }
 0x11f   :  { %2042 = vmatpush2.bf16.msra.mxu0 %v6070_v1  ;;  %2085 = vmatpush2.bf16.msra.mxu1 %v6198_v2  ;;  %v521_v1 = vld [vmem:[%s9988_s3 + $0x530] sm:$0xff]  ;;  %v6016_v2 = vcombine.low %v397_v54, %v401_v55  ;;  %v6104_v54 = vcombine.low %v485_v41, %v489_v42 }
 0x120   :  { %2043 = vmatprep.subr.bf16.mxu0 %v6063_v3  ;;  %2086 = vmatprep.subr.bf16.mxu1 %v6191_v4  ;;  %v381_v3 = vld [vmem:[%s9988_s3 + $0xd0] sm:$0xff]  ;;  %v6137_v8 = vcombine.high %v517_v63, %v521_v1  ;;  %v6136_v13 = vcombine.low %v517_v63, %v521_v1 }
 0x121   :  { %v385_v4 = vld [vmem:[%s9988_s3 + $0xf0] sm:$0xff] }
 0x122   :  { %v6001_v14 = vcombine.high %v381_v3, %v385_v4  ;;  %v597_v56 = vld [vmem:[%s9988_s3 + $0x790] sm:$0xff] }
 0x123   :  { %2044 = vmatpush2.bf16.msra.mxu0 %v6062_v9  ;;  %2087 = vmatpush2.bf16.msra.mxu1 %v6190_v10  ;;  %v513_v9 = vld [vmem:[%s9988_s3 + $0x4f0] sm:$0xff]  ;;  %v6008_v10 = vcombine.low %v389_v59, %v393_v60 }
 0x124   :  { %2045 = vmatprep.subr.bf16.mxu0 %v6055_v11  ;;  %2088 = vmatprep.subr.bf16.mxu1 %v6183_v12  ;;  %v373_v11 = vld [vmem:[%s9988_s3 + $0x90] sm:$0xff]  ;;  %v6129_v16 = vcombine.high %v509_v7, %v513_v9  ;;  %v6128_v21 = vcombine.low %v509_v7, %v513_v9 }
 0x125   :  { %v377_v12 = vld [vmem:[%s9988_s3 + $0xb0] sm:$0xff] }
 0x126   :  { %v5993_v22 = vcombine.high %v373_v11, %v377_v12  ;;  %v601_v57 = vld [vmem:[%s9988_s3 + $0x7b0] sm:$0xff] }
 0x127   :  { %2046 = vmatpush2.bf16.msra.mxu0 %v6054_v17  ;;  %2089 = vmatpush2.bf16.msra.mxu1 %v6182_v18  ;;  %v505_v17 = vld [vmem:[%s9988_s3 + $0x4b0] sm:$0xff]  ;;  %v6000_v18 = vcombine.low %v381_v3, %v385_v4 }
 0x128   :  { %2047 = vmatprep.subr.bf16.mxu0 %v6047_v19  ;;  %2090 = vmatprep.subr.bf16.mxu1 %v6175_v20  ;;  %v365_v19 = vld [vmem:[%s9988_s3 + $0x50] sm:$0xff]  ;;  %v6121_v23 = vcombine.high %v501_v15, %v505_v17  ;;  %v6120_v33 = vcombine.low %v501_v15, %v505_v17 }
 0x129   :  { %v369_v20 = vld [vmem:[%s9988_s3 + $0x70] sm:$0xff] }
 0x12a   :  { %v5985_v37 = vcombine.high %v365_v19, %v369_v20  ;;  %v461_v60 = vld [vmem:[%s9988_s3 + $0x350] sm:$0xff] }
 0x12b   :  { %2048 = vmatpush2.bf16.msra.mxu0 %v6046_v29  ;;  %2091 = vmatpush2.bf16.msra.mxu1 %v6174_v30  ;;  %v497_v29 = vld [vmem:[%s9988_s3 + $0x470] sm:$0xff]  ;;  %v5992_v30 = vcombine.low %v373_v11, %v377_v12 }
 0x12c   :  { %2049 = vmatprep.subr.bf16.mxu0 %v6039_v31  ;;  %2092 = vmatprep.subr.bf16.mxu1 %v6167_v32  ;;  %v357_v31 = vld [vmem:[%s9988_s3 + $0x10] sm:$0xff]  ;;  %v6112_v35 = vcombine.low %v493_v24, %v497_v29 }
 0x12d   :  { %v361_v32 = vld [vmem:[%s9988_s3 + $0x30] sm:$0xff] }
 0x12e   :  { %v5977_v36 = vcombine.high %v357_v31, %v361_v32  ;;  %v593_v1 = vld [vmem:[%s9988_s3 + $0x770] sm:$0xff] }
 0x12f   :  { %2050 = vmatpush2.bf16.msra.mxu0 %v6038_v45  ;;  %2093 = vmatpush2.bf16.msra.mxu1 %v6166_v49  ;;  %v6113_v45 = vcombine.high %v493_v24, %v497_v29  ;;  %v5984_v49 = vcombine.low %v365_v19, %v369_v20  ;;  %v453_v4 = vld [vmem:[%s9988_s3 + $0x310] sm:$0xff] }
 0x130   :  { %2105 = vmatprep.subr.bf16.mxu0 %v6033_v50  ;;  %2148 = vmatprep.subr.bf16.mxu1 %v6161_v34  ;;  %v477_v50 = vld [vmem:[%s9988_s3 + $0x3d0] sm:$0xff] }
 0x131   :  { %v481_v34 = vld [vmem:[%s9988_s3 + $0x3f0] sm:$0xff] }
 0x132   :  { %2052 = vmatmul.mubr.bf16.vlgmr.msra.gmra.mxu0 %v7908_v27  ;;  %2095 = vmatmul.mubr.bf16.vlgmr.msra.gmra.mxu1 %v7910_v28  ;;  %v6097_v55 = vcombine.high %v477_v50, %v481_v34  ;;  %v6096_v59 = vcombine.low %v477_v50, %v481_v34  ;;  %v585_v9 = vld [vmem:[%s9988_s3 + $0x730] sm:$0xff] }
 0x133   :  { %2106 = vmatpush1.bf16.msra.mxu0 %v6032_v40  ;;  %2137 = vmatprep.mubr.bf16.mxu0 %v7904_v25  ;;  %v6105_v40 = vcombine.high %v485_v41, %v489_v42  ;;  %v445_v12 = vld [vmem:[%s9988_s3 + $0x2d0] sm:$0xff] }
 0x134   :  { %2149 = vmatpush1.bf16.msra.mxu1 %v6160_v51  ;;  %2180 = vmatprep.mubr.bf16.mxu1 %v7906_v26  ;;  %v5976_v51 = vcombine.low %v357_v31, %v361_v32  ;;  %v577_v17 = vld [vmem:[%s9988_s3 + $0x6f0] sm:$0xff] }
 0x135   :  { %2107 = vmatprep.subr.bf16.mxu0 %v6025_v52  ;;  %2150 = vmatprep.subr.bf16.mxu1 %v6153_v53  ;;  %v469_v52 = vld [vmem:[%s9988_s3 + $0x390] sm:$0xff] }
 0x136   :  { %v473_v53 = vld [vmem:[%s9988_s3 + $0x3b0] sm:$0xff] }
 0x137   :  { %2108 = vmatpush1.bf16.msra.mxu0 %v6024_v58  ;;  %v6225_v58 = vcombine.high %v605_v38, %v609_v39  ;;  %v6089_v63 = vcombine.high %v469_v52, %v473_v53  ;;  %v6088_v3 = vcombine.low %v469_v52, %v473_v53  ;;  %v437_v20 = vld [vmem:[%s9988_s3 + $0x290] sm:$0xff]  ;;  %v414_v53 = vld [vmem:[%s9988_s3 + $0x1d8] sm:$0xff] }
 0x138   :  { %2151 = vmatpush1.bf16.msra.mxu1 %v6152_v61  ;;  %2109 = vmatprep.subr.bf16.mxu0 %v6017_v62  ;;  %v465_v61 = vld [vmem:[%s9988_s3 + $0x370] sm:$0xff]  ;;  %v6224_v62 = vcombine.low %v605_v38, %v609_v39 }
 0x139   :  { %2152 = vmatprep.subr.bf16.mxu1 %v6145_v0  ;;  %v589_v0 = vld [vmem:[%s9988_s3 + $0x750] sm:$0xff]  ;;  %v6081_v7 = vcombine.high %v461_v60, %v465_v61  ;;  %v6080_v11 = vcombine.low %v461_v60, %v465_v61 }
 0x13a   :  { %v565_v24 = vld [vmem:[%s9988_s3 + $0x690] sm:$0xff] }
 0x13b   :  { %2110 = vmatpush1.bf16.msra.mxu0 %v6016_v2  ;;  %v6217_v2 = vcombine.high %v597_v56, %v601_v57  ;;  %v569_v29 = vld [vmem:[%s9988_s3 + $0x6b0] sm:$0xff] }
 0x13c   :  { %2153 = vmatpush1.bf16.msra.mxu1 %v6144_v5  ;;  %2111 = vmatprep.subr.bf16.mxu0 %v6009_v6  ;;  %v457_v5 = vld [vmem:[%s9988_s3 + $0x330] sm:$0xff]  ;;  %v6216_v6 = vcombine.low %v597_v56, %v601_v57  ;;  %v542_v57 = vld [vmem:[%s9988_s3 + $0x5d8] sm:$0xff] }
 0x13d   :  { %2154 = vmatprep.subr.bf16.mxu1 %v6137_v8  ;;  %v581_v8 = vld [vmem:[%s9988_s3 + $0x710] sm:$0xff]  ;;  %v6073_v15 = vcombine.high %v453_v4, %v457_v5  ;;  %v6072_v19 = vcombine.low %v453_v4, %v457_v5  ;;  %v398_v5 = vld [vmem:[%s9988_s3 + $0x158] sm:$0xff] }
 0x13e   :  { %v429_v32 = vld [vmem:[%s9988_s3 + $0x250] sm:$0xff] }
 0x13f   :  { %2112 = vmatpush1.bf16.msra.mxu0 %v6008_v10  ;;  %v6209_v10 = vcombine.high %v589_v0, %v593_v1  ;;  %v557_v42 = vld [vmem:[%s9988_s3 + $0x650] sm:$0xff] }
 0x140   :  { %2155 = vmatpush1.bf16.msra.mxu1 %v6136_v13  ;;  %2113 = vmatprep.subr.bf16.mxu0 %v6001_v14  ;;  %v449_v13 = vld [vmem:[%s9988_s3 + $0x2f0] sm:$0xff]  ;;  %v6208_v14 = vcombine.low %v589_v0, %v593_v1  ;;  %v410_v0 = vld [vmem:[%s9988_s3 + $0x1b8] sm:$0xff] }
 0x141   :  { %2156 = vmatprep.subr.bf16.mxu1 %v6129_v16  ;;  %v573_v16 = vld [vmem:[%s9988_s3 + $0x6d0] sm:$0xff]  ;;  %v6064_v31 = vcombine.low %v445_v12, %v449_v13 }
 0x142   :  { %v421_v34 = vld [vmem:[%s9988_s3 + $0x210] sm:$0xff] }
 0x143   :  { %2114 = vmatpush1.bf16.msra.mxu0 %v6000_v18  ;;  %v6201_v18 = vcombine.high %v581_v8, %v585_v9  ;;  %v549_v39 = vld [vmem:[%s9988_s3 + $0x610] sm:$0xff] }
 0x144   :  { %2157 = vmatpush1.bf16.msra.mxu1 %v6128_v21  ;;  %2115 = vmatprep.subr.bf16.mxu0 %v5993_v22  ;;  %v441_v21 = vld [vmem:[%s9988_s3 + $0x2b0] sm:$0xff]  ;;  %v6200_v22 = vcombine.low %v581_v8, %v585_v9  ;;  %v526_v8 = vld [vmem:[%s9988_s3 + $0x558] sm:$0xff] }
 0x145   :  { %2158 = vmatprep.subr.bf16.mxu1 %v6121_v23  ;;  %v6065_v23 = vcombine.high %v445_v12, %v449_v13  ;;  %v6057_v41 = vcombine.high %v437_v20, %v441_v21  ;;  %v6056_v50 = vcombine.low %v437_v20, %v441_v21  ;;  %v530_v9 = vld [vmem:[%s9988_s3 + $0x578] sm:$0xff] }
 0x146   :  { %v390_v13 = vld [vmem:[%s9988_s3 + $0x118] sm:$0xff] }
 0x147   :  { %2116 = vmatpush1.bf16.msra.mxu0 %v5992_v30  ;;  %v6193_v30 = vcombine.high %v573_v16, %v577_v17  ;;  %v386_v21 = vld [vmem:[%s9988_s3 + $0xf8] sm:$0xff] }
 0x148   :  { %2159 = vmatpush1.bf16.msra.mxu1 %v6120_v33  ;;  %2117 = vmatprep.subr.bf16.mxu0 %v5985_v37  ;;  %v433_v33 = vld [vmem:[%s9988_s3 + $0x270] sm:$0xff]  ;;  %v6192_v37 = vcombine.low %v573_v16, %v577_v17  ;;  %v518_v17 = vld [vmem:[%s9988_s3 + $0x518] sm:$0xff] }
 0x149   :  { %2160 = vmatprep.subr.bf16.mxu1 %v6113_v45  ;;  %v561_v45 = vld [vmem:[%s9988_s3 + $0x670] sm:$0xff]  ;;  %v6049_v38 = vcombine.high %v429_v32, %v433_v33  ;;  %v6048_v52 = vcombine.low %v429_v32, %v433_v33  ;;  %v378_v32 = vld [vmem:[%s9988_s3 + $0xb8] sm:$0xff] }
 0x14b   :  { %2118 = vmatpush1.bf16.msra.mxu0 %v5984_v49  ;;  %v6185_v49 = vcombine.high %v565_v24, %v569_v29 }
 0x14c   :  { %2161 = vmatpush1.bf16.msra.mxu1 %v6112_v35  ;;  %2119 = vmatprep.subr.bf16.mxu0 %v5977_v36  ;;  %v425_v35 = vld [vmem:[%s9988_s3 + $0x230] sm:$0xff]  ;;  %v6184_v36 = vcombine.low %v565_v24, %v569_v29  ;;  %v514_v29 = vld [vmem:[%s9988_s3 + $0x4f8] sm:$0xff] }
 0x14d   :  { %2162 = vmatprep.subr.bf16.mxu1 %v6105_v40  ;;  %v553_v40 = vld [vmem:[%s9988_s3 + $0x630] sm:$0xff]  ;;  %v6041_v56 = vcombine.high %v421_v34, %v425_v35  ;;  %v6040_v60 = vcombine.low %v421_v34, %v425_v35  ;;  %v370_v34 = vld [vmem:[%s9988_s3 + $0x78] sm:$0xff] }
 0x14e   :  { %v6168_v61 = vcombine.low %v549_v39, %v553_v40 }
 0x14f   :  { %2120 = vmatpush1.bf16.msra.mxu0 %v5976_v51  ;;  %v6177_v51 = vcombine.high %v557_v42, %v561_v45 }
 0x150   :  { %2163 = vmatpush1.bf16.msra.mxu1 %v6104_v54  ;;  %2121 = vmatprep.subr.bf16.mxu0 %v6097_v55  ;;  %v418_v54 = vld [vmem:[%s9988_s3 + $0x1f8] sm:$0xff]  ;;  %v6176_v55 = vcombine.low %v557_v42, %v561_v45 }
 0x151   :  { %2164 = vmatprep.subr.bf16.mxu1 %v6225_v58  ;;  %v546_v58 = vld [vmem:[%s9988_s3 + $0x5f8] sm:$0xff]  ;;  %v6034_v4 = vcombine.low %v414_v53, %v418_v54 }
 0x152   :  { %v6163_v1 = vcombine.high %v542_v57, %v546_v58  ;;  %v506_v45 = vld [vmem:[%s9988_s3 + $0x4b8] sm:$0xff] }
 0x153   :  { %2122 = vmatpush2.bf16.msra.mxu0 %v6096_v59  ;;  %v6169_v59 = vcombine.high %v549_v39, %v553_v40  ;;  %v498_v40 = vld [vmem:[%s9988_s3 + $0x478] sm:$0xff] }
 0x154   :  { %2165 = vmatpush2.bf16.msra.mxu1 %v6224_v62  ;;  %2123 = vmatprep.subr.bf16.mxu0 %v6089_v63  ;;  %v6035_v62 = vcombine.high %v414_v53, %v418_v54  ;;  %v406_v63 = vld [vmem:[%s9988_s3 + $0x198] sm:$0xff] }
 0x155   :  { %2166 = vmatprep.subr.bf16.mxu1 %v6217_v2  ;;  %v534_v2 = vld [vmem:[%s9988_s3 + $0x598] sm:$0xff]  ;;  %v6026_v12 = vcombine.low %v406_v63, %v410_v0 }
 0x157   :  { %2124 = vmatpush2.bf16.msra.mxu0 %v6088_v3  ;;  %v538_v3 = vld [vmem:[%s9988_s3 + $0x5b8] sm:$0xff] }
 0x158   :  { %2167 = vmatpush2.bf16.msra.mxu1 %v6216_v6  ;;  %2125 = vmatprep.subr.bf16.mxu0 %v6081_v7  ;;  %v402_v6 = vld [vmem:[%s9988_s3 + $0x178] sm:$0xff]  ;;  %v6162_v7 = vcombine.low %v542_v57, %v546_v58 }
 0x159   :  { %2168 = vmatprep.subr.bf16.mxu1 %v6209_v10  ;;  %v6027_v10 = vcombine.high %v406_v63, %v410_v0  ;;  %v6019_v16 = vcombine.high %v398_v5, %v402_v6  ;;  %v6018_v20 = vcombine.low %v398_v5, %v402_v6  ;;  %v486_v57 = vld [vmem:[%s9988_s3 + $0x418] sm:$0xff] }
 0x15a   :  { %v490_v58 = vld [vmem:[%s9988_s3 + $0x438] sm:$0xff] }
 0x15b   :  { %2126 = vmatpush2.bf16.msra.mxu0 %v6080_v11  ;;  %v6155_v11 = vcombine.high %v534_v2, %v538_v3  ;;  %v606_v0 = vld [vmem:[%s9988_s3 + $0x7d8] sm:$0xff]  ;;  %v6106_v6 = vcombine.low %v486_v57, %v490_v58 }
 0x15c   :  { %2169 = vmatpush2.bf16.msra.mxu1 %v6208_v14  ;;  %2127 = vmatprep.subr.bf16.mxu0 %v6073_v15  ;;  %v394_v14 = vld [vmem:[%s9988_s3 + $0x138] sm:$0xff]  ;;  %v6154_v15 = vcombine.low %v534_v2, %v538_v3  ;;  %v6107_v2 = vcombine.high %v486_v57, %v490_v58 }
 0x15d   :  { %2170 = vmatprep.subr.bf16.mxu1 %v6201_v18  ;;  %v6147_v18 = vcombine.high %v526_v8, %v530_v9  ;;  %v474_v5 = vld [vmem:[%s9988_s3 + $0x3b8] sm:$0xff] }
 0x15f   :  { %2128 = vmatpush2.bf16.msra.mxu0 %v6072_v19  ;;  %v522_v19 = vld [vmem:[%s9988_s3 + $0x538] sm:$0xff] }
 0x160   :  { %2171 = vmatpush2.bf16.msra.mxu1 %v6200_v22  ;;  %2129 = vmatprep.subr.bf16.mxu0 %v6065_v23  ;;  %v6011_v22 = vcombine.high %v390_v13, %v394_v14  ;;  %v510_v23 = vld [vmem:[%s9988_s3 + $0x4d8] sm:$0xff]  ;;  %v6139_v24 = vcombine.high %v518_v17, %v522_v19  ;;  %v6138_v33 = vcombine.low %v518_v17, %v522_v19 }
 0x161   :  { %2172 = vmatprep.subr.bf16.mxu1 %v6193_v30  ;;  %v6010_v30 = vcombine.low %v390_v13, %v394_v14  ;;  %v6131_v42 = vcombine.high %v510_v23, %v514_v29  ;;  %v6130_v35 = vcombine.low %v510_v23, %v514_v29  ;;  %v466_v13 = vld [vmem:[%s9988_s3 + $0x378] sm:$0xff] }
 0x162   :  { %v594_v17 = vld [vmem:[%s9988_s3 + $0x778] sm:$0xff] }
 0x163   :  { %2130 = vmatpush2.bf16.msra.mxu0 %v6064_v31  ;;  %v374_v31 = vld [vmem:[%s9988_s3 + $0x98] sm:$0xff] }
 0x164   :  { %2173 = vmatpush2.bf16.msra.mxu1 %v6192_v37  ;;  %2131 = vmatprep.subr.bf16.mxu0 %v6057_v41  ;;  %v502_v41 = vld [vmem:[%s9988_s3 + $0x498] sm:$0xff] }
 0x165   :  { %2174 = vmatprep.subr.bf16.mxu1 %v6185_v49  ;;  %v6123_v39 = vcombine.high %v502_v41, %v506_v45  ;;  %v586_v23 = vld [vmem:[%s9988_s3 + $0x738] sm:$0xff] }
 0x167   :  { %2132 = vmatpush2.bf16.msra.mxu0 %v6056_v50  ;;  %v366_v50 = vld [vmem:[%s9988_s3 + $0x58] sm:$0xff] }
 0x168   :  { %2175 = vmatpush2.bf16.msra.mxu1 %v6184_v36  ;;  %2133 = vmatprep.subr.bf16.mxu0 %v6049_v38  ;;  %v5995_v36 = vcombine.high %v374_v31, %v378_v32  ;;  %v494_v38 = vld [vmem:[%s9988_s3 + $0x458] sm:$0xff]  ;;  %v5987_v53 = vcombine.high %v366_v50, %v370_v34 }
 0x169   :  { %2176 = vmatprep.subr.bf16.mxu1 %v6177_v51  ;;  %v5994_v51 = vcombine.low %v374_v31, %v378_v32  ;;  %v6115_v54 = vcombine.high %v494_v38, %v498_v40  ;;  %v450_v31 = vld [vmem:[%s9988_s3 + $0x2f8] sm:$0xff] }
 0x16b   :  { %2134 = vmatpush2.bf16.msra.mxu0 %v6048_v52  ;;  %v6122_v52 = vcombine.low %v502_v41, %v506_v45  ;;  %v578_v41 = vld [vmem:[%s9988_s3 + $0x6f8] sm:$0xff] }
 0x16c   :  { %2177 = vmatpush2.bf16.msra.mxu1 %v6176_v55  ;;  %2135 = vmatprep.subr.bf16.mxu0 %v6041_v56  ;;  %v358_v55 = vld [vmem:[%s9988_s3 + $0x18] sm:$0xff] }
 0x16d   :  { %2178 = vmatprep.subr.bf16.mxu1 %v6169_v59  ;;  %v362_v56 = vld [vmem:[%s9988_s3 + $0x38] sm:$0xff]  ;;  %v5986_v59 = vcombine.low %v366_v50, %v370_v34 }
 0x16e   :  { %v5979_v63 = vcombine.high %v358_v55, %v362_v56  ;;  %v5978_v3 = vcombine.low %v358_v55, %v362_v56  ;;  %v442_v50 = vld [vmem:[%s9988_s3 + $0x2b8] sm:$0xff] }
 0x16f   :  { %2136 = vmatpush2.bf16.msra.mxu0 %v6040_v60  ;;  %v478_v60 = vld [vmem:[%s9988_s3 + $0x3d8] sm:$0xff] }
 0x170   :  { %2179 = vmatpush2.bf16.msra.mxu1 %v6168_v61  ;;  %2191 = vmatprep.subr.bf16.mxu0 %v6035_v62  ;;  %v482_v61 = vld [vmem:[%s9988_s3 + $0x3f8] sm:$0xff]  ;;  %v6114_v62 = vcombine.low %v494_v38, %v498_v40 }
 0x171   :  { %2234 = vmatprep.subr.bf16.mxu1 %v6163_v1  ;;  %v610_v1 = vld [vmem:[%s9988_s3 + $0x7f8] sm:$0xff] }
 0x172   :  { %2138 = vmatmul.mubr.bf16.vlgmr.msra.gmra.mxu0 %v7908_v27  ;;  %v6226_v14 = vcombine.low %v606_v0, %v610_v1  ;;  %v570_v38 = vld [vmem:[%s9988_s3 + $0x6b8] sm:$0xff] }
 0x173   :  { %2181 = vmatmul.mubr.bf16.vlgmr.msra.gmra.mxu1 %v7910_v28  ;;  %2192 = vmatpush1.bf16.msra.mxu0 %v6034_v4  ;;  %v470_v4 = vld [vmem:[%s9988_s3 + $0x398] sm:$0xff] }
 0x174   :  { %2223 = vmatprep.mubr.bf16.mxu0 %v7904_v25  ;;  %2235 = vmatpush1.bf16.msra.mxu1 %v6162_v7  ;;  %v382_v25 = vld [vmem:[%s9988_s3 + $0xd8] sm:$0xff]  ;;  %v6099_v7 = vcombine.high %v478_v60, %v482_v61  ;;  %v6090_v19 = vcombine.low %v470_v4, %v474_v5 }
 0x175   :  { %2266 = vmatprep.mubr.bf16.mxu1 %v7906_v26  ;;  %2193 = vmatprep.subr.bf16.mxu0 %v6027_v10  ;;  %v6146_v26 = vcombine.low %v526_v8, %v530_v9  ;;  %v6003_v37 = vcombine.high %v382_v25, %v386_v21  ;;  %v6002_v49 = vcombine.low %v382_v25, %v386_v21  ;;  %v598_v8 = vld [vmem:[%s9988_s3 + $0x798] sm:$0xff] }
 0x176   :  { %2236 = vmatprep.subr.bf16.mxu1 %v6155_v11  ;;  %v602_v9 = vld [vmem:[%s9988_s3 + $0x7b8] sm:$0xff]  ;;  %v6227_v10 = vcombine.high %v606_v0, %v610_v1  ;;  %v6098_v11 = vcombine.low %v478_v60, %v482_v61 }
 0x177   :  { %2194 = vmatpush1.bf16.msra.mxu0 %v6026_v12  ;;  %v462_v12 = vld [vmem:[%s9988_s3 + $0x358] sm:$0xff]  ;;  %v6218_v21 = vcombine.low %v598_v8, %v602_v9 }
 0x178   :  { %2237 = vmatpush1.bf16.msra.mxu1 %v6154_v15  ;;  %2195 = vmatprep.subr.bf16.mxu0 %v6019_v16  ;;  %v6091_v15 = vcombine.high %v470_v4, %v474_v5  ;;  %v590_v16 = vld [vmem:[%s9988_s3 + $0x758] sm:$0xff]  ;;  %v6082_v29 = vcombine.low %v462_v12, %v466_v13 }
 0x179   :  { %2238 = vmatprep.subr.bf16.mxu1 %v6147_v18  ;;  %v6219_v18 = vcombine.high %v598_v8, %v602_v9  ;;  %v458_v25 = vld [vmem:[%s9988_s3 + $0x338] sm:$0xff]  ;;  %v6210_v32 = vcombine.low %v590_v16, %v594_v17  ;;  %v6831_v8 = vld [vmem:[%s9990_s5 + $0x50c] ss:$28 sps:$4 sm:$0xff]  }
 0x17a   :  { %v558_v55 = vld [vmem:[%s9988_s3 + $0x658] sm:$0xff] }
 0x17b   :  { %2196 = vmatpush1.bf16.msra.mxu0 %v6018_v20  ;;  %v454_v20 = vld [vmem:[%s9988_s3 + $0x318] sm:$0xff] }
 0x17c   :  { %2239 = vmatpush1.bf16.msra.mxu1 %v6146_v26  ;;  %2197 = vmatprep.subr.bf16.mxu0 %v6011_v22  ;;  %v6083_v26 = vcombine.high %v462_v12, %v466_v13  ;;  %v582_v22 = vld [vmem:[%s9988_s3 + $0x718] sm:$0xff]  ;;  %v6074_v45 = vcombine.low %v454_v20, %v458_v25  ;;  %v6819_v12 = vld [vmem:[%s9990_s5 + $0x154] ss:$28 sps:$4 sm:$0xff]   ;;  %v6829_v13 = vld [vmem:[%s9990_s5 + $0x508] ss:$28 sps:$4 sm:$0xff]  }
 0x17d   :  { %2240 = vmatprep.subr.bf16.mxu1 %v6139_v24  ;;  %v6211_v24 = vcombine.high %v590_v16, %v594_v17  ;;  %v6202_v34 = vcombine.low %v582_v22, %v586_v23  ;;  %v562_v56 = vld [vmem:[%s9988_s3 + $0x678] sm:$0xff]  ;;  %v6817_v16 = vld [vmem:[%s9990_s5 + $0x150] ss:$28 sps:$4 sm:$0xff]  }
 0x17e   :  { %v426_v60 = vld [vmem:[%s9988_s3 + $0x238] sm:$0xff]  ;;  %v6179_v1 = vcombine.high %v558_v55, %v562_v56 }
 0x17f   :  { %2198 = vmatpush1.bf16.msra.mxu0 %v6010_v30  ;;  %v446_v30 = vld [vmem:[%s9988_s3 + $0x2d8] sm:$0xff] }
 0x180   :  { %2241 = vmatpush1.bf16.msra.mxu1 %v6138_v33  ;;  %2199 = vmatprep.subr.bf16.mxu0 %v6003_v37  ;;  %v6075_v33 = vcombine.high %v454_v20, %v458_v25  ;;  %v574_v37 = vld [vmem:[%s9988_s3 + $0x6d8] sm:$0xff]  ;;  %v6066_v40 = vcombine.low %v446_v30, %v450_v31  ;;  %v6835_v20 = vld [vmem:[%s9990_s5 + $0x4d0] ss:$28 sps:$4 sm:$0xff]  }
 0x181   :  { %2242 = vmatprep.subr.bf16.mxu1 %v6131_v42  ;;  %v6203_v42 = vcombine.high %v582_v22, %v586_v23  ;;  %v554_v0 = vld [vmem:[%s9988_s3 + $0x638] sm:$0xff] }
 0x182   :  { %v6820_v22 = vld [vmem:[%s9990_s5 + $0x118] ss:$28 sps:$4 sm:$0xff]  }
 0x183   :  { %2200 = vmatpush1.bf16.msra.mxu0 %v6002_v49  ;;  %v438_v49 = vld [vmem:[%s9988_s3 + $0x298] sm:$0xff] }
 0x184   :  { %2243 = vmatpush1.bf16.msra.mxu1 %v6130_v35  ;;  %2201 = vmatprep.subr.bf16.mxu0 %v5995_v36  ;;  %v6067_v35 = vcombine.high %v446_v30, %v450_v31  ;;  %v566_v36 = vld [vmem:[%s9988_s3 + $0x698] sm:$0xff]  ;;  %v6058_v58 = vcombine.low %v438_v49, %v442_v50 }
 0x185   :  { %2244 = vmatprep.subr.bf16.mxu1 %v6123_v39  ;;  %v6195_v39 = vcombine.high %v574_v37, %v578_v41  ;;  %v6187_v57 = vcombine.high %v566_v36, %v570_v38  ;;  %v6186_v61 = vcombine.low %v566_v36, %v570_v38  ;;  %v6841_v30 = vld [vmem:[%s9990_s5 + $0x498] ss:$28 sps:$4 sm:$0xff]   ;;  %v6826_v36 = vld [vmem:[%s9990_s5 + $0xa8] ss:$28 sps:$4 sm:$0xff]  }
 0x186   :  { %v6834_v38 = vld [vmem:[%s9990_s5 + $0x74] ss:$28 sps:$4 sm:$0xff]  }
 0x187   :  { %2202 = vmatpush1.bf16.msra.mxu0 %v5994_v51  ;;  %v430_v51 = vld [vmem:[%s9988_s3 + $0x258] sm:$0xff] }
 0x188   :  { %2245 = vmatpush1.bf16.msra.mxu1 %v6122_v52  ;;  %2203 = vmatprep.subr.bf16.mxu0 %v5987_v53  ;;  %v434_v52 = vld [vmem:[%s9988_s3 + $0x278] sm:$0xff]  ;;  %v6194_v53 = vcombine.low %v574_v37, %v578_v41 }
 0x189   :  { %2246 = vmatprep.subr.bf16.mxu1 %v6115_v54  ;;  %v6059_v54 = vcombine.high %v438_v49, %v442_v50  ;;  %v6823_v37 = vld [vmem:[%s9990_s5 + $0xe0] ss:$28 sps:$4 sm:$0xff]  }
 0x18a   :  { %v6847_v50 = vld [vmem:[%s9990_s5 + $0x460] ss:$28 sps:$4 sm:$0xff]  }
 0x18b   :  { %2204 = vmatpush1.bf16.msra.mxu0 %v5986_v59  ;;  %v422_v59 = vld [vmem:[%s9988_s3 + $0x218] sm:$0xff] }
 0x18c   :  { %2247 = vmatpush1.bf16.msra.mxu1 %v6114_v62  ;;  %2205 = vmatprep.subr.bf16.mxu0 %v5979_v63  ;;  %v6051_v62 = vcombine.high %v430_v51, %v434_v52  ;;  %v550_v63 = vld [vmem:[%s9988_s3 + $0x618] sm:$0xff]  ;;  %v6043_v4 = vcombine.high %v422_v59, %v426_v60 }
 0x18d   :  { %2248 = vmatprep.subr.bf16.mxu1 %v6107_v2  ;;  %v6050_v2 = vcombine.low %v430_v51, %v434_v52  ;;  %v6171_v5 = vcombine.high %v550_v63, %v554_v0  ;;  %v6170_v9 = vcombine.low %v550_v63, %v554_v0  ;;  %v6853_v51 = vld [vmem:[%s9990_s5 + $0x428] ss:$28 sps:$4 sm:$0xff]   ;;  %v6861_v52 = vld [vmem:[%s9990_s5 + $0x3f4] ss:$28 sps:$4 sm:$0xff]   ;;  %v6871_v0 = vld [vmem:[%s9990_s5 + $0x380] ss:$28 sps:$4 sm:$0xff]  }
 0x18e   :  { %v6852_v63 = vld [vmem:[%s9990_s5 + $0x34c] ss:$28 sps:$4 sm:$0xff]  }
 0x18f   :  { %2206 = vmatpush1.bf16.msra.mxu0 %v5978_v3  ;;  %v6178_v3 = vcombine.low %v558_v55, %v562_v56  ;;  %v6840_v55 = vld [vmem:[%s9990_s5 + $0x3c] ss:$28 sps:$4 sm:$0xff]   ;;  %v6859_v56 = vld [vmem:[%s9990_s5 + $0x3f0] ss:$28 sps:$4 sm:$0xff]  }
 0x190   :  { %2249 = vmatpush1.bf16.msra.mxu1 %v6106_v6  ;;  %2207 = vmatprep.subr.bf16.mxu0 %v6099_v7  ;;  %v6816_v6 = vld [vmem:[%s9990_s5 + $0x18c] ss:$28 sps:$4 sm:$0xff]   ;;  %v6042_v7 = vcombine.low %v422_v59, %v426_v60  ;;  %v6846_v59 = vld [vmem:[%s9990_s5 + $0x4] ss:$28 sps:$4 sm:$0xff]   ;;  %v6865_v60 = vld [vmem:[%s9990_s5 + $0x3b8] ss:$28 sps:$4 sm:$0xff]  }
 0x191   :  { %2250 = vmatprep.subr.bf16.mxu1 %v6227_v10  ;;  %v6814_v10 = vld [vmem:[%s9990_s5 + $0x188] ss:$28 sps:$4 sm:$0xff]  }
 0x193   :  { %2208 = vmatpush2.bf16.msra.mxu0 %v6098_v11  ;;  %v8496_v11 = vld [vmem:[%s9991_s4] sm:$0xff] }
 0x194   :  { %2251 = vmatpush2.bf16.msra.mxu1 %v6226_v14  ;;  %2209 = vmatprep.subr.bf16.mxu0 %v6091_v15  ;;  %v6837_v14 = vld [vmem:[%s9990_s5 + $0x4d4] ss:$28 sps:$4 sm:$0xff]   ;;  %v620_v15 = vrot.slane %v8496_v11, %v7880_v46 }
 0x195   :  { %2252 = vmatprep.subr.bf16.mxu1 %v6219_v18 }
 0x197   :  { %2210 = vmatpush2.bf16.msra.mxu0 %v6090_v19  ;;  %v6822_v19 = vld [vmem:[%s9990_s5 + $0x11c] ss:$28 sps:$4 sm:$0xff]  }
 0x198   :  { %2253 = vmatpush2.bf16.msra.mxu1 %v6218_v21  ;;  %2211 = vmatprep.subr.bf16.mxu0 %v6083_v26 }
 0x199   :  { %2254 = vmatprep.subr.bf16.mxu1 %v6211_v24  ;;  %v6825_v24 = vld [vmem:[%s9990_s5 + $0xe4] ss:$28 sps:$4 sm:$0xff]  }
 0x19b   :  { %2212 = vmatpush2.bf16.msra.mxu0 %v6082_v29 }
 0x19c   :  { %2255 = vmatpush2.bf16.msra.mxu1 %v6210_v32  ;;  %2213 = vmatprep.subr.bf16.mxu0 %v6075_v33  ;;  %v6849_v32 = vld [vmem:[%s9990_s5 + $0x464] ss:$28 sps:$4 sm:$0xff]  }
 0x19d   :  { %2256 = vmatprep.subr.bf16.mxu1 %v6203_v42  ;;  %v6828_v42 = vld [vmem:[%s9990_s5 + $0xac] ss:$28 sps:$4 sm:$0xff]  }
 0x19f   :  { %2214 = vmatpush2.bf16.msra.mxu0 %v6074_v45 }
 0x1a0   :  { %2257 = vmatpush2.bf16.msra.mxu1 %v6202_v34  ;;  %2215 = vmatprep.subr.bf16.mxu0 %v6067_v35  ;;  %v6855_v34 = vld [vmem:[%s9990_s5 + $0x42c] ss:$28 sps:$4 sm:$0xff]  }
 0x1a1   :  { %2258 = vmatprep.subr.bf16.mxu1 %v6195_v39 }
 0x1a3   :  { %2216 = vmatpush2.bf16.msra.mxu0 %v6066_v40 }
 0x1a4   :  { %2259 = vmatpush2.bf16.msra.mxu1 %v6194_v53  ;;  %2217 = vmatprep.subr.bf16.mxu0 %v6059_v54  ;;  %v6832_v54 = vld [vmem:[%s9990_s5 + $0x70] ss:$28 sps:$4 sm:$0xff]  }
 0x1a5   :  { %2260 = vmatprep.subr.bf16.mxu1 %v6187_v57  ;;  %v6838_v57 = vld [vmem:[%s9990_s5 + $0x38] ss:$28 sps:$4 sm:$0xff]  }
 0x1a7   :  { %2218 = vmatpush2.bf16.msra.mxu0 %v6058_v58  ;;  %v6867_v58 = vld [vmem:[%s9990_s5 + $0x3bc] ss:$28 sps:$4 sm:$0xff]  }
 0x1a8   :  { %2261 = vmatpush2.bf16.msra.mxu1 %v6186_v61  ;;  %2219 = vmatprep.subr.bf16.mxu0 %v6051_v62  ;;  %v6844_v61 = vld [vmem:[%s9990_s5] ss:$28 sps:$4 sm:$0xff]  }
 0x1a9   :  { %2262 = vmatprep.subr.bf16.mxu1 %v6179_v1  ;;  %v6873_v62 = vld [vmem:[%s9990_s5 + $0x384] ss:$28 sps:$4 sm:$0xff]  }
 0x1aa   :  { %v6850_v1 = vld [vmem:[%s9990_s5 + $0x348] ss:$28 sps:$4 sm:$0xff]  }
 0x1ab   :  { %2220 = vmatpush2.bf16.msra.mxu0 %v6050_v2  ;;  %v6879_v2 = vld [vmem:[%s9990_s5 + $0x6cc] ss:$28 sps:$4 sm:$0xff]  }
 0x1ac   :  { %2263 = vmatpush2.bf16.msra.mxu1 %v6178_v3  ;;  %2221 = vmatprep.subr.bf16.mxu0 %v6043_v4  ;;  %v6858_v3 = vld [vmem:[%s9990_s5 + $0x314] ss:$28 sps:$4 sm:$0xff]   ;;  %v6877_v4 = vld [vmem:[%s9990_s5 + $0x6c8] ss:$28 sps:$4 sm:$0xff]  }
 0x1ad   :  { %2264 = vmatprep.subr.bf16.mxu1 %v6171_v5  ;;  %v6856_v5 = vld [vmem:[%s9990_s5 + $0x310] ss:$28 sps:$4 sm:$0xff]  }
 0x1af   :  { %2222 = vmatpush2.bf16.msra.mxu0 %v6042_v7  ;;  %v6864_v7 = vld [vmem:[%s9990_s5 + $0x2dc] ss:$28 sps:$4 sm:$0xff]  }
 0x1b0   :  { %2265 = vmatpush2.bf16.msra.mxu1 %v6170_v9  ;;  %5170 = vmatprep.subr.bf16.mxu0 %v6816_v6  ;;  %v6885_v6 = vld [vmem:[%s9990_s5 + $0x694] ss:$28 sps:$4 sm:$0xff]  }
 0x1b1   :  { %5213 = vmatprep.subr.bf16.mxu1 %v6831_v8  ;;  %v6883_v8 = vld [vmem:[%s9990_s5 + $0x690] ss:$28 sps:$4 sm:$0xff]   ;;  %v6862_v9 = vld [vmem:[%s9990_s5 + $0x2d8] ss:$28 sps:$4 sm:$0xff]  }
 0x1b2   :  { %2224 = vmatmul.mubr.bf16.vlgmr.msra.gmra.mxu0 %v7908_v27  ;;  %v8513_v17 = vpop.f32.mrf.mxu0  ;;  %v8515_v18 = vpop.f32.mrf.mxu1  ;;  %v6843_v27 = vld [vmem:[%s9990_s5 + $0x49c] ss:$28 sps:$4 sm:$0xff]  }
 0x1b3   :  { %2267 = vmatmul.mubr.bf16.vlgmr.msra.gmra.mxu1 %v7910_v28  ;;  %5171 = vmatpush1.bf16.msra.mxu0 %v6814_v10  ;;  %v6891_v10 = vld [vmem:[%s9990_s5 + $0x65c] ss:$28 sps:$4 sm:$0xff]  }
 0x1b4   :  { %v1969_v25 = vpop.f32.mrf.mxu0  ;;  %v2012_v21 = vpop.f32.mrf.mxu1  ;;  %5172 = vmatprep.subr.bf16.mxu0 %v6819_v12  ;;  %5214 = vmatpush1.bf16.msra.mxu1 %v6829_v13  ;;  %v6870_v12 = vld [vmem:[%s9990_s5 + $0x2a4] ss:$28 sps:$4 sm:$0xff]   ;;  %v6889_v13 = vld [vmem:[%s9990_s5 + $0x658] ss:$28 sps:$4 sm:$0xff]  }
 0x1b5   :  { %v1970_v26 = vadd.f32 %v1969_v25, %v620_v15  ;;  %5215 = vmatprep.subr.bf16.mxu1 %v6837_v14  ;;  %v6868_v14 = vld [vmem:[%s9990_s5 + $0x2a0] ss:$28 sps:$4 sm:$0xff]   ;;  %v6874_v25 = vld [vmem:[%s9990_s5 + $0x268] ss:$28 sps:$4 sm:$0xff]  }
 0x1b6   :  { %v8530_v28 = vpop.f32.mrf.mxu0  ;;  %v8532_v23 = vpop.f32.mrf.mxu1 }
 0x1b7   :  { %v2013_v29 = vadd.f32 %v2012_v21, %v1970_v26  ;;  %5173 = vmatpush1.bf16.msra.mxu0 %v6817_v16  ;;  %v6876_v16 = vld [vmem:[%s9990_s5 + $0x26c] ss:$28 sps:$4 sm:$0xff]  }
 0x1b8   :  { %v1973_v31 = vpop.f32.mrf.mxu0  ;;  %5174 = vmatprep.subr.bf16.mxu0 %v6822_v19  ;;  %5216 = vmatpush1.bf16.msra.mxu1 %v6835_v20  ;;  %v2016_v41 = vpop.f32.mrf.mxu1  ;;  %v6895_v19 = vld [vmem:[%s9990_s5 + $0x620] ss:$28 sps:$4 sm:$0xff]   ;;  %v616_v20 = vrot.slane %v8496_v11, %v7874_v44  ;;  %v6900_v21 = vld [vmem:[%s9990_s5 + $0x5ec] ss:$28 sps:$4 sm:$0xff]  }
 0x1b9   :  { %v1974_v33 = vadd.f32 %v1973_v31, %v620_v15  ;;  %5217 = vmatprep.subr.bf16.mxu1 %v6843_v27  ;;  %v2278_v45 = vmul.f32 0.2, %v2013_v29  ;;  %v6897_v15 = vld [vmem:[%s9990_s5 + $0x624] ss:$28 sps:$4 sm:$0xff]   ;;  %v6882_v27 = vld [vmem:[%s9990_s5 + $0x234] ss:$28 sps:$4 sm:$0xff]  }
 0x1ba   :  { %v6898_v26 = vld [vmem:[%s9990_s5 + $0x5e8] ss:$28 sps:$4 sm:$0xff]   ;;  %v6888_v31 = vld [vmem:[%s9990_s5 + $0x1fc] ss:$28 sps:$4 sm:$0xff]  }
 0x1bb   :  { %v2017_v49 = vadd.f32 %v2016_v41, %v1974_v33  ;;  %5175 = vmatpush1.bf16.msra.mxu0 %v6820_v22  ;;  %v2294_v39 = vmax.f32 %v2013_v29, %v2278_v45  ;;  %v1972_v22 = vadd.f32 %v8530_v28, %v616_v20  ;;  %v6903_v29 = vld [vmem:[%s9990_s5 + $0x5b4] ss:$28 sps:$4 sm:$0xff]   ;;  %v6894_v41 = vld [vmem:[%s9990_s5 + $0x1c4] ss:$28 sps:$4 sm:$0xff]  }
 0x1bc   :  { %5176 = vmatprep.subr.bf16.mxu0 %v6825_v24  ;;  %5218 = vmatpush1.bf16.msra.mxu1 %v6841_v30  ;;  %v6880_v24 = vld [vmem:[%s9990_s5 + $0x230] ss:$28 sps:$4 sm:$0xff]   ;;  %v1968_v30 = vadd.f32 %v8513_v17, %v616_v20  ;;  %v6886_v33 = vld [vmem:[%s9990_s5 + $0x1f8] ss:$28 sps:$4 sm:$0xff]   ;;  %v6892_v45 = vld [vmem:[%s9990_s5 + $0x1c0] ss:$28 sps:$4 sm:$0xff]  }
 0x1bd   :  { %v2286_v35 = vmul.f32 0.2, %v2017_v49  ;;  %5219 = vmatprep.subr.bf16.mxu1 %v6849_v32  ;;  %v6901_v28 = vld [vmem:[%s9990_s5 + $0x5b0] ss:$28 sps:$4 sm:$0xff]   ;;  %v2015_v32 = vadd.f32 %v8532_v23, %v1972_v22  ;;  %v6906_v17 = vld [vmem:[%s9990_s5 + $0x57c] ss:$28 sps:$4 sm:$0xff]  }
 0x1be   :  { %v6904_v23 = vld [vmem:[%s9990_s5 + $0x578] ss:$28 sps:$4 sm:$0xff]   ;;  %v6958_v22 = vld [vmem:[%s9990_s5 + $0xc08] ss:$28 sps:$4 sm:$0xff]  }
 0x1bf   :  { %v2302_v40 = vmax.f32 %v2017_v49, %v2286_v35  ;;  %5177 = vmatpush1.bf16.msra.mxu0 %v6823_v37  ;;  %v2011_v37 = vadd.f32 %v8515_v18, %v1968_v30  ;;  %v6909_v18 = vld [vmem:[%s9990_s5 + $0x544] ss:$28 sps:$4 sm:$0xff]  }
 0x1c0   :  { %5178 = vmatprep.subr.bf16.mxu0 %v6828_v42  ;;  %5220 = vmatpush1.bf16.msra.mxu1 %v6847_v50  ;;  %v2285_v42 = vmul.f32 0.2, %v2015_v32  ;;  %v6907_v50 = vld [vmem:[%s9990_s5 + $0x540] ss:$28 sps:$4 sm:$0xff]  }
 0x1c1   :  { %v8567_v53 = vpack.c.bf16 %v2302_v40, %v2294_v39  ;;  %5221 = vmatprep.subr.bf16.mxu1 %v6855_v34  ;;  %v2277_v49 = vmul.f32 0.2, %v2011_v37  ;;  %v6912_v34 = vld [vmem:[%s9990_s5 + $0x88c] ss:$28 sps:$4 sm:$0xff]   ;;  %v6915_v40 = vld [vmem:[%s9990_s5 + $0x854] ss:$28 sps:$4 sm:$0xff]  }
 0x1c2   :  { %v2301_v35 = vmax.f32 %v2015_v32, %v2285_v42  ;;  %v6964_v32 = vld [vmem:[%s9990_s5 + $0xbd0] ss:$28 sps:$4 sm:$0xff]  }
 0x1c3   :  { %5179 = vmatpush1.bf16.msra.mxu0 %v6826_v36  ;;  %5202 = vmatprep.mubr.bf16.mxu0 %v8567_v53  ;;  %v6910_v36 = vld [vmem:[%s9990_s5 + $0x888] ss:$28 sps:$4 sm:$0xff]   ;;  %v2293_v39 = vmax.f32 %v2011_v37, %v2277_v49  ;;  %v6976_v49 = vld [vmem:[%s9990_s5 + $0xb60] ss:$28 sps:$4 sm:$0xff]  }
 0x1c4   :  { %5180 = vmatprep.subr.bf16.mxu0 %v6834_v38  ;;  %5222 = vmatpush1.bf16.msra.mxu1 %v6853_v51  ;;  %v6960_v38 = vld [vmem:[%s9990_s5 + $0xc0c] ss:$28 sps:$4 sm:$0xff]   ;;  %v6933_v37 = vld [vmem:[%s9990_s5 + $0x704] ss:$28 sps:$4 sm:$0xff]  }
 0x1c5   :  { %5223 = vmatprep.subr.bf16.mxu1 %v6861_v52  ;;  %v8714_v51 = vpack.c.bf16 %v2301_v35, %v2293_v39  ;;  %v624_v52 = vrot.slane %v8496_v11, %v7886_v48  ;;  %v6936_v42 = vld [vmem:[%s9990_s5 + $0xa4c] ss:$28 sps:$4 sm:$0xff]   ;;  %v6990_v39 = vld [vmem:[%s9990_s5 + $0xaf4] ss:$28 sps:$4 sm:$0xff]  }
 0x1c6   :  { %v6937_v35 = vld [vmem:[%s9990_s5 + $0xa10] ss:$28 sps:$4 sm:$0xff]  }
 0x1c7   :  { %5181 = vmatpush1.bf16.msra.mxu0 %v6832_v54  ;;  %v628_v54 = vrot.slane %v8496_v11, %v7883_v47 }
 0x1c8   :  { %5182 = vmatprep.subr.bf16.mxu0 %v6840_v55  ;;  %5224 = vmatpush1.bf16.msra.mxu1 %v6859_v56 }
 0x1c9   :  { %5225 = vmatprep.subr.bf16.mxu1 %v6867_v58 }
 0x1cb   :  { %5183 = vmatpush1.bf16.msra.mxu0 %v6838_v57  ;;  %v6913_v57 = vld [vmem:[%s9990_s5 + $0x850] ss:$28 sps:$4 sm:$0xff]  }
 0x1cc   :  { %5184 = vmatprep.subr.bf16.mxu0 %v6846_v59  ;;  %5226 = vmatpush1.bf16.msra.mxu1 %v6865_v60 }
 0x1cd   :  { %5227 = vmatprep.subr.bf16.mxu1 %v6873_v62 }
 0x1cf   :  { %5185 = vmatpush1.bf16.msra.mxu0 %v6844_v61  ;;  %v6918_v61 = vld [vmem:[%s9990_s5 + $0x81c] ss:$28 sps:$4 sm:$0xff]  }
 0x1d0   :  { %5186 = vmatprep.subr.bf16.mxu0 %v6852_v63  ;;  %5228 = vmatpush1.bf16.msra.mxu1 %v6871_v0 }
 0x1d1   :  { %5229 = vmatprep.subr.bf16.mxu1 %v6879_v2  ;;  %v6916_v2 = vld [vmem:[%s9990_s5 + $0x818] ss:$28 sps:$4 sm:$0xff]  }
 0x1d3   :  { %5187 = vmatpush2.bf16.msra.mxu0 %v6850_v1 }
 0x1d4   :  { %5188 = vmatprep.subr.bf16.mxu0 %v6858_v3  ;;  %5230 = vmatpush2.bf16.msra.mxu1 %v6877_v4 }
 0x1d5   :  { %5231 = vmatprep.subr.bf16.mxu1 %v6885_v6 }
 0x1d7   :  { %5189 = vmatpush2.bf16.msra.mxu0 %v6856_v5  ;;  %v6921_v5 = vld [vmem:[%s9990_s5 + $0x7e4] ss:$28 sps:$4 sm:$0xff]  }
 0x1d8   :  { %5190 = vmatprep.subr.bf16.mxu0 %v6864_v7  ;;  %5232 = vmatpush2.bf16.msra.mxu1 %v6883_v8 }
 0x1d9   :  { %5233 = vmatprep.subr.bf16.mxu1 %v6891_v10 }
 0x1db   :  { %5191 = vmatpush2.bf16.msra.mxu0 %v6862_v9 }
 0x1dc   :  { %5192 = vmatprep.subr.bf16.mxu0 %v6870_v12  ;;  %5234 = vmatpush2.bf16.msra.mxu1 %v6889_v13  ;;  %v6919_v13 = vld [vmem:[%s9990_s5 + $0x7e0] ss:$28 sps:$4 sm:$0xff]  }
 0x1dd   :  { %5235 = vmatprep.subr.bf16.mxu1 %v6897_v15  ;;  %v6924_v15 = vld [vmem:[%s9990_s5 + $0x7ac] ss:$28 sps:$4 sm:$0xff]  }
 0x1df   :  { %5193 = vmatpush2.bf16.msra.mxu0 %v6868_v14 }
 0x1e0   :  { %5194 = vmatprep.subr.bf16.mxu0 %v6876_v16  ;;  %5236 = vmatpush2.bf16.msra.mxu1 %v6895_v19 }
 0x1e1   :  { %5237 = vmatprep.subr.bf16.mxu1 %v6900_v21  ;;  %v6922_v21 = vld [vmem:[%s9990_s5 + $0x7a8] ss:$28 sps:$4 sm:$0xff]  }
 0x1e3   :  { %5195 = vmatpush2.bf16.msra.mxu0 %v6874_v25 }
 0x1e4   :  { %5196 = vmatprep.subr.bf16.mxu0 %v6882_v27  ;;  %5238 = vmatpush2.bf16.msra.mxu1 %v6898_v26  ;;  %v6927_v27 = vld [vmem:[%s9990_s5 + $0x774] ss:$28 sps:$4 sm:$0xff]  }
 0x1e5   :  { %5239 = vmatprep.subr.bf16.mxu1 %v6903_v29 }
 0x1e7   :  { %5197 = vmatpush2.bf16.msra.mxu0 %v6880_v24  ;;  %v6966_v24 = vld [vmem:[%s9990_s5 + $0xbd4] ss:$28 sps:$4 sm:$0xff]  }
 0x1e8   :  { %5198 = vmatprep.subr.bf16.mxu0 %v6888_v31  ;;  %5240 = vmatpush2.bf16.msra.mxu1 %v6901_v28  ;;  %v6925_v31 = vld [vmem:[%s9990_s5 + $0x770] ss:$28 sps:$4 sm:$0xff]   ;;  %v6930_v28 = vld [vmem:[%s9990_s5 + $0x73c] ss:$28 sps:$4 sm:$0xff]  }
 0x1e9   :  { %5241 = vmatprep.subr.bf16.mxu1 %v6906_v17  ;;  %v6928_v17 = vld [vmem:[%s9990_s5 + $0x738] ss:$28 sps:$4 sm:$0xff]  }
 0x1eb   :  { %5199 = vmatpush2.bf16.msra.mxu0 %v6886_v33  ;;  %v6972_v33 = vld [vmem:[%s9990_s5 + $0xb9c] ss:$28 sps:$4 sm:$0xff]  }
 0x1ec   :  { %5200 = vmatprep.subr.bf16.mxu0 %v6894_v41  ;;  %5242 = vmatpush2.bf16.msra.mxu1 %v6904_v23  ;;  %v6931_v41 = vld [vmem:[%s9990_s5 + $0x700] ss:$28 sps:$4 sm:$0xff]   ;;  %v6970_v23 = vld [vmem:[%s9990_s5 + $0xb98] ss:$28 sps:$4 sm:$0xff]  }
 0x1ed   :  { %5243 = vmatprep.subr.bf16.mxu1 %v6909_v18  ;;  %v6934_v18 = vld [vmem:[%s9990_s5 + $0xa48] ss:$28 sps:$4 sm:$0xff]  }
 0x1ef   :  { %5201 = vmatpush2.bf16.msra.mxu0 %v6892_v45  ;;  %v6978_v45 = vld [vmem:[%s9990_s5 + $0xb64] ss:$28 sps:$4 sm:$0xff]  }
 0x1f0   :  { %5244 = vmatpush2.bf16.msra.mxu1 %v6907_v50  ;;  %5256 = vmatprep.subr.bf16.mxu0 %v6912_v34  ;;  %v6939_v50 = vld [vmem:[%s9990_s5 + $0xa14] ss:$28 sps:$4 sm:$0xff]   ;;  %v6984_v34 = vld [vmem:[%s9990_s5 + $0xb2c] ss:$28 sps:$4 sm:$0xff]  }
 0x1f1   :  { %5299 = vmatprep.subr.bf16.mxu1 %v6960_v38  ;;  %v6942_v38 = vld [vmem:[%s9990_s5 + $0x9dc] ss:$28 sps:$4 sm:$0xff]  }
 0x1f2   :  { %v2053_v55 = vpop.f32.mrf.mxu0  ;;  %v2096_v56 = vpop.f32.mrf.mxu1  ;;  %5203 = vmatmul.mubr.bf16.vlgmr.msra.gmra.mxu0 %v8714_v51 }
 0x1f3   :  { %5257 = vmatpush1.bf16.msra.mxu0 %v6910_v36  ;;  %v2054_v58 = vadd.f32 %v2053_v55, %v624_v52  ;;  %v6982_v36 = vld [vmem:[%s9990_s5 + $0xb28] ss:$28 sps:$4 sm:$0xff]   ;;  %v6996_v55 = vld [vmem:[%s9990_s5 + $0xabc] ss:$28 sps:$4 sm:$0xff]  }
 0x1f4   :  { %v2055_v59 = vpop.f32.mrf.mxu0  ;;  %v2098_v60 = vpop.f32.mrf.mxu1  ;;  %5258 = vmatprep.subr.bf16.mxu0 %v6915_v40  ;;  %v6940_v40 = vld [vmem:[%s9990_s5 + $0x9d8] ss:$28 sps:$4 sm:$0xff]  }
 0x1f5   :  { %v2056_v62 = vadd.f32 %v2055_v59, %v628_v54  ;;  %v2097_v3 = vadd.f32 %v2096_v56, %v2054_v58  ;;  %v6943_v56 = vld [vmem:[%s9990_s5 + $0x9a0] ss:$28 sps:$4 sm:$0xff]   ;;  %v6948_v58 = vld [vmem:[%s9990_s5 + $0x96c] ss:$28 sps:$4 sm:$0xff]  }
 0x1f6   :  { %v2057_v11 = vpop.f32.mrf.mxu0  ;;  %v2100_v63 = vpop.f32.mrf.mxu1  ;;  %v7002_v59 = vld [vmem:[%s9990_s5 + $0xa84] ss:$28 sps:$4 sm:$0xff]  }
 0x1f7   :  { %v2099_v0 = vadd.f32 %v2098_v60, %v2056_v62  ;;  %v2058_v1 = vadd.f32 %v2057_v11, %v624_v52  ;;  %5259 = vmatpush1.bf16.msra.mxu0 %v6913_v57  ;;  %v2279_v14 = vmul.f32 0.2, %v2097_v3  ;;  %v6988_v52 = vld [vmem:[%s9990_s5 + $0xaf0] ss:$28 sps:$4 sm:$0xff]   ;;  %v6994_v57 = vld [vmem:[%s9990_s5 + $0xab8] ss:$28 sps:$4 sm:$0xff]  }
 0x1f8   :  { %v2059_v4 = vpop.f32.mrf.mxu0  ;;  %5260 = vmatprep.subr.bf16.mxu0 %v6918_v61  ;;  %v2102_v8 = vpop.f32.mrf.mxu1  ;;  %v7000_v60 = vld [vmem:[%s9990_s5 + $0xa80] ss:$28 sps:$4 sm:$0xff]   ;;  %v7008_v61 = vld [vmem:[%s9990_s5 + $0xdcc] ss:$28 sps:$4 sm:$0xff]   ;;  %v6951_v11 = vld [vmem:[%s9990_s5 + $0x934] ss:$28 sps:$4 sm:$0xff]  }
 0x1f9   :  { %v2101_v6 = vadd.f32 %v2100_v63, %v2058_v1  ;;  %v2060_v7 = vadd.f32 %v2059_v4, %v628_v54  ;;  %v2280_v9 = vmul.f32 0.2, %v2099_v0  ;;  %v2295_v26 = vmax.f32 %v2097_v3, %v2279_v14  ;;  %v6945_v54 = vld [vmem:[%s9990_s5 + $0x9a4] ss:$28 sps:$4 sm:$0xff]   ;;  %v6949_v1 = vld [vmem:[%s9990_s5 + $0x930] ss:$28 sps:$4 sm:$0xff]  }
 0x1fa   :  { %v6946_v62 = vld [vmem:[%s9990_s5 + $0x968] ss:$28 sps:$4 sm:$0xff]   ;;  %v7012_v3 = vld [vmem:[%s9990_s5 + $0xd90] ss:$28 sps:$4 sm:$0xff]   ;;  %v7020_v4 = vld [vmem:[%s9990_s5 + $0xd5c] ss:$28 sps:$4 sm:$0xff]  }
 0x1fb   :  { %v2287_v10 = vmul.f32 0.2, %v2101_v6  ;;  %v2103_v12 = vadd.f32 %v2102_v8, %v2060_v7  ;;  %5261 = vmatpush1.bf16.msra.mxu0 %v6916_v2  ;;  %v2296_v20 = vmax.f32 %v2099_v0, %v2280_v9  ;;  %v7006_v63 = vld [vmem:[%s9990_s5 + $0xdc8] ss:$28 sps:$4 sm:$0xff]   ;;  %v7014_v0 = vld [vmem:[%s9990_s5 + $0xd94] ss:$28 sps:$4 sm:$0xff]  }
 0x1fc   :  { %5262 = vmatprep.subr.bf16.mxu0 %v6921_v5  ;;  %v6954_v2 = vld [vmem:[%s9990_s5 + $0x8fc] ss:$28 sps:$4 sm:$0xff]   ;;  %v7026_v8 = vld [vmem:[%s9990_s5 + $0xd24] ss:$28 sps:$4 sm:$0xff]  }
 0x1fd   :  { %v2288_v16 = vmul.f32 0.2, %v2103_v12  ;;  %v2303_v19 = vmax.f32 %v2101_v6, %v2287_v10  ;;  %v6952_v5 = vld [vmem:[%s9990_s5 + $0x8f8] ss:$28 sps:$4 sm:$0xff]   ;;  %v6957_v6 = vld [vmem:[%s9990_s5 + $0x8c4] ss:$28 sps:$4 sm:$0xff]  }
 0x1fe   :  { %v7018_v7 = vld [vmem:[%s9990_s5 + $0xd58] ss:$28 sps:$4 sm:$0xff]   ;;  %v6955_v9 = vld [vmem:[%s9990_s5 + $0x8c0] ss:$28 sps:$4 sm:$0xff]   ;;  %v631_v10 = vsub.s32 4, %v7871_v43 }
 0x1ff   :  { %v2304_v25 = vmax.f32 %v2103_v12, %v2288_v16  ;;  %5263 = vmatpush1.bf16.msra.mxu0 %v6919_v13  ;;  %v8753_v30 = vpack.c.bf16 %v2303_v19, %v2295_v26  ;;  %v6963_v12 = vld [vmem:[%s9990_s5 + $0x194] ss:$28 sps:$4 sm:$0xff]   ;;  %v635_v13 = vsub.s32 5, %v7871_v43  ;;  %v7024_v14 = vld [vmem:[%s9990_s5 + $0xd20] ss:$28 sps:$4 sm:$0xff]  }
 0x200   :  { %5264 = vmatprep.subr.bf16.mxu0 %v6924_v15  ;;  %v7032_v15 = vld [vmem:[%s9990_s5 + $0xcec] ss:$28 sps:$4 sm:$0xff]   ;;  %v8894_v16 = vld [vmem:[%s9991_s4] sm:$0xff] }
 0x201   :  { %v8751_v29 = vpack.c.bf16 %v2304_v25, %v2296_v20  ;;  %v632_v19 = vrot.slane %v8894_v16, %v631_v10  ;;  %v636_v20 = vrot.slane %v8894_v16, %v635_v13  ;;  %v7030_v25 = vld [vmem:[%s9990_s5 + $0xce8] ss:$28 sps:$4 sm:$0xff]  }
 0x203   :  { %5245 = vmatprep.mubr.bf16.mxu1 %v8751_v29  ;;  %5265 = vmatpush1.bf16.msra.mxu0 %v6922_v21 }
 0x204   :  { %5246 = vmatmul.mubr.bf16.vlgmr.msra.gmra.mxu1 %v8753_v30  ;;  %5266 = vmatprep.subr.bf16.mxu0 %v6927_v27  ;;  %v7038_v27 = vld [vmem:[%s9990_s5 + $0xcb4] ss:$28 sps:$4 sm:$0xff]  }
 0x205   :  { %5300 = vmatpush1.bf16.msra.mxu1 %v6958_v22 }
 0x206   :  { %5301 = vmatprep.subr.bf16.mxu1 %v6966_v24 }
 0x207   :  { %5267 = vmatpush1.bf16.msra.mxu0 %v6925_v31 }
 0x208   :  { %5268 = vmatprep.subr.bf16.mxu0 %v6930_v28 }
 0x209   :  { %5302 = vmatpush1.bf16.msra.mxu1 %v6964_v32  ;;  %v7036_v32 = vld [vmem:[%s9990_s5 + $0xcb0] ss:$28 sps:$4 sm:$0xff]  }
 0x20a   :  { %5303 = vmatprep.subr.bf16.mxu1 %v6972_v33 }
 0x20b   :  { %5269 = vmatpush1.bf16.msra.mxu0 %v6928_v17  ;;  %v7044_v17 = vld [vmem:[%s9990_s5 + $0xc7c] ss:$28 sps:$4 sm:$0xff]  }
 0x20c   :  { %5270 = vmatprep.subr.bf16.mxu0 %v6933_v37 }
 0x20d   :  { %5304 = vmatpush1.bf16.msra.mxu1 %v6970_v23 }
 0x20e   :  { %5305 = vmatprep.subr.bf16.mxu1 %v6978_v45 }
 0x20f   :  { %5271 = vmatpush1.bf16.msra.mxu0 %v6931_v41 }
 0x210   :  { %5272 = vmatprep.subr.bf16.mxu0 %v6936_v42 }
 0x211   :  { %5306 = vmatpush1.bf16.msra.mxu1 %v6976_v49 }
 0x212   :  { %5307 = vmatprep.subr.bf16.mxu1 %v6984_v34 }
 0x213   :  { %5273 = vmatpush2.bf16.msra.mxu0 %v6934_v18 }
 0x214   :  { %5274 = vmatprep.subr.bf16.mxu0 %v6939_v50  ;;  %v7042_v50 = vld [vmem:[%s9990_s5 + $0xc78] ss:$28 sps:$4 sm:$0xff]  }
 0x215   :  { %5308 = vmatpush1.bf16.msra.mxu1 %v6982_v36 }
 0x216   :  { %5309 = vmatprep.subr.bf16.mxu1 %v6990_v39 }
 0x217   :  { %5275 = vmatpush2.bf16.msra.mxu0 %v6937_v35  ;;  %v7050_v35 = vld [vmem:[%s9990_s5 + $0xc44] ss:$28 sps:$4 sm:$0xff]  }
 0x218   :  { %5276 = vmatprep.subr.bf16.mxu0 %v6942_v38 }
 0x219   :  { %5310 = vmatpush1.bf16.msra.mxu1 %v6988_v52 }
 0x21a   :  { %5311 = vmatprep.subr.bf16.mxu1 %v6996_v55 }
 0x21b   :  { %5277 = vmatpush2.bf16.msra.mxu0 %v6940_v40 }
 0x21c   :  { %5278 = vmatprep.subr.bf16.mxu0 %v6945_v54  ;;  %v7048_v54 = vld [vmem:[%s9990_s5 + $0xc40] ss:$28 sps:$4 sm:$0xff]  }
 0x21d   :  { %5312 = vmatpush1.bf16.msra.mxu1 %v6994_v57 }
 0x21e   :  { %5313 = vmatprep.subr.bf16.mxu1 %v7002_v59 }
 0x21f   :  { %5279 = vmatpush2.bf16.msra.mxu0 %v6943_v56  ;;  %v7056_v56 = vld [vmem:[%s9990_s5 + $0x514] ss:$28 sps:$4 sm:$0xff]  }
 0x220   :  { %5280 = vmatprep.subr.bf16.mxu0 %v6948_v58 }
 0x221   :  { %5314 = vmatpush1.bf16.msra.mxu1 %v7000_v60 }
 0x222   :  { %5315 = vmatprep.subr.bf16.mxu1 %v7008_v61  ;;  %v6961_v61 = vld [vmem:[%s9990_s5 + $0x190] ss:$28 sps:$4 sm:$0xff]  }
 0x223   :  { %5281 = vmatpush2.bf16.msra.mxu0 %v6946_v62 }
 0x224   :  { %5282 = vmatprep.subr.bf16.mxu0 %v6951_v11  ;;  %v6969_v11 = vld [vmem:[%s9990_s5 + $0x15c] ss:$28 sps:$4 sm:$0xff]  }
 0x225   :  { %5316 = vmatpush2.bf16.msra.mxu1 %v7006_v63  ;;  %v6967_v63 = vld [vmem:[%s9990_s5 + $0x158] ss:$28 sps:$4 sm:$0xff]  }
 0x226   :  { %5317 = vmatprep.subr.bf16.mxu1 %v7014_v0  ;;  %v6975_v0 = vld [vmem:[%s9990_s5 + $0x124] ss:$28 sps:$4 sm:$0xff]  }
 0x227   :  { %5283 = vmatpush2.bf16.msra.mxu0 %v6949_v1  ;;  %v6973_v1 = vld [vmem:[%s9990_s5 + $0x120] ss:$28 sps:$4 sm:$0xff]  }
 0x228   :  { %5284 = vmatprep.subr.bf16.mxu0 %v6954_v2  ;;  %v6981_v2 = vld [vmem:[%s9990_s5 + $0xec] ss:$28 sps:$4 sm:$0xff]  }
 0x229   :  { %5318 = vmatpush2.bf16.msra.mxu1 %v7012_v3  ;;  %v6979_v3 = vld [vmem:[%s9990_s5 + $0xe8] ss:$28 sps:$4 sm:$0xff]  }
 0x22a   :  { %5319 = vmatprep.subr.bf16.mxu1 %v7020_v4  ;;  %v6987_v4 = vld [vmem:[%s9990_s5 + $0xb4] ss:$28 sps:$4 sm:$0xff]  }
 0x22b   :  { %5285 = vmatpush2.bf16.msra.mxu0 %v6952_v5  ;;  %v6985_v5 = vld [vmem:[%s9990_s5 + $0xb0] ss:$28 sps:$4 sm:$0xff]  }
 0x22c   :  { %5286 = vmatprep.subr.bf16.mxu0 %v6957_v6  ;;  %v6993_v6 = vld [vmem:[%s9990_s5 + $0x7c] ss:$28 sps:$4 sm:$0xff]  }
 0x22d   :  { %5320 = vmatpush2.bf16.msra.mxu1 %v7018_v7  ;;  %v6991_v7 = vld [vmem:[%s9990_s5 + $0x78] ss:$28 sps:$4 sm:$0xff]  }
 0x22e   :  { %5321 = vmatprep.subr.bf16.mxu1 %v7026_v8  ;;  %v6999_v8 = vld [vmem:[%s9990_s5 + $0x44] ss:$28 sps:$4 sm:$0xff]  }
 0x22f   :  { %5287 = vmatpush2.bf16.msra.mxu0 %v6955_v9  ;;  %v6997_v9 = vld [vmem:[%s9990_s5 + $0x40] ss:$28 sps:$4 sm:$0xff]  }
 0x230   :  { %5342 = vmatprep.subr.bf16.mxu0 %v6963_v12  ;;  %v7005_v12 = vld [vmem:[%s9990_s5 + $0xc] ss:$28 sps:$4 sm:$0xff]  }
 0x231   :  { %5322 = vmatpush2.bf16.msra.mxu1 %v7024_v14  ;;  %v7003_v14 = vld [vmem:[%s9990_s5 + $0x8] ss:$28 sps:$4 sm:$0xff]  }
 0x232   :  { %v2139_v21 = vpop.f32.mrf.mxu0  ;;  %5323 = vmatprep.subr.bf16.mxu1 %v7032_v15  ;;  %v7011_v15 = vld [vmem:[%s9990_s5 + $0x354] ss:$28 sps:$4 sm:$0xff]  }
 0x233   :  { %v2182_v26 = vpop.f32.mrf.mxu1  ;;  %v2140_v22 = vadd.f32 %v2139_v21, %v632_v19  ;;  %v7023_v21 = vld [vmem:[%s9990_s5 + $0x2e4] ss:$28 sps:$4 sm:$0xff]  }
 0x234   :  { %v2141_v24 = vpop.f32.mrf.mxu0 }
 0x235   :  { %v2142_v31 = vadd.f32 %v2141_v24, %v636_v20  ;;  %v2184_v28 = vpop.f32.mrf.mxu1  ;;  %5324 = vmatpush2.bf16.msra.mxu1 %v7030_v25  ;;  %v2183_v42 = vadd.f32 %v2182_v26, %v2140_v22  ;;  %v7015_v25 = vld [vmem:[%s9990_s5 + $0x318] ss:$28 sps:$4 sm:$0xff]   ;;  %v7029_v26 = vld [vmem:[%s9990_s5 + $0x2ac] ss:$28 sps:$4 sm:$0xff]   ;;  %v639_v22 = vsub.s32 6, %v7871_v43 }
 0x236   :  { %v2143_v33 = vpop.f32.mrf.mxu0  ;;  %5325 = vmatprep.subr.bf16.mxu1 %v7038_v27  ;;  %v7021_v27 = vld [vmem:[%s9990_s5 + $0x2e0] ss:$28 sps:$4 sm:$0xff]   ;;  %v7027_v24 = vld [vmem:[%s9990_s5 + $0x2a8] ss:$28 sps:$4 sm:$0xff]  }
 0x237   :  { %v2185_v37 = vadd.f32 %v2184_v28, %v2142_v31  ;;  %v2144_v41 = vadd.f32 %v2143_v33, %v632_v19  ;;  %v2186_v23 = vpop.f32.mrf.mxu1  ;;  %v2281_v40 = vmul.f32 0.2, %v2183_v42  ;;  %v7009_v19 = vld [vmem:[%s9990_s5 + $0x350] ss:$28 sps:$4 sm:$0xff]   ;;  %v643_v31 = vsub.s32 7, %v7871_v43 }
 0x238   :  { %v2145_v45 = vpop.f32.mrf.mxu0  ;;  %v7035_v28 = vld [vmem:[%s9990_s5 + $0x274] ss:$28 sps:$4 sm:$0xff]  }
 0x239   :  { %v2187_v18 = vadd.f32 %v2186_v23, %v2144_v41  ;;  %v2146_v49 = vadd.f32 %v2145_v45, %v636_v20  ;;  %5326 = vmatpush2.bf16.msra.mxu1 %v7036_v32  ;;  %v2188_v34 = vpop.f32.mrf.mxu1  ;;  %v2282_v36 = vmul.f32 0.2, %v2185_v37  ;;  %v2297_v59 = vmax.f32 %v2183_v42, %v2281_v40  ;;  %v7017_v20 = vld [vmem:[%s9990_s5 + $0x31c] ss:$28 sps:$4 sm:$0xff]   ;;  %v7033_v33 = vld [vmem:[%s9990_s5 + $0x270] ss:$28 sps:$4 sm:$0xff]  }
 0x23a   :  { %5327 = vmatprep.subr.bf16.mxu1 %v7044_v17  ;;  %v640_v32 = vrot.slane %v8894_v16, %v639_v22  ;;  %v644_v17 = vrot.slane %v8894_v16, %v643_v31  ;;  %v7041_v41 = vld [vmem:[%s9990_s5 + $0x23c] ss:$28 sps:$4 sm:$0xff]   ;;  %v7047_v16 = vld [vmem:[%s9990_s5 + $0x204] ss:$28 sps:$4 sm:$0xff]  }
 0x23b   :  { %v2289_v38 = vmul.f32 0.2, %v2187_v18  ;;  %v2189_v39 = vadd.f32 %v2188_v34, %v2146_v49  ;;  %v2298_v57 = vmax.f32 %v2185_v37, %v2282_v36  ;;  %v7072_v31 = vld [vmem:[%s9990_s5 + $0x468] ss:$28 sps:$4 sm:$0xff]  }
 0x23d   :  { %v2290_v52 = vmul.f32 0.2, %v2189_v39  ;;  %5328 = vmatpush2.bf16.msra.mxu1 %v7042_v50  ;;  %v2305_v55 = vmax.f32 %v2187_v18, %v2289_v38  ;;  %v7039_v50 = vld [vmem:[%s9990_s5 + $0x238] ss:$28 sps:$4 sm:$0xff]  }
 0x23e   :  { %5329 = vmatprep.subr.bf16.mxu1 %v7050_v35 }
 0x23f   :  { %v2306_v58 = vmax.f32 %v2189_v39, %v2290_v52  ;;  %v8931_v62 = vpack.c.bf16 %v2305_v55, %v2297_v59  ;;  %v7045_v55 = vld [vmem:[%s9990_s5 + $0x200] ss:$28 sps:$4 sm:$0xff]  }
 0x241   :  { %v8926_v60 = vpack.c.bf16 %v2306_v58, %v2298_v57  ;;  %5330 = vmatpush2.bf16.msra.mxu1 %v7048_v54  ;;  %v7053_v57 = vld [vmem:[%s9990_s5 + $0x1cc] ss:$28 sps:$4 sm:$0xff]  }
 0x242   :  { %5385 = vmatprep.subr.bf16.mxu1 %v7056_v56 }
 0x243   :  { %5288 = vmatprep.mubr.bf16.mxu0 %v8926_v60 }
 0x244   :  { %5289 = vmatmul.mubr.bf16.vlgmr.msra.gmra.mxu0 %v8931_v62 }
 0x245   :  { %5343 = vmatpush1.bf16.msra.mxu0 %v6961_v61  ;;  %5374 = vmatprep.mubr.bf16.mxu0 %v8567_v53 }
 0x246   :  { %5344 = vmatprep.subr.bf16.mxu0 %v6969_v11 }
 0x249   :  { %5345 = vmatpush1.bf16.msra.mxu0 %v6967_v63 }
 0x24a   :  { %5346 = vmatprep.subr.bf16.mxu0 %v6975_v0  ;;  %v7051_v0 = vld [vmem:[%s9990_s5 + $0x1c8] ss:$28 sps:$4 sm:$0xff]  }
 0x24d   :  { %5347 = vmatpush1.bf16.msra.mxu0 %v6973_v1 }
 0x24e   :  { %5348 = vmatprep.subr.bf16.mxu0 %v6981_v2  ;;  %v7059_v2 = vld [vmem:[%s9990_s5 + $0x894] ss:$28 sps:$4 sm:$0xff]  }
 0x251   :  { %5349 = vmatpush1.bf16.msra.mxu0 %v6979_v3 }
 0x252   :  { %5350 = vmatprep.subr.bf16.mxu0 %v6987_v4 }
 0x255   :  { %5351 = vmatpush1.bf16.msra.mxu0 %v6985_v5 }
 0x256   :  { %5352 = vmatprep.subr.bf16.mxu0 %v6993_v6 }
 0x259   :  { %5353 = vmatpush1.bf16.msra.mxu0 %v6991_v7  ;;  %v7054_v7 = vld [vmem:[%s9990_s5 + $0x510] ss:$28 sps:$4 sm:$0xff]  }
 0x25a   :  { %5354 = vmatprep.subr.bf16.mxu0 %v6999_v8  ;;  %v7057_v8 = vld [vmem:[%s9990_s5 + $0x890] ss:$28 sps:$4 sm:$0xff]  }
 0x25d   :  { %5355 = vmatpush1.bf16.msra.mxu0 %v6997_v9 }
 0x25e   :  { %5356 = vmatprep.subr.bf16.mxu0 %v7005_v12  ;;  %v7062_v12 = vld [vmem:[%s9990_s5 + $0x4dc] ss:$28 sps:$4 sm:$0xff]  }
 0x261   :  { %5357 = vmatpush1.bf16.msra.mxu0 %v7003_v14  ;;  %v7065_v14 = vld [vmem:[%s9990_s5 + $0x85c] ss:$28 sps:$4 sm:$0xff]  }
 0x262   :  { %5358 = vmatprep.subr.bf16.mxu0 %v7011_v15  ;;  %v7060_v15 = vld [vmem:[%s9990_s5 + $0x4d8] ss:$28 sps:$4 sm:$0xff]  }
 0x265   :  { %5359 = vmatpush2.bf16.msra.mxu0 %v7009_v19  ;;  %v7063_v19 = vld [vmem:[%s9990_s5 + $0x858] ss:$28 sps:$4 sm:$0xff]  }
 0x266   :  { %5360 = vmatprep.subr.bf16.mxu0 %v7017_v20  ;;  %v7068_v20 = vld [vmem:[%s9990_s5 + $0x4a4] ss:$28 sps:$4 sm:$0xff]  }
 0x269   :  { %5361 = vmatpush2.bf16.msra.mxu0 %v7015_v25  ;;  %v7071_v25 = vld [vmem:[%s9990_s5 + $0x824] ss:$28 sps:$4 sm:$0xff]  }
 0x26a   :  { %5362 = vmatprep.subr.bf16.mxu0 %v7023_v21  ;;  %v7066_v21 = vld [vmem:[%s9990_s5 + $0x4a0] ss:$28 sps:$4 sm:$0xff]  }
 0x26d   :  { %5363 = vmatpush2.bf16.msra.mxu0 %v7021_v27  ;;  %v7069_v27 = vld [vmem:[%s9990_s5 + $0x820] ss:$28 sps:$4 sm:$0xff]  }
 0x26e   :  { %5364 = vmatprep.subr.bf16.mxu0 %v7029_v26  ;;  %v7074_v26 = vld [vmem:[%s9990_s5 + $0x46c] ss:$28 sps:$4 sm:$0xff]  }
 0x271   :  { %5365 = vmatpush2.bf16.msra.mxu0 %v7027_v24  ;;  %v7077_v24 = vld [vmem:[%s9990_s5 + $0x7ec] ss:$28 sps:$4 sm:$0xff]  }
 0x272   :  { %v2225_v37 = vpop.f32.mrf.mxu0  ;;  %5366 = vmatprep.subr.bf16.mxu0 %v7035_v28  ;;  %v7075_v28 = vld [vmem:[%s9990_s5 + $0x7e8] ss:$28 sps:$4 sm:$0xff]  }
 0x273   :  { %v2268_v23 = vpop.f32.mrf.mxu1  ;;  %v2226_v42 = vadd.f32 %v2225_v37, %v640_v32  ;;  %v7081_v37 = vld [vmem:[%s9990_s5 + $0x7b0] ss:$28 sps:$4 sm:$0xff]  }
 0x274   :  { %v2227_v45 = vpop.f32.mrf.mxu0 }
 0x275   :  { %v2228_v18 = vadd.f32 %v2227_v45, %v644_v17  ;;  %v2270_v49 = vpop.f32.mrf.mxu1  ;;  %5367 = vmatpush2.bf16.msra.mxu0 %v7033_v33  ;;  %v2269_v39 = vadd.f32 %v2268_v23, %v2226_v42  ;;  %v7083_v33 = vld [vmem:[%s9990_s5 + $0x7b4] ss:$28 sps:$4 sm:$0xff]   ;;  %v7089_v23 = vld [vmem:[%s9990_s5 + $0x77c] ss:$28 sps:$4 sm:$0xff]  }
 0x276   :  { %v2229_v34 = vpop.f32.mrf.mxu0  ;;  %5368 = vmatprep.subr.bf16.mxu0 %v7041_v41  ;;  %v7086_v41 = vld [vmem:[%s9990_s5 + $0x3fc] ss:$28 sps:$4 sm:$0xff]  }
 0x277   :  { %v2271_v35 = vadd.f32 %v2270_v49, %v2228_v18  ;;  %v2230_v36 = vadd.f32 %v2229_v34, %v640_v32  ;;  %v2272_v38 = vpop.f32.mrf.mxu1  ;;  %v2283_v11 = vmul.f32 0.2, %v2269_v39  ;;  %v7080_v32 = vld [vmem:[%s9990_s5 + $0x434] ss:$28 sps:$4 sm:$0xff]   ;;  %v7092_v18 = vld [vmem:[%s9990_s5 + $0x3c4] ss:$28 sps:$4 sm:$0xff]  }
 0x278   :  { %v2231_v40 = vpop.f32.mrf.mxu0  ;;  %v7084_v42 = vld [vmem:[%s9990_s5 + $0x3f8] ss:$28 sps:$4 sm:$0xff]   ;;  %v7095_v49 = vld [vmem:[%s9990_s5 + $0x744] ss:$28 sps:$4 sm:$0xff]  }
 0x279   :  { %v2273_v52 = vadd.f32 %v2272_v38, %v2230_v36  ;;  %v2232_v54 = vadd.f32 %v2231_v40, %v644_v17  ;;  %5369 = vmatpush2.bf16.msra.mxu0 %v7039_v50  ;;  %v2274_v56 = vpop.f32.mrf.mxu1  ;;  %v2284_v58 = vmul.f32 0.2, %v2271_v35  ;;  %v2299_v5 = vmax.f32 %v2269_v39, %v2283_v11  ;;  %v7078_v17 = vld [vmem:[%s9990_s5 + $0x430] ss:$28 sps:$4 sm:$0xff]   ;;  %v7087_v45 = vld [vmem:[%s9990_s5 + $0x778] ss:$28 sps:$4 sm:$0xff]  }
 0x27a   :  { %5370 = vmatprep.subr.bf16.mxu0 %v7047_v16  ;;  %v7090_v50 = vld [vmem:[%s9990_s5 + $0x3c0] ss:$28 sps:$4 sm:$0xff]   ;;  %v7098_v16 = vld [vmem:[%s9990_s5 + $0x38c] ss:$28 sps:$4 sm:$0xff]   ;;  %v7104_v39 = vld [vmem:[%s9990_s5 + $0x6d4] ss:$28 sps:$4 sm:$0xff]  }
 0x27b   :  { %v2291_v59 = vmul.f32 0.2, %v2273_v52  ;;  %v2275_v61 = vadd.f32 %v2274_v56, %v2232_v54  ;;  %v2300_v3 = vmax.f32 %v2271_v35, %v2284_v58  ;;  %v7093_v34 = vld [vmem:[%s9990_s5 + $0x740] ss:$28 sps:$4 sm:$0xff]   ;;  %v7101_v35 = vld [vmem:[%s9990_s5 + $0x70c] ss:$28 sps:$4 sm:$0xff]  }
 0x27c   :  { %v7096_v36 = vld [vmem:[%s9990_s5 + $0x388] ss:$28 sps:$4 sm:$0xff]   ;;  %v7107_v40 = vld [vmem:[%s9990_s5 + $0xa54] ss:$28 sps:$4 sm:$0xff]   ;;  %v7113_v56 = vld [vmem:[%s9990_s5 + $0xa1c] ss:$28 sps:$4 sm:$0xff]  }
 0x27d   :  { %v2292_v63 = vmul.f32 0.2, %v2275_v61  ;;  %5371 = vmatpush2.bf16.msra.mxu0 %v7045_v55  ;;  %v2307_v1 = vmax.f32 %v2273_v52, %v2291_v59  ;;  %v7099_v38 = vld [vmem:[%s9990_s5 + $0x708] ss:$28 sps:$4 sm:$0xff]   ;;  %v7102_v52 = vld [vmem:[%s9990_s5 + $0x6d0] ss:$28 sps:$4 sm:$0xff]  }
 0x27e   :  { %5372 = vmatprep.subr.bf16.mxu0 %v7053_v57  ;;  %v7105_v54 = vld [vmem:[%s9990_s5 + $0xa50] ss:$28 sps:$4 sm:$0xff]   ;;  %v7110_v55 = vld [vmem:[%s9990_s5 + $0x69c] ss:$28 sps:$4 sm:$0xff]   ;;  %v7116_v59 = vld [vmem:[%s9990_s5 + $0x664] ss:$28 sps:$4 sm:$0xff]  }
 0x27f   :  { %v2308_v4 = vmax.f32 %v2275_v61, %v2292_v63  ;;  %v9043_v9 = vpack.c.bf16 %v2307_v1, %v2299_v5  ;;  %v7108_v57 = vld [vmem:[%s9990_s5 + $0x698] ss:$28 sps:$4 sm:$0xff]   ;;  %v7119_v61 = vld [vmem:[%s9990_s5 + $0x9e4] ss:$28 sps:$4 sm:$0xff]   ;;  %v7125_v1 = vld [vmem:[%s9990_s5 + $0x9ac] ss:$28 sps:$4 sm:$0xff]  }
 0x280   :  { %v7111_v58 = vld [vmem:[%s9990_s5 + $0xa18] ss:$28 sps:$4 sm:$0xff]   ;;  %v7114_v11 = vld [vmem:[%s9990_s5 + $0x660] ss:$28 sps:$4 sm:$0xff]  }
 0x281   :  { %v9035_v6 = vpack.c.bf16 %v2308_v4, %v2300_v3  ;;  %5373 = vmatpush2.bf16.msra.mxu0 %v7051_v0  ;;  %v7117_v63 = vld [vmem:[%s9990_s5 + $0x9e0] ss:$28 sps:$4 sm:$0xff]   ;;  %v7122_v0 = vld [vmem:[%s9990_s5 + $0x62c] ss:$28 sps:$4 sm:$0xff]   ;;  %v7128_v4 = vld [vmem:[%s9990_s5 + $0x5f4] ss:$28 sps:$4 sm:$0xff]  }
 0x282   :  { %5428 = vmatprep.subr.bf16.mxu0 %v7059_v2  ;;  %v7120_v2 = vld [vmem:[%s9990_s5 + $0x628] ss:$28 sps:$4 sm:$0xff]   ;;  %v7131_v5 = vld [vmem:[%s9990_s5 + $0x974] ss:$28 sps:$4 sm:$0xff]  }
 0x283   :  { %5331 = vmatprep.mubr.bf16.mxu1 %v9035_v6  ;;  %v7123_v3 = vld [vmem:[%s9990_s5 + $0x9a8] ss:$28 sps:$4 sm:$0xff]  }
 0x284   :  { %5375 = vmatmul.mubr.bf16.vlgmr.msra.gmra.mxu0 %v8714_v51  ;;  %5332 = vmatmul.mubr.bf16.vlgmr.msra.gmra.mxu1 %v9043_v9 }
 0x285   :  { %5386 = vmatpush1.bf16.msra.mxu1 %v7054_v7  ;;  %5429 = vmatpush1.bf16.msra.mxu0 %v7057_v8  ;;  %v7126_v7 = vld [vmem:[%s9990_s5 + $0x5f0] ss:$28 sps:$4 sm:$0xff]  }
 0x286   :  { %5460 = vmatprep.mubr.bf16.mxu0 %v8926_v60  ;;  %5417 = vmatprep.mubr.bf16.mxu1 %v8751_v29  ;;  %v7129_v8 = vld [vmem:[%s9990_s5 + $0x970] ss:$28 sps:$4 sm:$0xff]  }
 0x287   :  { %5387 = vmatprep.subr.bf16.mxu1 %v7062_v12  ;;  %5430 = vmatprep.subr.bf16.mxu0 %v7065_v14  ;;  %v7134_v12 = vld [vmem:[%s9990_s5 + $0x5bc] ss:$28 sps:$4 sm:$0xff]  }
 0x288   :  { %v7137_v14 = vld [vmem:[%s9990_s5 + $0x93c] ss:$28 sps:$4 sm:$0xff]  }
 0x289   :  { %5388 = vmatpush1.bf16.msra.mxu1 %v7060_v15  ;;  %5431 = vmatpush1.bf16.msra.mxu0 %v7063_v19  ;;  %v7132_v15 = vld [vmem:[%s9990_s5 + $0x5b8] ss:$28 sps:$4 sm:$0xff]  }
 0x28a   :  { %5389 = vmatprep.subr.bf16.mxu1 %v7068_v20  ;;  %5432 = vmatprep.subr.bf16.mxu0 %v7071_v25  ;;  %v7135_v19 = vld [vmem:[%s9990_s5 + $0x938] ss:$28 sps:$4 sm:$0xff]   ;;  %v7140_v20 = vld [vmem:[%s9990_s5 + $0x584] ss:$28 sps:$4 sm:$0xff]  }
 0x28b   :  { %v7143_v25 = vld [vmem:[%s9990_s5 + $0x904] ss:$28 sps:$4 sm:$0xff]  }
 0x28d   :  { %5390 = vmatpush1.bf16.msra.mxu1 %v7066_v21  ;;  %5433 = vmatpush1.bf16.msra.mxu0 %v7069_v27  ;;  %v7138_v21 = vld [vmem:[%s9990_s5 + $0x580] ss:$28 sps:$4 sm:$0xff]  }
 0x28e   :  { %5391 = vmatprep.subr.bf16.mxu1 %v7074_v26  ;;  %5434 = vmatprep.subr.bf16.mxu0 %v7077_v24  ;;  %v7141_v27 = vld [vmem:[%s9990_s5 + $0x900] ss:$28 sps:$4 sm:$0xff]   ;;  %v7146_v26 = vld [vmem:[%s9990_s5 + $0x54c] ss:$28 sps:$4 sm:$0xff]  }
 0x28f   :  { %v7149_v24 = vld [vmem:[%s9990_s5 + $0x8cc] ss:$28 sps:$4 sm:$0xff]  }
 0x291   :  { %5392 = vmatpush1.bf16.msra.mxu1 %v7072_v31  ;;  %5435 = vmatpush1.bf16.msra.mxu0 %v7075_v28  ;;  %v7144_v31 = vld [vmem:[%s9990_s5 + $0x548] ss:$28 sps:$4 sm:$0xff]  }
 0x292   :  { %5393 = vmatprep.subr.bf16.mxu1 %v7080_v32  ;;  %5436 = vmatprep.subr.bf16.mxu0 %v7083_v33  ;;  %v7147_v28 = vld [vmem:[%s9990_s5 + $0x8c8] ss:$28 sps:$4 sm:$0xff]   ;;  %v7152_v32 = vld [vmem:[%s9990_s5 + $0xc14] ss:$28 sps:$4 sm:$0xff]   ;;  %v7155_v33 = vld [vmem:[%s9990_s5 + $0x19c] ss:$28 sps:$4 sm:$0xff]  }
 0x295   :  { %5394 = vmatpush1.bf16.msra.mxu1 %v7078_v17  ;;  %5437 = vmatpush1.bf16.msra.mxu0 %v7081_v37  ;;  %v7150_v17 = vld [vmem:[%s9990_s5 + $0xc10] ss:$28 sps:$4 sm:$0xff]   ;;  %v7153_v37 = vld [vmem:[%s9990_s5 + $0x198] ss:$28 sps:$4 sm:$0xff]  }
 0x296   :  { %5395 = vmatprep.subr.bf16.mxu1 %v7086_v41  ;;  %5438 = vmatprep.subr.bf16.mxu0 %v7089_v23  ;;  %v7158_v41 = vld [vmem:[%s9990_s5 + $0xbdc] ss:$28 sps:$4 sm:$0xff]   ;;  %v7161_v23 = vld [vmem:[%s9990_s5 + $0x164] ss:$28 sps:$4 sm:$0xff]  }
 0x299   :  { %5396 = vmatpush1.bf16.msra.mxu1 %v7084_v42  ;;  %5439 = vmatpush1.bf16.msra.mxu0 %v7087_v45  ;;  %v7156_v42 = vld [vmem:[%s9990_s5 + $0xbd8] ss:$28 sps:$4 sm:$0xff]   ;;  %v7159_v45 = vld [vmem:[%s9990_s5 + $0x160] ss:$28 sps:$4 sm:$0xff]  }
 0x29a   :  { %5397 = vmatprep.subr.bf16.mxu1 %v7092_v18  ;;  %5440 = vmatprep.subr.bf16.mxu0 %v7095_v49  ;;  %v7164_v18 = vld [vmem:[%s9990_s5 + $0xba4] ss:$28 sps:$4 sm:$0xff]   ;;  %v7167_v49 = vld [vmem:[%s9990_s5 + $0x12c] ss:$28 sps:$4 sm:$0xff]  }
 0x29d   :  { %5398 = vmatpush1.bf16.msra.mxu1 %v7090_v50  ;;  %5441 = vmatpush1.bf16.msra.mxu0 %v7093_v34  ;;  %v7162_v50 = vld [vmem:[%s9990_s5 + $0xba0] ss:$28 sps:$4 sm:$0xff]   ;;  %v7165_v34 = vld [vmem:[%s9990_s5 + $0x128] ss:$28 sps:$4 sm:$0xff]  }
 0x29e   :  { %5399 = vmatprep.subr.bf16.mxu1 %v7098_v16  ;;  %5442 = vmatprep.subr.bf16.mxu0 %v7101_v35  ;;  %v7170_v16 = vld [vmem:[%s9990_s5 + $0xb6c] ss:$28 sps:$4 sm:$0xff]   ;;  %v7173_v35 = vld [vmem:[%s9990_s5 + $0xf4] ss:$28 sps:$4 sm:$0xff]  }
 0x2a1   :  { %5400 = vmatpush1.bf16.msra.mxu1 %v7096_v36  ;;  %5443 = vmatpush1.bf16.msra.mxu0 %v7099_v38  ;;  %v7168_v36 = vld [vmem:[%s9990_s5 + $0xb68] ss:$28 sps:$4 sm:$0xff]   ;;  %v7171_v38 = vld [vmem:[%s9990_s5 + $0xf0] ss:$28 sps:$4 sm:$0xff]  }
 0x2a2   :  { %5401 = vmatprep.subr.bf16.mxu1 %v7104_v39  ;;  %5444 = vmatprep.subr.bf16.mxu0 %v7107_v40  ;;  %v7176_v39 = vld [vmem:[%s9990_s5 + $0xb34] ss:$28 sps:$4 sm:$0xff]   ;;  %v7179_v40 = vld [vmem:[%s9990_s5 + $0xbc] ss:$28 sps:$4 sm:$0xff]  }
 0x2a5   :  { %5402 = vmatpush2.bf16.msra.mxu1 %v7102_v52  ;;  %5445 = vmatpush2.bf16.msra.mxu0 %v7105_v54  ;;  %v7174_v52 = vld [vmem:[%s9990_s5 + $0xb30] ss:$28 sps:$4 sm:$0xff]   ;;  %v7177_v54 = vld [vmem:[%s9990_s5 + $0xb8] ss:$28 sps:$4 sm:$0xff]  }
 0x2a6   :  { %5403 = vmatprep.subr.bf16.mxu1 %v7110_v55  ;;  %5446 = vmatprep.subr.bf16.mxu0 %v7113_v56  ;;  %v7182_v55 = vld [vmem:[%s9990_s5 + $0xafc] ss:$28 sps:$4 sm:$0xff]   ;;  %v7185_v56 = vld [vmem:[%s9990_s5 + $0x84] ss:$28 sps:$4 sm:$0xff]  }
 0x2a9   :  { %5404 = vmatpush2.bf16.msra.mxu1 %v7108_v57  ;;  %5447 = vmatpush2.bf16.msra.mxu0 %v7111_v58  ;;  %v7180_v57 = vld [vmem:[%s9990_s5 + $0xaf8] ss:$28 sps:$4 sm:$0xff]   ;;  %v7183_v58 = vld [vmem:[%s9990_s5 + $0x80] ss:$28 sps:$4 sm:$0xff]  }
 0x2aa   :  { %5405 = vmatprep.subr.bf16.mxu1 %v7116_v59  ;;  %5448 = vmatprep.subr.bf16.mxu0 %v7119_v61  ;;  %v7188_v59 = vld [vmem:[%s9990_s5 + $0xac4] ss:$28 sps:$4 sm:$0xff]   ;;  %v7191_v61 = vld [vmem:[%s9990_s5 + $0x4c] ss:$28 sps:$4 sm:$0xff]  }
 0x2ad   :  { %5406 = vmatpush2.bf16.msra.mxu1 %v7114_v11  ;;  %5449 = vmatpush2.bf16.msra.mxu0 %v7117_v63  ;;  %v7186_v11 = vld [vmem:[%s9990_s5 + $0xac0] ss:$28 sps:$4 sm:$0xff]   ;;  %v7189_v63 = vld [vmem:[%s9990_s5 + $0x48] ss:$28 sps:$4 sm:$0xff]  }
 0x2ae   :  { %5407 = vmatprep.subr.bf16.mxu1 %v7122_v0  ;;  %5450 = vmatprep.subr.bf16.mxu0 %v7125_v1  ;;  %v7194_v0 = vld [vmem:[%s9990_s5 + $0xa8c] ss:$28 sps:$4 sm:$0xff]   ;;  %v7197_v1 = vld [vmem:[%s9990_s5 + $0x14] ss:$28 sps:$4 sm:$0xff]  }
 0x2b1   :  { %5408 = vmatpush2.bf16.msra.mxu1 %v7120_v2  ;;  %5451 = vmatpush2.bf16.msra.mxu0 %v7123_v3  ;;  %v7192_v2 = vld [vmem:[%s9990_s5 + $0xa88] ss:$28 sps:$4 sm:$0xff]   ;;  %v7195_v3 = vld [vmem:[%s9990_s5 + $0x10] ss:$28 sps:$4 sm:$0xff]  }
 0x2b2   :  { %5409 = vmatprep.subr.bf16.mxu1 %v7128_v4  ;;  %5452 = vmatprep.subr.bf16.mxu0 %v7131_v5  ;;  %v7200_v4 = vld [vmem:[%s9990_s5 + $0xdd4] ss:$28 sps:$4 sm:$0xff]   ;;  %v7203_v5 = vld [vmem:[%s9990_s5 + $0x35c] ss:$28 sps:$4 sm:$0xff]  }
 0x2b5   :  { %5410 = vmatpush2.bf16.msra.mxu1 %v7126_v7  ;;  %5453 = vmatpush2.bf16.msra.mxu0 %v7129_v8  ;;  %v7198_v7 = vld [vmem:[%s9990_s5 + $0xdd0] ss:$28 sps:$4 sm:$0xff]   ;;  %v7201_v8 = vld [vmem:[%s9990_s5 + $0x358] ss:$28 sps:$4 sm:$0xff]  }
 0x2b6   :  { %5411 = vmatprep.subr.bf16.mxu1 %v7134_v12  ;;  %5454 = vmatprep.subr.bf16.mxu0 %v7137_v14  ;;  %v7206_v12 = vld [vmem:[%s9990_s5 + $0xd9c] ss:$28 sps:$4 sm:$0xff]   ;;  %v7209_v14 = vld [vmem:[%s9990_s5 + $0x324] ss:$28 sps:$4 sm:$0xff]  }
 0x2b9   :  { %5412 = vmatpush2.bf16.msra.mxu1 %v7132_v15  ;;  %5455 = vmatpush2.bf16.msra.mxu0 %v7135_v19  ;;  %v7204_v15 = vld [vmem:[%s9990_s5 + $0xd98] ss:$28 sps:$4 sm:$0xff]   ;;  %v7207_v19 = vld [vmem:[%s9990_s5 + $0x320] ss:$28 sps:$4 sm:$0xff]  }
 0x2ba   :  { %5413 = vmatprep.subr.bf16.mxu1 %v7140_v20  ;;  %5456 = vmatprep.subr.bf16.mxu0 %v7143_v25  ;;  %v7212_v20 = vld [vmem:[%s9990_s5 + $0xd64] ss:$28 sps:$4 sm:$0xff]   ;;  %v7215_v25 = vld [vmem:[%s9990_s5 + $0x2ec] ss:$28 sps:$4 sm:$0xff]  }
 0x2bd   :  { %5414 = vmatpush2.bf16.msra.mxu1 %v7138_v21  ;;  %5457 = vmatpush2.bf16.msra.mxu0 %v7141_v27  ;;  %v7210_v21 = vld [vmem:[%s9990_s5 + $0xd60] ss:$28 sps:$4 sm:$0xff]   ;;  %v7213_v27 = vld [vmem:[%s9990_s5 + $0x2e8] ss:$28 sps:$4 sm:$0xff]  }
 0x2be   :  { %5415 = vmatprep.subr.bf16.mxu1 %v7146_v26  ;;  %5458 = vmatprep.subr.bf16.mxu0 %v7149_v24  ;;  %v7218_v26 = vld [vmem:[%s9990_s5 + $0xd2c] ss:$28 sps:$4 sm:$0xff]   ;;  %v7221_v24 = vld [vmem:[%s9990_s5 + $0x2b4] ss:$28 sps:$4 sm:$0xff]  }
 0x2c1   :  { %5416 = vmatpush2.bf16.msra.mxu1 %v7144_v31  ;;  %5459 = vmatpush2.bf16.msra.mxu0 %v7147_v28  ;;  %v7216_v31 = vld [vmem:[%s9990_s5 + $0xd28] ss:$28 sps:$4 sm:$0xff]   ;;  %v7219_v28 = vld [vmem:[%s9990_s5 + $0x2b0] ss:$28 sps:$4 sm:$0xff]  }
 0x2c2   :  { %5471 = vmatprep.subr.bf16.mxu1 %v7152_v32  ;;  %5514 = vmatprep.subr.bf16.mxu0 %v7155_v33  ;;  %v7224_v32 = vld [vmem:[%s9990_s5 + $0xcf4] ss:$28 sps:$4 sm:$0xff]   ;;  %v7227_v33 = vld [vmem:[%s9990_s5 + $0x27c] ss:$28 sps:$4 sm:$0xff]  }
 0x2c4   :  { %5418 = vmatmul.mubr.bf16.vlgmr.msra.gmra.mxu1 %v8753_v30  ;;  %5461 = vmatmul.mubr.bf16.vlgmr.msra.gmra.mxu0 %v8931_v62 }
 0x2c5   :  { %5472 = vmatpush1.bf16.msra.mxu1 %v7150_v17  ;;  %5503 = vmatprep.mubr.bf16.mxu1 %v9035_v6  ;;  %v7222_v17 = vld [vmem:[%s9990_s5 + $0xcf0] ss:$28 sps:$4 sm:$0xff]  }
 0x2c6   :  { %5515 = vmatpush1.bf16.msra.mxu0 %v7153_v37  ;;  %5546 = vmatprep.mubr.bf16.mxu0 %v8567_v53  ;;  %v7225_v37 = vld [vmem:[%s9990_s5 + $0x278] ss:$28 sps:$4 sm:$0xff]  }
 0x2c7   :  { %5473 = vmatprep.subr.bf16.mxu1 %v7158_v41  ;;  %5516 = vmatprep.subr.bf16.mxu0 %v7161_v23  ;;  %v7230_v41 = vld [vmem:[%s9990_s5 + $0xcbc] ss:$28 sps:$4 sm:$0xff]   ;;  %v7233_v23 = vld [vmem:[%s9990_s5 + $0x244] ss:$28 sps:$4 sm:$0xff]  }
 0x2c9   :  { %5474 = vmatpush1.bf16.msra.mxu1 %v7156_v42  ;;  %v7228_v42 = vld [vmem:[%s9990_s5 + $0xcb8] ss:$28 sps:$4 sm:$0xff]  }
 0x2ca   :  { %5517 = vmatpush1.bf16.msra.mxu0 %v7159_v45  ;;  %5475 = vmatprep.subr.bf16.mxu1 %v7164_v18  ;;  %v7231_v45 = vld [vmem:[%s9990_s5 + $0x240] ss:$28 sps:$4 sm:$0xff]  }
 0x2cb   :  { %5518 = vmatprep.subr.bf16.mxu0 %v7167_v49  ;;  %v7236_v18 = vld [vmem:[%s9990_s5 + $0xc84] ss:$28 sps:$4 sm:$0xff]   ;;  %v7239_v49 = vld [vmem:[%s9990_s5 + $0x20c] ss:$28 sps:$4 sm:$0xff]  }
 0x2cd   :  { %5476 = vmatpush1.bf16.msra.mxu1 %v7162_v50  ;;  %v7234_v50 = vld [vmem:[%s9990_s5 + $0xc80] ss:$28 sps:$4 sm:$0xff]  }
 0x2ce   :  { %5519 = vmatpush1.bf16.msra.mxu0 %v7165_v34  ;;  %5477 = vmatprep.subr.bf16.mxu1 %v7170_v16  ;;  %v7237_v34 = vld [vmem:[%s9990_s5 + $0x208] ss:$28 sps:$4 sm:$0xff]  }
 0x2cf   :  { %5520 = vmatprep.subr.bf16.mxu0 %v7173_v35  ;;  %v7242_v16 = vld [vmem:[%s9990_s5 + $0xc4c] ss:$28 sps:$4 sm:$0xff]   ;;  %v7245_v35 = vld [vmem:[%s9990_s5 + $0x1d4] ss:$28 sps:$4 sm:$0xff]  }
 0x2d1   :  { %5478 = vmatpush1.bf16.msra.mxu1 %v7168_v36  ;;  %v7240_v36 = vld [vmem:[%s9990_s5 + $0xc48] ss:$28 sps:$4 sm:$0xff]  }
 0x2d2   :  { %5521 = vmatpush1.bf16.msra.mxu0 %v7171_v38  ;;  %5479 = vmatprep.subr.bf16.mxu1 %v7176_v39  ;;  %v7243_v38 = vld [vmem:[%s9990_s5 + $0x1d0] ss:$28 sps:$4 sm:$0xff]   ;;  %v7248_v39 = vld [vmem:[%s9990_s5 + $0x51c] ss:$28 sps:$4 sm:$0xff]  }
 0x2d3   :  { %5522 = vmatprep.subr.bf16.mxu0 %v7179_v40  ;;  %v7251_v40 = vld [vmem:[%s9990_s5 + $0x89c] ss:$28 sps:$4 sm:$0xff]  }
 0x2d5   :  { %5480 = vmatpush1.bf16.msra.mxu1 %v7174_v52  ;;  %v7246_v52 = vld [vmem:[%s9990_s5 + $0x518] ss:$28 sps:$4 sm:$0xff]  }
 0x2d6   :  { %5523 = vmatpush1.bf16.msra.mxu0 %v7177_v54  ;;  %5481 = vmatprep.subr.bf16.mxu1 %v7182_v55  ;;  %v7249_v54 = vld [vmem:[%s9990_s5 + $0x898] ss:$28 sps:$4 sm:$0xff]   ;;  %v7254_v55 = vld [vmem:[%s9990_s5 + $0x4e4] ss:$28 sps:$4 sm:$0xff]  }
 0x2d7   :  { %5524 = vmatprep.subr.bf16.mxu0 %v7185_v56  ;;  %v7257_v56 = vld [vmem:[%s9990_s5 + $0x864] ss:$28 sps:$4 sm:$0xff]  }
 0x2d9   :  { %5482 = vmatpush1.bf16.msra.mxu1 %v7180_v57  ;;  %v7252_v57 = vld [vmem:[%s9990_s5 + $0x4e0] ss:$28 sps:$4 sm:$0xff]  }
 0x2da   :  { %5525 = vmatpush1.bf16.msra.mxu0 %v7183_v58  ;;  %5483 = vmatprep.subr.bf16.mxu1 %v7188_v59  ;;  %v7255_v58 = vld [vmem:[%s9990_s5 + $0x860] ss:$28 sps:$4 sm:$0xff]   ;;  %v7260_v59 = vld [vmem:[%s9990_s5 + $0x4ac] ss:$28 sps:$4 sm:$0xff]  }
 0x2db   :  { %5526 = vmatprep.subr.bf16.mxu0 %v7191_v61  ;;  %v7263_v61 = vld [vmem:[%s9990_s5 + $0x82c] ss:$28 sps:$4 sm:$0xff]  }
 0x2dd   :  { %5484 = vmatpush1.bf16.msra.mxu1 %v7186_v11  ;;  %v7258_v11 = vld [vmem:[%s9990_s5 + $0x4a8] ss:$28 sps:$4 sm:$0xff]  }
 0x2de   :  { %5527 = vmatpush1.bf16.msra.mxu0 %v7189_v63  ;;  %5485 = vmatprep.subr.bf16.mxu1 %v7194_v0  ;;  %v7261_v63 = vld [vmem:[%s9990_s5 + $0x828] ss:$28 sps:$4 sm:$0xff]   ;;  %v7266_v0 = vld [vmem:[%s9990_s5 + $0x474] ss:$28 sps:$4 sm:$0xff]  }
 0x2df   :  { %5528 = vmatprep.subr.bf16.mxu0 %v7197_v1  ;;  %v7269_v1 = vld [vmem:[%s9990_s5 + $0x7f4] ss:$28 sps:$4 sm:$0xff]  }
 0x2e1   :  { %5486 = vmatpush1.bf16.msra.mxu1 %v7192_v2  ;;  %v7264_v2 = vld [vmem:[%s9990_s5 + $0x470] ss:$28 sps:$4 sm:$0xff]  }
 0x2e2   :  { %5529 = vmatpush1.bf16.msra.mxu0 %v7195_v3  ;;  %5487 = vmatprep.subr.bf16.mxu1 %v7200_v4  ;;  %v7267_v3 = vld [vmem:[%s9990_s5 + $0x7f0] ss:$28 sps:$4 sm:$0xff]   ;;  %v7272_v4 = vld [vmem:[%s9990_s5 + $0x43c] ss:$28 sps:$4 sm:$0xff]  }
 0x2e3   :  { %5530 = vmatprep.subr.bf16.mxu0 %v7203_v5  ;;  %v7275_v5 = vld [vmem:[%s9990_s5 + $0x7bc] ss:$28 sps:$4 sm:$0xff]  }
 0x2e5   :  { %5488 = vmatpush2.bf16.msra.mxu1 %v7198_v7  ;;  %v7270_v7 = vld [vmem:[%s9990_s5 + $0x438] ss:$28 sps:$4 sm:$0xff]  }
 0x2e6   :  { %5531 = vmatpush2.bf16.msra.mxu0 %v7201_v8  ;;  %5489 = vmatprep.subr.bf16.mxu1 %v7206_v12  ;;  %v7273_v8 = vld [vmem:[%s9990_s5 + $0x7b8] ss:$28 sps:$4 sm:$0xff]   ;;  %v7278_v12 = vld [vmem:[%s9990_s5 + $0x404] ss:$28 sps:$4 sm:$0xff]  }
 0x2e7   :  { %5532 = vmatprep.subr.bf16.mxu0 %v7209_v14  ;;  %v7281_v14 = vld [vmem:[%s9990_s5 + $0x784] ss:$28 sps:$4 sm:$0xff]  }
 0x2e9   :  { %5490 = vmatpush2.bf16.msra.mxu1 %v7204_v15  ;;  %v7276_v15 = vld [vmem:[%s9990_s5 + $0x400] ss:$28 sps:$4 sm:$0xff]  }
 0x2ea   :  { %5533 = vmatpush2.bf16.msra.mxu0 %v7207_v19  ;;  %5491 = vmatprep.subr.bf16.mxu1 %v7212_v20  ;;  %v7279_v19 = vld [vmem:[%s9990_s5 + $0x780] ss:$28 sps:$4 sm:$0xff]   ;;  %v7284_v20 = vld [vmem:[%s9990_s5 + $0x3cc] ss:$28 sps:$4 sm:$0xff]  }
 0x2eb   :  { %5534 = vmatprep.subr.bf16.mxu0 %v7215_v25  ;;  %v7287_v25 = vld [vmem:[%s9990_s5 + $0x74c] ss:$28 sps:$4 sm:$0xff]  }
 0x2ed   :  { %5492 = vmatpush2.bf16.msra.mxu1 %v7210_v21  ;;  %v7282_v21 = vld [vmem:[%s9990_s5 + $0x3c8] ss:$28 sps:$4 sm:$0xff]  }
 0x2ee   :  { %5535 = vmatpush2.bf16.msra.mxu0 %v7213_v27  ;;  %5493 = vmatprep.subr.bf16.mxu1 %v7218_v26  ;;  %v7285_v27 = vld [vmem:[%s9990_s5 + $0x748] ss:$28 sps:$4 sm:$0xff]   ;;  %v7290_v26 = vld [vmem:[%s9990_s5 + $0x394] ss:$28 sps:$4 sm:$0xff]  }
 0x2ef   :  { %5536 = vmatprep.subr.bf16.mxu0 %v7221_v24  ;;  %v7293_v24 = vld [vmem:[%s9990_s5 + $0x714] ss:$28 sps:$4 sm:$0xff]  }
 0x2f1   :  { %5494 = vmatpush2.bf16.msra.mxu1 %v7216_v31  ;;  %v7288_v31 = vld [vmem:[%s9990_s5 + $0x390] ss:$28 sps:$4 sm:$0xff]  }
 0x2f2   :  { %5537 = vmatpush2.bf16.msra.mxu0 %v7219_v28  ;;  %5495 = vmatprep.subr.bf16.mxu1 %v7224_v32  ;;  %v7291_v28 = vld [vmem:[%s9990_s5 + $0x710] ss:$28 sps:$4 sm:$0xff]   ;;  %v7296_v32 = vld [vmem:[%s9990_s5 + $0x6dc] ss:$28 sps:$4 sm:$0xff]  }
 0x2f3   :  { %5538 = vmatprep.subr.bf16.mxu0 %v7227_v33  ;;  %v7299_v33 = vld [vmem:[%s9990_s5 + $0xa5c] ss:$28 sps:$4 sm:$0xff]  }
 0x2f5   :  { %5496 = vmatpush2.bf16.msra.mxu1 %v7222_v17  ;;  %v7294_v17 = vld [vmem:[%s9990_s5 + $0x6d8] ss:$28 sps:$4 sm:$0xff]  }
 0x2f6   :  { %5539 = vmatpush2.bf16.msra.mxu0 %v7225_v37  ;;  %5497 = vmatprep.subr.bf16.mxu1 %v7230_v41  ;;  %v7297_v37 = vld [vmem:[%s9990_s5 + $0xa58] ss:$28 sps:$4 sm:$0xff]   ;;  %v7302_v41 = vld [vmem:[%s9990_s5 + $0x6a4] ss:$28 sps:$4 sm:$0xff]  }
 0x2f7   :  { %5540 = vmatprep.subr.bf16.mxu0 %v7233_v23  ;;  %v7305_v23 = vld [vmem:[%s9990_s5 + $0xa24] ss:$28 sps:$4 sm:$0xff]  }
 0x2f9   :  { %5498 = vmatpush2.bf16.msra.mxu1 %v7228_v42  ;;  %v7300_v42 = vld [vmem:[%s9990_s5 + $0x6a0] ss:$28 sps:$4 sm:$0xff]  }
 0x2fa   :  { %5541 = vmatpush2.bf16.msra.mxu0 %v7231_v45  ;;  %5499 = vmatprep.subr.bf16.mxu1 %v7236_v18  ;;  %v7303_v45 = vld [vmem:[%s9990_s5 + $0xa20] ss:$28 sps:$4 sm:$0xff]   ;;  %v7308_v18 = vld [vmem:[%s9990_s5 + $0x66c] ss:$28 sps:$4 sm:$0xff]  }
 0x2fb   :  { %5542 = vmatprep.subr.bf16.mxu0 %v7239_v49  ;;  %v7311_v49 = vld [vmem:[%s9990_s5 + $0x9ec] ss:$28 sps:$4 sm:$0xff]  }
 0x2fd   :  { %5500 = vmatpush2.bf16.msra.mxu1 %v7234_v50  ;;  %v7306_v50 = vld [vmem:[%s9990_s5 + $0x668] ss:$28 sps:$4 sm:$0xff]  }
 0x2fe   :  { %5543 = vmatpush2.bf16.msra.mxu0 %v7237_v34  ;;  %5501 = vmatprep.subr.bf16.mxu1 %v7242_v16  ;;  %v7309_v34 = vld [vmem:[%s9990_s5 + $0x9e8] ss:$28 sps:$4 sm:$0xff]   ;;  %v7314_v16 = vld [vmem:[%s9990_s5 + $0x634] ss:$28 sps:$4 sm:$0xff]  }
 0x2ff   :  { %5544 = vmatprep.subr.bf16.mxu0 %v7245_v35  ;;  %v7317_v35 = vld [vmem:[%s9990_s5 + $0x9b4] ss:$28 sps:$4 sm:$0xff]  }
 0x301   :  { %5502 = vmatpush2.bf16.msra.mxu1 %v7240_v36  ;;  %v5204_v36 = vpop.f32.mrf.mxu0 }
 0x302   :  { %5545 = vmatpush2.bf16.msra.mxu0 %v7243_v38  ;;  %5557 = vmatprep.subr.bf16.mxu1 %v7248_v39  ;;  %v7312_v38 = vld [vmem:[%s9990_s5 + $0x630] ss:$28 sps:$4 sm:$0xff]  }
 0x303   :  { %5600 = vmatprep.subr.bf16.mxu0 %v7251_v40  ;;  %v7315_v39 = vld [vmem:[%s9990_s5 + $0x9b0] ss:$28 sps:$4 sm:$0xff]   ;;  %v7320_v40 = vld [vmem:[%s9990_s5 + $0x5fc] ss:$28 sps:$4 sm:$0xff]  }
 0x304   :  { %5504 = vmatmul.mubr.bf16.vlgmr.msra.gmra.mxu1 %v9043_v9 }
 0x305   :  { %5547 = vmatmul.mubr.bf16.vlgmr.msra.gmra.mxu0 %v8714_v51  ;;  %5558 = vmatpush1.bf16.msra.mxu1 %v7246_v52  ;;  %v7323_v52 = vld [vmem:[%s9990_s5 + $0x97c] ss:$28 sps:$4 sm:$0xff]  }
 0x306   :  { %5589 = vmatprep.mubr.bf16.mxu1 %v8751_v29  ;;  %5601 = vmatpush1.bf16.msra.mxu0 %v7249_v54  ;;  %v5206_v54 = vpop.f32.mrf.mxu0 }
 0x307   :  { %5632 = vmatprep.mubr.bf16.mxu0 %v8926_v60  ;;  %5559 = vmatprep.subr.bf16.mxu1 %v7254_v55  ;;  %v7318_v55 = vld [vmem:[%s9990_s5 + $0x5f8] ss:$28 sps:$4 sm:$0xff]  }
 0x308   :  { %5602 = vmatprep.subr.bf16.mxu0 %v7257_v56  ;;  %v7321_v56 = vld [vmem:[%s9990_s5 + $0x978] ss:$28 sps:$4 sm:$0xff]  }
 0x309   :  { %5560 = vmatpush1.bf16.msra.mxu1 %v7252_v57  ;;  %v7326_v57 = vld [vmem:[%s9990_s5 + $0x5c4] ss:$28 sps:$4 sm:$0xff]  }
 0x30a   :  { %5603 = vmatpush1.bf16.msra.mxu0 %v7255_v58  ;;  %5561 = vmatprep.subr.bf16.mxu1 %v7260_v59  ;;  %v7329_v58 = vld [vmem:[%s9990_s5 + $0x944] ss:$28 sps:$4 sm:$0xff]   ;;  %v5208_v59 = vpop.f32.mrf.mxu0 }
 0x30b   :  { %5604 = vmatprep.subr.bf16.mxu0 %v7263_v61  ;;  %v7324_v61 = vld [vmem:[%s9990_s5 + $0x5c0] ss:$28 sps:$4 sm:$0xff]  }
 0x30d   :  { %5562 = vmatpush1.bf16.msra.mxu1 %v7258_v11  ;;  %v5247_v11 = vpop.f32.mrf.mxu1 }
 0x30e   :  { %5605 = vmatpush1.bf16.msra.mxu0 %v7261_v63  ;;  %5563 = vmatprep.subr.bf16.mxu1 %v7266_v0  ;;  %v7327_v63 = vld [vmem:[%s9990_s5 + $0x940] ss:$28 sps:$4 sm:$0xff]   ;;  %v7332_v0 = vld [vmem:[%s9990_s5 + $0x58c] ss:$28 sps:$4 sm:$0xff]  }
 0x30f   :  { %5606 = vmatprep.subr.bf16.mxu0 %v7269_v1  ;;  %v7335_v1 = vld [vmem:[%s9990_s5 + $0x90c] ss:$28 sps:$4 sm:$0xff]  }
 0x311   :  { %5564 = vmatpush1.bf16.msra.mxu1 %v7264_v2  ;;  %v9607_v2 = vld [vmem:[%s9992_s6] sm:$0x7f] }
 0x312   :  { %5607 = vmatpush1.bf16.msra.mxu0 %v7267_v3  ;;  %5565 = vmatprep.subr.bf16.mxu1 %v7272_v4  ;;  %v5210_v3 = vpop.f32.mrf.mxu0  ;;  %v7330_v4 = vld [vmem:[%s9990_s5 + $0x588] ss:$28 sps:$4 sm:$0xff]  }
 0x313   :  { %5608 = vmatprep.subr.bf16.mxu0 %v7275_v5  ;;  %v5249_v5 = vpop.f32.mrf.mxu1 }
 0x315   :  { %5566 = vmatpush1.bf16.msra.mxu1 %v7270_v7  ;;  %v7333_v7 = vld [vmem:[%s9990_s5 + $0x908] ss:$28 sps:$4 sm:$0xff]  }
 0x316   :  { %5609 = vmatpush1.bf16.msra.mxu0 %v7273_v8  ;;  %5567 = vmatprep.subr.bf16.mxu1 %v7278_v12  ;;  %v7338_v8 = vld [vmem:[%s9990_s5 + $0x554] ss:$28 sps:$4 sm:$0xff]   ;;  %v2834_v12 = vrot.slane %v9607_v2, %v7874_v44 }
 0x317   :  { %5610 = vmatprep.subr.bf16.mxu0 %v7281_v14  ;;  %v5290_v14 = vpop.f32.mrf.mxu0  ;;  %v7339_v44 = vld [vmem:[%s9990_s5 + $0x8d0] ss:$28 sps:$4 sm:$0xff]  }
 0x319   :  { %5568 = vmatpush1.bf16.msra.mxu1 %v7276_v15  ;;  %v7341_v15 = vld [vmem:[%s9990_s5 + $0x8d4] ss:$28 sps:$4 sm:$0xff]  }
 0x31a   :  { %5611 = vmatpush1.bf16.msra.mxu0 %v7279_v19  ;;  %5569 = vmatprep.subr.bf16.mxu1 %v7284_v20  ;;  %v2838_v19 = vrot.slane %v9607_v2, %v7880_v46  ;;  %v7336_v20 = vld [vmem:[%s9990_s5 + $0x550] ss:$28 sps:$4 sm:$0xff]   ;;  %v7345_v46 = vld [vmem:[%s9990_s5 + $0x360] ss:$28 sps:$4 sm:$0xff]  }
 0x31b   :  { %5612 = vmatprep.subr.bf16.mxu0 %v7287_v25  ;;  %v5251_v25 = vpop.f32.mrf.mxu1 }
 0x31d   :  { %5570 = vmatpush1.bf16.msra.mxu1 %v7282_v21  ;;  %v7344_v21 = vld [vmem:[%s9990_s5 + $0xc1c] ss:$28 sps:$4 sm:$0xff]  }
 0x31e   :  { %5613 = vmatpush1.bf16.msra.mxu0 %v7285_v27  ;;  %5571 = vmatprep.subr.bf16.mxu1 %v7290_v26  ;;  %v5205_v27 = vadd.f32 %v5204_v36, %v2834_v12  ;;  %v5292_v26 = vpop.f32.mrf.mxu0 }
 0x31f   :  { %5614 = vmatprep.subr.bf16.mxu0 %v7293_v24  ;;  %v5207_v24 = vadd.f32 %v5206_v54, %v2838_v19 }
 0x321   :  { %5572 = vmatpush1.bf16.msra.mxu1 %v7288_v31  ;;  %v5248_v31 = vadd.f32 %v5247_v11, %v5205_v27  ;;  %v7366_v27 = vld [vmem:[%s9990_s5 + $0xc0] ss:$28 sps:$4 sm:$0xff]  }
 0x322   :  { %5615 = vmatpush1.bf16.msra.mxu0 %v7291_v28  ;;  %5573 = vmatprep.subr.bf16.mxu1 %v7296_v32  ;;  %v7342_v28 = vld [vmem:[%s9990_s5 + $0xc18] ss:$28 sps:$4 sm:$0xff]   ;;  %v5253_v32 = vpop.f32.mrf.mxu1 }
 0x323   :  { %5616 = vmatprep.subr.bf16.mxu0 %v7299_v33  ;;  %v7346_v33 = vld [vmem:[%s9990_s5 + $0x1a0] ss:$28 sps:$4 sm:$0xff]  }
 0x325   :  { %5574 = vmatpush2.bf16.msra.mxu1 %v7294_v17  ;;  %v5209_v17 = vadd.f32 %v5208_v59, %v2834_v12 }
 0x326   :  { %5617 = vmatpush2.bf16.msra.mxu0 %v7297_v37  ;;  %5575 = vmatprep.subr.bf16.mxu1 %v7302_v41  ;;  %v5250_v37 = vadd.f32 %v5249_v5, %v5207_v24  ;;  %v5291_v41 = vadd.f32 %v5290_v14, %v5248_v31  ;;  %v7357_v14 = vld [vmem:[%s9990_s5 + $0xb70] ss:$28 sps:$4 sm:$0xff]   ;;  %v7367_v24 = vld [vmem:[%s9990_s5 + $0xb00] ss:$28 sps:$4 sm:$0xff]   ;;  %v7371_v31 = vld [vmem:[%s9990_s5 + $0x88] ss:$28 sps:$4 sm:$0xff]  }
 0x327   :  { %5618 = vmatprep.subr.bf16.mxu0 %v7305_v23  ;;  %v5294_v23 = vpop.f32.mrf.mxu0 }
 0x329   :  { %5576 = vmatpush2.bf16.msra.mxu1 %v7300_v42  ;;  %v7349_v42 = vld [vmem:[%s9990_s5 + $0xbe4] ss:$28 sps:$4 sm:$0xff]  }
 0x32a   :  { %5619 = vmatpush2.bf16.msra.mxu0 %v7303_v45  ;;  %5577 = vmatprep.subr.bf16.mxu1 %v7308_v18  ;;  %v7350_v18 = vld [vmem:[%s9990_s5 + $0x328] ss:$28 sps:$4 sm:$0xff]  }
 0x32b   :  { %5620 = vmatprep.subr.bf16.mxu0 %v7311_v49  ;;  %v5252_v49 = vadd.f32 %v5251_v25, %v5209_v17  ;;  %v7365_v25 = vld [vmem:[%s9990_s5 + $0x280] ss:$28 sps:$4 sm:$0xff]  }
 0x32d   :  { %5578 = vmatpush2.bf16.msra.mxu1 %v7306_v50  ;;  %v5293_v50 = vadd.f32 %v5292_v26, %v5250_v37  ;;  %v7369_v26 = vld [vmem:[%s9990_s5 + $0xb04] ss:$28 sps:$4 sm:$0xff]  }
 0x32e   :  { %5621 = vmatpush2.bf16.msra.mxu0 %v7309_v34  ;;  %5579 = vmatprep.subr.bf16.mxu1 %v7314_v16  ;;  %v7347_v16 = vld [vmem:[%s9990_s5 + $0xbe0] ss:$28 sps:$4 sm:$0xff]   ;;  %v7372_v37 = vld [vmem:[%s9990_s5 + $0xac8] ss:$28 sps:$4 sm:$0xff]  }
 0x32f   :  { %5622 = vmatprep.subr.bf16.mxu0 %v7317_v35  ;;  %v5211_v35 = vadd.f32 %v5210_v3, %v2838_v19  ;;  %v7359_v3 = vld [vmem:[%s9990_s5 + $0xb74] ss:$28 sps:$4 sm:$0xff]  }
 0x330   :  { %v7361_v19 = vld [vmem:[%s9990_s5 + $0xf8] ss:$28 sps:$4 sm:$0xff]  }
 0x331   :  { %5580 = vmatpush2.bf16.msra.mxu1 %v7312_v38  ;;  %v7351_v38 = vld [vmem:[%s9990_s5 + $0x168] ss:$28 sps:$4 sm:$0xff]  }
 0x332   :  { %5623 = vmatpush2.bf16.msra.mxu0 %v7315_v39  ;;  %5581 = vmatprep.subr.bf16.mxu1 %v7320_v40  ;;  %v7354_v39 = vld [vmem:[%s9990_s5 + $0xbac] ss:$28 sps:$4 sm:$0xff]   ;;  %v5295_v40 = vadd.f32 %v5294_v23, %v5252_v49 }
 0x333   :  { %5624 = vmatprep.subr.bf16.mxu0 %v7323_v52  ;;  %v5296_v52 = vpop.f32.mrf.mxu0  ;;  %v7376_v23 = vld [vmem:[%s9990_s5 + $0x50] ss:$28 sps:$4 sm:$0xff]  }
 0x335   :  { %5582 = vmatpush2.bf16.msra.mxu1 %v7318_v55 }
 0x336   :  { %5625 = vmatpush2.bf16.msra.mxu0 %v7321_v56  ;;  %5583 = vmatprep.subr.bf16.mxu1 %v7326_v57  ;;  %v7355_v56 = vld [vmem:[%s9990_s5 + $0x2f0] ss:$28 sps:$4 sm:$0xff]   ;;  %v5254_v57 = vadd.f32 %v5253_v32, %v5211_v35  ;;  %v7384_v35 = vld [vmem:[%s9990_s5 + $0xddc] ss:$28 sps:$4 sm:$0xff]  }
 0x337   :  { %5626 = vmatprep.subr.bf16.mxu0 %v7329_v58  ;;  %v7375_v32 = vld [vmem:[%s9990_s5 + $0x210] ss:$28 sps:$4 sm:$0xff]  }
 0x339   :  { %5584 = vmatpush2.bf16.msra.mxu1 %v7324_v61 }
 0x33a   :  { %5627 = vmatpush2.bf16.msra.mxu0 %v7327_v63  ;;  %5585 = vmatprep.subr.bf16.mxu1 %v7332_v0  ;;  %v7352_v63 = vld [vmem:[%s9990_s5 + $0xba8] ss:$28 sps:$4 sm:$0xff]   ;;  %v5297_v0 = vadd.f32 %v5296_v52, %v5254_v57  ;;  %v7386_v52 = vld [vmem:[%s9990_s5 + $0x8a0] ss:$28 sps:$4 sm:$0xff]  }
 0x33b   :  { %5628 = vmatprep.subr.bf16.mxu0 %v7335_v1  ;;  %v7356_v1 = vld [vmem:[%s9990_s5 + $0x130] ss:$28 sps:$4 sm:$0xff]   ;;  %v7391_v57 = vld [vmem:[%s9990_s5 + $0x868] ss:$28 sps:$4 sm:$0xff]  }
 0x33d   :  { %5586 = vmatpush2.bf16.msra.mxu1 %v7330_v4 }
 0x33e   :  { %5629 = vmatpush2.bf16.msra.mxu0 %v7333_v7  ;;  %5587 = vmatprep.subr.bf16.mxu1 %v7338_v8  ;;  %v7360_v7 = vld [vmem:[%s9990_s5 + $0x2b8] ss:$28 sps:$4 sm:$0xff]  }
 0x33f   :  { %5630 = vmatprep.subr.bf16.mxu0 %v7341_v15 }
 0x341   :  { %5588 = vmatpush2.bf16.msra.mxu1 %v7336_v20  ;;  %v7364_v20 = vld [vmem:[%s9990_s5 + $0xb3c] ss:$28 sps:$4 sm:$0xff]  }
 0x342   :  { %5631 = vmatpush2.bf16.msra.mxu0 %v7339_v44  ;;  %5643 = vmatprep.subr.bf16.mxu1 %v7344_v21  ;;  %v7362_v21 = vld [vmem:[%s9990_s5 + $0xb38] ss:$28 sps:$4 sm:$0xff]  }
 0x343   :  { %6676 = vmatprep.subr.bf16.mxu0 %v7345_v46  ;;  %v7370_v46 = vld [vmem:[%s9990_s5 + $0x248] ss:$28 sps:$4 sm:$0xff]  }
 0x344   :  { %5590 = vmatmul.mubr.bf16.vlgmr.msra.gmra.mxu1 %v8753_v30  ;;  %v5333_v45 = vpop.f32.mrf.mxu1 }
 0x345   :  { %5633 = vmatmul.mubr.bf16.vlgmr.msra.gmra.mxu0 %v8931_v62  ;;  %v5334_v34 = vadd.f32 %v5333_v45, %v5291_v41  ;;  %5644 = vmatpush1.bf16.msra.mxu1 %v7342_v28  ;;  %v7374_v28 = vld [vmem:[%s9990_s5 + $0xacc] ss:$28 sps:$4 sm:$0xff]  }
 0x346   :  { %5675 = vmatprep.mubr.bf16.mxu1 %v9035_v6  ;;  %6677 = vmatpush3.bf16.msra.mxu0 %v7346_v33  ;;  %v5335_v36 = vpop.f32.mrf.mxu1 }
 0x347   :  { %v5850_v54 = vsub.f32 0.0, %v5334_v34  ;;  %5718 = vmatprep.mubr.bf16.mxu0 %v8567_v53  ;;  %v5336_v55 = vadd.f32 %v5335_v36, %v5293_v50  ;;  %5645 = vmatprep.subr.bf16.mxu1 %v7349_v42  ;;  %v7379_v42 = vld [vmem:[%s9990_s5 + $0xa94] ss:$28 sps:$4 sm:$0xff]  }
 0x348   :  { %6678 = vmatprep.subr.bf16.mxu0 %v7350_v18  ;;  %v5337_v58 = vpop.f32.mrf.mxu1  ;;  %v7380_v18 = vld [vmem:[%s9990_s5 + $0x1d8] ss:$28 sps:$4 sm:$0xff]   ;;  %v7377_v34 = vld [vmem:[%s9990_s5 + $0xa90] ss:$28 sps:$4 sm:$0xff]  }
 0x349   :  { %v5864_v59 = vmul.f32 1.442695, %v5850_v54  ;;  %v5851_v61 = vsub.f32 0.0, %v5336_v55  ;;  %v5338_v11 = vadd.f32 %v5337_v58, %v5295_v40  ;;  %5646 = vmatpush1.bf16.msra.mxu1 %v7347_v16  ;;  %v7381_v16 = vld [vmem:[%s9990_s5 + $0x18] ss:$28 sps:$4 sm:$0xff]  }
 0x34a   :  { %6679 = vmatpush3.bf16.msra.mxu0 %v7351_v38  ;;  %v5339_v53 = vpop.f32.mrf.mxu1  ;;  %5647 = vmatprep.subr.bf16.mxu1 %v7354_v39  ;;  %v7385_v38 = vld [vmem:[%s9990_s5 + $0xa60] ss:$28 sps:$4 sm:$0xff]   ;;  %v7382_v40 = vld [vmem:[%s9990_s5 + $0xdd8] ss:$28 sps:$4 sm:$0xff]   ;;  %v7390_v55 = vld [vmem:[%s9990_s5 + $0xa28] ss:$28 sps:$4 sm:$0xff]  }
 0x34b   :  { %7454 = vpow2.f32 %v5864_v59  ;;  %v5866_v4 = vmul.f32 1.442695, %v5851_v61  ;;  %v5857_v5 = vsub.f32 0.0, %v5338_v11  ;;  %6680 = vmatprep.subr.bf16.mxu0 %v7355_v56  ;;  %v5340_v8 = vadd.f32 %v5339_v53, %v5297_v0  ;;  %v7389_v54 = vld [vmem:[%s9990_s5 + $0xda4] ss:$28 sps:$4 sm:$0xff]  }
 0x34c   :  { %v7387_v56 = vld [vmem:[%s9990_s5 + $0xda0] ss:$28 sps:$4 sm:$0xff]   ;;  %v7394_v58 = vld [vmem:[%s9990_s5 + $0xd6c] ss:$28 sps:$4 sm:$0xff]   ;;  %v7400_v0 = vld [vmem:[%s9990_s5 + $0x9b8] ss:$28 sps:$4 sm:$0xff]  }
 0x34d   :  { %7456 = vpow2.f32 %v5866_v4  ;;  %v5878_v12 = vmul.f32 1.442695, %v5857_v5  ;;  %5648 = vmatpush1.bf16.msra.mxu1 %v7352_v63  ;;  %v5858_v15 = vsub.f32 0.0, %v5340_v8  ;;  %v7396_v11 = vld [vmem:[%s9990_s5 + $0x830] ss:$28 sps:$4 sm:$0xff]  }
 0x34e   :  { %6681 = vmatpush3.bf16.msra.mxu0 %v7356_v1  ;;  %5649 = vmatprep.subr.bf16.mxu1 %v7359_v3  ;;  %v7399_v63 = vld [vmem:[%s9990_s5 + $0xd34] ss:$28 sps:$4 sm:$0xff]   ;;  %v7404_v4 = vld [vmem:[%s9990_s5 + $0xcfc] ss:$28 sps:$4 sm:$0xff]  }
 0x34f   :  { %7458 = vpow2.f32 %v5878_v12  ;;  %6682 = vmatprep.subr.bf16.mxu0 %v7360_v7  ;;  %v5880_v44 = vmul.f32 1.442695, %v5858_v15  ;;  %v7397_v1 = vld [vmem:[%s9990_s5 + $0xd30] ss:$28 sps:$4 sm:$0xff]   ;;  %v7401_v3 = vld [vmem:[%s9990_s5 + $0x7f8] ss:$28 sps:$4 sm:$0xff]  }
 0x350   :  { %v7405_v7 = vld [vmem:[%s9990_s5 + $0x980] ss:$28 sps:$4 sm:$0xff]   ;;  %v7402_v8 = vld [vmem:[%s9990_s5 + $0xcf8] ss:$28 sps:$4 sm:$0xff]   ;;  %v7410_v15 = vld [vmem:[%s9990_s5 + $0x948] ss:$28 sps:$4 sm:$0xff]  }
 0x351   :  { %5650 = vmatpush1.bf16.msra.mxu1 %v7357_v14  ;;  %7460 = vpow2.f32 %v5880_v44  ;;  %v7406_v12 = vld [vmem:[%s9990_s5 + $0x7c0] ss:$28 sps:$4 sm:$0xff]   ;;  %v7415_v44 = vld [vmem:[%s9990_s5 + $0x910] ss:$28 sps:$4 sm:$0xff]  }
 0x352   :  { %6683 = vmatpush3.bf16.msra.mxu0 %v7361_v19  ;;  %5651 = vmatprep.subr.bf16.mxu1 %v7364_v20  ;;  %v7409_v14 = vld [vmem:[%s9990_s5 + $0xcc4] ss:$28 sps:$4 sm:$0xff]  }
 0x353   :  { %6684 = vmatprep.subr.bf16.mxu0 %v7365_v25  ;;  %v7407_v19 = vld [vmem:[%s9990_s5 + $0xcc0] ss:$28 sps:$4 sm:$0xff]   ;;  %v7411_v20 = vld [vmem:[%s9990_s5 + $0x788] ss:$28 sps:$4 sm:$0xff]  }
 0x354   :  { %v7414_v25 = vld [vmem:[%s9990_s5 + $0xc8c] ss:$28 sps:$4 sm:$0xff]  }
 0x355   :  { %5652 = vmatpush1.bf16.msra.mxu1 %v7362_v21  ;;  %v7412_v21 = vld [vmem:[%s9990_s5 + $0xc88] ss:$28 sps:$4 sm:$0xff]  }
 0x356   :  { %6685 = vmatpush3.bf16.msra.mxu0 %v7366_v27  ;;  %5653 = vmatprep.subr.bf16.mxu1 %v7369_v26  ;;  %v7416_v27 = vld [vmem:[%s9990_s5 + $0x750] ss:$28 sps:$4 sm:$0xff]  }
 0x357   :  { %6686 = vmatprep.subr.bf16.mxu0 %v7370_v46  ;;  %v7419_v26 = vld [vmem:[%s9990_s5 + $0xc54] ss:$28 sps:$4 sm:$0xff]  }
 0x358   :  { %v7455_v33 = vpop.eup %7454  ;;  %v7420_v46 = vld [vmem:[%s9990_s5 + $0x8d8] ss:$28 sps:$4 sm:$0xff]  }
 0x359   :  { %v5892_v17 = vadd.f32 1.0, %v7455_v33  ;;  %5654 = vmatpush1.bf16.msra.mxu1 %v7367_v24  ;;  %v7417_v24 = vld [vmem:[%s9990_s5 + $0xc50] ss:$28 sps:$4 sm:$0xff]   ;;  %v7424_v33 = vld [vmem:[%s9990_s5 + $0x6a8] ss:$28 sps:$4 sm:$0xff]  }
 0x35a   :  { %v7457_v41 = vpop.eup %7456  ;;  %6687 = vmatpush3.bf16.msra.mxu0 %v7371_v31  ;;  %5655 = vmatprep.subr.bf16.mxu1 %v7374_v28  ;;  %v7421_v31 = vld [vmem:[%s9990_s5 + $0x718] ss:$28 sps:$4 sm:$0xff]   ;;  %v7422_v28 = vld [vmem:[%s9990_s5 + $0x6e0] ss:$28 sps:$4 sm:$0xff]  }
 0x35b   :  { %7462 = vrcp.f32 %v5892_v17  ;;  %v5893_v45 = vadd.f32 1.0, %v7457_v41  ;;  %6688 = vmatprep.subr.bf16.mxu0 %v7375_v32  ;;  %v7423_v32 = vld [vmem:[%s9990_s5 + $0x520] ss:$28 sps:$4 sm:$0xff]   ;;  %v7425_v17 = vld [vmem:[%s9990_s5 + $0x4e8] ss:$28 sps:$4 sm:$0xff]  }
 0x35c   :  { %v7459_v49 = vpop.eup %7458  ;;  %v7427_v41 = vld [vmem:[%s9990_s5 + $0x4b0] ss:$28 sps:$4 sm:$0xff]  }
 0x35d   :  { %7464 = vrcp.f32 %v5893_v45  ;;  %v5899_v50 = vadd.f32 1.0, %v7459_v49  ;;  %5656 = vmatpush1.bf16.msra.mxu1 %v7372_v37  ;;  %v7426_v37 = vld [vmem:[%s9990_s5 + $0x670] ss:$28 sps:$4 sm:$0xff]   ;;  %v7432_v45 = vld [vmem:[%s9990_s5 + $0x5c8] ss:$28 sps:$4 sm:$0xff]  }
 0x35e   :  { %6689 = vmatpush3.bf16.msra.mxu0 %v7376_v23  ;;  %5657 = vmatprep.subr.bf16.mxu1 %v7379_v42  ;;  %v7461_v36 = vpop.eup %7460  ;;  %v7430_v23 = vld [vmem:[%s9990_s5 + $0x600] ss:$28 sps:$4 sm:$0xff]   ;;  %v7434_v49 = vld [vmem:[%s9990_s5 + $0x590] ss:$28 sps:$4 sm:$0xff]  }
 0x35f   :  { %7466 = vrcp.f32 %v5899_v50  ;;  %6690 = vmatprep.subr.bf16.mxu0 %v7380_v18  ;;  %v5900_v39 = vadd.f32 1.0, %v7461_v36  ;;  %v7431_v42 = vld [vmem:[%s9990_s5 + $0x440] ss:$28 sps:$4 sm:$0xff]   ;;  %v7433_v18 = vld [vmem:[%s9990_s5 + $0x408] ss:$28 sps:$4 sm:$0xff]  }
 0x360   :  { %v7435_v50 = vld [vmem:[%s9990_s5 + $0x3d0] ss:$28 sps:$4 sm:$0xff]   ;;  %v7439_v36 = vld [vmem:[%s9990_s5 + $0xc20] ss:$28 sps:$4 sm:$0xff]  }
 0x361   :  { %5658 = vmatpush1.bf16.msra.mxu1 %v7377_v34  ;;  %7468 = vrcp.f32 %v5900_v39  ;;  %v7436_v34 = vld [vmem:[%s9990_s5 + $0x558] ss:$28 sps:$4 sm:$0xff]   ;;  %v7441_v39 = vld [vmem:[%s9990_s5 + $0xbe8] ss:$28 sps:$4 sm:$0xff]  }
 0x362   :  { %6691 = vmatpush3.bf16.msra.mxu0 %v7381_v16  ;;  %5659 = vmatprep.subr.bf16.mxu1 %v7384_v35  ;;  %v7437_v16 = vld [vmem:[%s9990_s5 + $0x398] ss:$28 sps:$4 sm:$0xff]   ;;  %v7438_v35 = vld [vmem:[%s9990_s5 + $0xde0] ss:$28 sps:$4 sm:$0xff]  }
 0x363   :  { %6720 = vmatprep.subr.bf16.mxu0 %v7385_v38  ;;  %v7440_v38 = vld [vmem:[%s9990_s5 + $0xda8] ss:$28 sps:$4 sm:$0xff]  }
 0x365   :  { %5719 = vmatmul.mubr.bf16.vlgmr.msra.gmra.mxu0 %v8714_v51  ;;  %5660 = vmatpush2.bf16.msra.mxu1 %v7382_v40  ;;  %v7395_v51 = vld [vmem:[%s9990_s5 + $0x9f0] ss:$28 sps:$4 sm:$0xff]  }
 0x366   :  { %6721 = vmatpush3.bf16.msra.mxu0 %v7386_v52  ;;  %5800 = vmatprep.mubr.bf16.mxu0 %v8926_v60  ;;  %v7392_v60 = vld [vmem:[%s9990_s5 + $0xd68] ss:$28 sps:$4 sm:$0xff]   ;;  %v7442_v40 = vld [vmem:[%s9990_s5 + $0xd70] ss:$28 sps:$4 sm:$0xff]  }
 0x367   :  { %5661 = vmatprep.subr.bf16.mxu1 %v7389_v54  ;;  %6722 = vmatprep.subr.bf16.mxu0 %v7390_v55  ;;  %v7443_v52 = vld [vmem:[%s9990_s5 + $0xbb0] ss:$28 sps:$4 sm:$0xff]   ;;  %v5376_v54 = vpop.f32.mrf.mxu0  ;;  %v7446_v55 = vld [vmem:[%s9990_s5 + $0xd00] ss:$28 sps:$4 sm:$0xff]  }
 0x368   :  { %v7463_v59 = vpop.eup %7462 }
 0x369   :  { %5920 = vst [vmem:[%s9993_s7] sm:$0xff] %v7463_v59  ;;  %5662 = vmatpush2.bf16.msra.mxu1 %v7387_v56  ;;  %v7447_v56 = vld [vmem:[%s9990_s5 + $0xb40] ss:$28 sps:$4 sm:$0xff]  }
 0x36a   :  { %v7465_v61 = vpop.eup %7464  ;;  %6723 = vmatpush3.bf16.msra.mxu0 %v7391_v57  ;;  %5663 = vmatprep.subr.bf16.mxu1 %v7394_v58  ;;  %v5378_v57 = vpop.f32.mrf.mxu0  ;;  %v7448_v58 = vld [vmem:[%s9990_s5 + $0xcc8] ss:$28 sps:$4 sm:$0xff]  }
 0x36b   :  { %5921 = vst [vmem:[%s9993_s7 + $0x8] sm:$0xff] %v7465_v61  ;;  %6724 = vmatprep.subr.bf16.mxu0 %v7395_v51  ;;  %v7449_v51 = vld [vmem:[%s9990_s5 + $0xb08] ss:$28 sps:$4 sm:$0xff]   ;;  %v7450_v61 = vld [vmem:[%s9990_s5 + $0xc90] ss:$28 sps:$4 sm:$0xff]  }
 0x36c   :  { %v7467_v53 = vpop.eup %7466  ;;  %v5380_v59 = vpop.f32.mrf.mxu0 }
 0x36d   :  { %5928 = vst [vmem:[%s9993_s7 + $0x38] sm:$0xff] %v7467_v53  ;;  %5664 = vmatpush2.bf16.msra.mxu1 %v7392_v60 }
 0x36e   :  { %6725 = vmatpush3.bf16.msra.mxu0 %v7396_v11  ;;  %5665 = vmatprep.subr.bf16.mxu1 %v7399_v63  ;;  %v7469_v5 = vpop.eup %7468  ;;  %v2842_v11 = vrot.slane %v9607_v2, %v7886_v48  ;;  %v7451_v63 = vld [vmem:[%s9990_s5 + $0xad0] ss:$28 sps:$4 sm:$0xff]   ;;  %v7453_v48 = vld [vmem:[%s9990_s5 + $0xa98] ss:$28 sps:$4 sm:$0xff]  }
 0x36f   :  { %6726 = vmatprep.subr.bf16.mxu0 %v7400_v0  ;;  %5929 = vst [vmem:[%s9993_s7 + $0x40] sm:$0xff] %v7469_v5  ;;  %v5382_v0 = vpop.f32.mrf.mxu0 }
 0x370   :  { %v5377_v5 = vadd.f32 %v5376_v54, %v2842_v11 }
 0x371   :  { %5666 = vmatpush2.bf16.msra.mxu1 %v7397_v1  ;;  %v7452_v1 = vld [vmem:[%s9990_s5 + $0xc58] ss:$28 sps:$4 sm:$0xff]  }
 0x372   :  { %6727 = vmatpush3.bf16.msra.mxu0 %v7401_v3  ;;  %5667 = vmatprep.subr.bf16.mxu1 %v7404_v4  ;;  %v2846_v3 = vrot.slane %v9607_v2, %v7883_v47 }
 0x373   :  { %6728 = vmatprep.subr.bf16.mxu0 %v7405_v7 }
 0x375   :  { %5668 = vmatpush2.bf16.msra.mxu1 %v7402_v8  ;;  %v5379_v8 = vadd.f32 %v5378_v57, %v2846_v3 }
 0x376   :  { %6729 = vmatpush3.bf16.msra.mxu0 %v7406_v12  ;;  %5669 = vmatprep.subr.bf16.mxu1 %v7409_v14 }
 0x377   :  { %6730 = vmatprep.subr.bf16.mxu0 %v7410_v15  ;;  %v5381_v15 = vadd.f32 %v5380_v59, %v2842_v11 }
 0x379   :  { %5670 = vmatpush2.bf16.msra.mxu1 %v7407_v19 }
 0x37a   :  { %6731 = vmatpush3.bf16.msra.mxu0 %v7411_v20  ;;  %5671 = vmatprep.subr.bf16.mxu1 %v7414_v25  ;;  %v5383_v25 = vadd.f32 %v5382_v0, %v2846_v3 }
 0x37b   :  { %6732 = vmatprep.subr.bf16.mxu0 %v7415_v44 }
 0x37d   :  { %5672 = vmatpush2.bf16.msra.mxu1 %v7412_v21 }
 0x37e   :  { %6733 = vmatpush3.bf16.msra.mxu0 %v7416_v27  ;;  %5673 = vmatprep.subr.bf16.mxu1 %v7419_v26 }
 0x37f   :  { %6734 = vmatprep.subr.bf16.mxu0 %v7420_v46 }
 0x381   :  { %5674 = vmatpush2.bf16.msra.mxu1 %v7417_v24 }
 0x382   :  { %6735 = vmatpush3.bf16.msra.mxu0 %v7421_v31  ;;  %6698 = vmatprep.subr.bf16.mxu1 %v7422_v28 }
 0x384   :  { %5676 = vmatmul.mubr.bf16.vlgmr.msra.gmra.mxu1 %v9043_v9  ;;  %v5419_v60 = vpop.f32.mrf.mxu1  ;;  %v5462_v4 = vpop.f32.mrf.mxu0 }
 0x385   :  { %5801 = vmatmul.mubr.bf16.vlgmr.msra.gmra.mxu0 %v8931_v62  ;;  %6699 = vmatpush3.bf16.msra.mxu1 %v7423_v32  ;;  %v7428_v62 = vld [vmem:[%s9990_s5 + $0x638] ss:$28 sps:$4 sm:$0xff]   ;;  %v5420_v12 = vadd.f32 %v5419_v60, %v5377_v5  ;;  %v2850_v60 = vrot.slane %v9607_v2, %v631_v10 }
 0x386   :  { %5759 = vmatprep.mubr.bf16.mxu1 %v8751_v29  ;;  %6700 = vmatprep.subr.bf16.mxu1 %v7424_v33  ;;  %v7429_v29 = vld [vmem:[%s9990_s5 + $0x478] ss:$28 sps:$4 sm:$0xff]   ;;  %v5421_v53 = vpop.f32.mrf.mxu1  ;;  %v5464_v14 = vpop.f32.mrf.mxu0 }
 0x387   :  { %v5422_v19 = vadd.f32 %v5421_v53, %v5379_v8  ;;  %v5463_v44 = vadd.f32 %v5462_v4, %v5420_v12 }
 0x388   :  { %v5423_v7 = vpop.f32.mrf.mxu1  ;;  %v5466_v47 = vpop.f32.mrf.mxu0 }
 0x389   :  { %6701 = vmatpush3.bf16.msra.mxu1 %v7425_v17  ;;  %v5424_v21 = vadd.f32 %v5423_v7, %v5381_v15  ;;  %v5465_v26 = vadd.f32 %v5464_v14, %v5422_v19 }
 0x38a   :  { %6702 = vmatprep.subr.bf16.mxu1 %v7426_v37  ;;  %v5425_v20 = vpop.f32.mrf.mxu1  ;;  %v5468_v17 = vpop.f32.mrf.mxu0 }
 0x38b   :  { %v5426_v46 = vadd.f32 %v5425_v20, %v5383_v25  ;;  %v5467_v28 = vadd.f32 %v5466_v47, %v5424_v21 }
 0x38d   :  { %6703 = vmatpush3.bf16.msra.mxu1 %v7427_v41  ;;  %v5469_v41 = vadd.f32 %v5468_v17, %v5426_v46 }
 0x38e   :  { %6704 = vmatprep.subr.bf16.mxu1 %v7428_v62 }
 0x391   :  { %6705 = vmatpush3.bf16.msra.mxu1 %v7429_v29 }
 0x392   :  { %6706 = vmatprep.subr.bf16.mxu1 %v7430_v23 }
 0x395   :  { %6707 = vmatpush3.bf16.msra.mxu1 %v7431_v42 }
 0x396   :  { %6708 = vmatprep.subr.bf16.mxu1 %v7432_v45 }
 0x399   :  { %6709 = vmatpush3.bf16.msra.mxu1 %v7433_v18 }
 0x39a   :  { %6710 = vmatprep.subr.bf16.mxu1 %v7434_v49 }
 0x39d   :  { %6711 = vmatpush3.bf16.msra.mxu1 %v7435_v50 }
 0x39e   :  { %6712 = vmatprep.subr.bf16.mxu1 %v7436_v34 }
 0x3a1   :  { %6713 = vmatpush3.bf16.msra.mxu1 %v7437_v16 }
 0x3a2   :  { %6742 = vmatprep.subr.bf16.mxu1 %v7438_v35 }
 0x3a4   :  { %5760 = vmatmul.mubr.bf16.vlgmr.msra.gmra.mxu1 %v8753_v30  ;;  %v7444_v30 = vld [vmem:[%s9990_s5 + $0xd38] ss:$28 sps:$4 sm:$0xff]  }
 0x3a5   :  { %6743 = vmatpush3.bf16.msra.mxu1 %v7439_v36  ;;  %5841 = vmatprep.mubr.bf16.mxu1 %v9035_v6  ;;  %v7445_v6 = vld [vmem:[%s9990_s5 + $0xb78] ss:$28 sps:$4 sm:$0xff]  }
 0x3a6   :  { %6744 = vmatprep.subr.bf16.mxu1 %v7440_v38 }
 0x3a9   :  { %6745 = vmatpush3.bf16.msra.mxu1 %v7441_v39 }
 0x3aa   :  { %6746 = vmatprep.subr.bf16.mxu1 %v7442_v40 }
 0x3ad   :  { %6747 = vmatpush3.bf16.msra.mxu1 %v7443_v52 }
 0x3ae   :  { %6748 = vmatprep.subr.bf16.mxu1 %v7444_v30 }
 0x3b1   :  { %6749 = vmatpush3.bf16.msra.mxu1 %v7445_v6 }
 0x3b2   :  { %6750 = vmatprep.subr.bf16.mxu1 %v7446_v55 }
 0x3b5   :  { %6751 = vmatpush3.bf16.msra.mxu1 %v7447_v56 }
 0x3b6   :  { %6752 = vmatprep.subr.bf16.mxu1 %v7448_v58 }
 0x3b9   :  { %6753 = vmatpush3.bf16.msra.mxu1 %v7449_v51 }
 0x3ba   :  { %6754 = vmatprep.subr.bf16.mxu1 %v7450_v61 }
 0x3bd   :  { %6755 = vmatpush3.bf16.msra.mxu1 %v7451_v63  ;;  %v2854_v63 = vrot.slane %v9607_v2, %v635_v13 }
 0x3be   :  { %6756 = vmatprep.subr.bf16.mxu1 %v7452_v1 }
 0x3c1   :  { %6757 = vmatpush3.bf16.msra.mxu1 %v7453_v48 }
 0x3c4   :  { %v5505_v27 = vpop.f32.mrf.mxu1  ;;  %5842 = vmatmul.mubr.bf16.vlgmr.msra.gmra.mxu1 %v9043_v9 }
 0x3c5   :  { %v5506_v24 = vadd.f32 %v5505_v27, %v5463_v44  ;;  %v5548_v57 = vpop.f32.mrf.mxu0 }
 0x3c6   :  { %v5507_v31 = vpop.f32.mrf.mxu1  ;;  %v5549_v53 = vadd.f32 %v5548_v57, %v2850_v60 }
 0x3c7   :  { %v5852_v32 = vsub.f32 0.0, %v5506_v24  ;;  %v5508_v33 = vadd.f32 %v5507_v31, %v5465_v26  ;;  %v5550_v58 = vpop.f32.mrf.mxu0 }
 0x3c8   :  { %v5509_v37 = vpop.f32.mrf.mxu1  ;;  %v5551_v3 = vadd.f32 %v5550_v58, %v2854_v63  ;;  %v2858_v58 = vrot.slane %v9607_v2, %v639_v22 }
 0x3c9   :  { %v5868_v62 = vmul.f32 1.442695, %v5852_v32  ;;  %v5853_v29 = vsub.f32 0.0, %v5508_v33  ;;  %v5510_v23 = vadd.f32 %v5509_v37, %v5467_v28  ;;  %v5552_v51 = vpop.f32.mrf.mxu0 }
 0x3ca   :  { %v5511_v42 = vpop.f32.mrf.mxu1  ;;  %v5553_v48 = vadd.f32 %v5552_v51, %v2850_v60 }
 0x3cb   :  { %7470 = vpow2.f32 %v5868_v62  ;;  %v5870_v45 = vmul.f32 1.442695, %v5853_v29  ;;  %v5859_v18 = vsub.f32 0.0, %v5510_v23  ;;  %v5512_v49 = vadd.f32 %v5511_v42, %v5469_v41  ;;  %v5554_v61 = vpop.f32.mrf.mxu0 }
 0x3cc   :  { %v5555_v12 = vadd.f32 %v5554_v61, %v2854_v63 }
 0x3cd   :  { %7472 = vpow2.f32 %v5870_v45  ;;  %v5882_v9 = vmul.f32 1.442695, %v5859_v18  ;;  %v5860_v50 = vsub.f32 0.0, %v5512_v49 }
 0x3cf   :  { %7474 = vpow2.f32 %v5882_v9  ;;  %v5884_v34 = vmul.f32 1.442695, %v5860_v50 }
 0x3d1   :  { %7476 = vpow2.f32 %v5884_v34 }
 0x3d8   :  { %v7471_v16 = vpop.eup %7470 }
 0x3d9   :  { %v5894_v35 = vadd.f32 1.0, %v7471_v16 }
 0x3da   :  { %v7473_v36 = vpop.eup %7472 }
 0x3db   :  { %7478 = vrcp.f32 %v5894_v35  ;;  %v5895_v38 = vadd.f32 1.0, %v7473_v36 }
 0x3dc   :  { %v7475_v39 = vpop.eup %7474 }
 0x3dd   :  { %7480 = vrcp.f32 %v5895_v38  ;;  %v5901_v40 = vadd.f32 1.0, %v7475_v39 }
 0x3de   :  { %v7477_v52 = vpop.eup %7476 }
 0x3df   :  { %7482 = vrcp.f32 %v5901_v40  ;;  %v5902_v30 = vadd.f32 1.0, %v7477_v52 }
 0x3e1   :  { %7484 = vrcp.f32 %v5902_v30 }
 0x3e8   :  { %v7479_v6 = vpop.eup %7478 }
 0x3e9   :  { %5922 = vst [vmem:[%s9993_s7 + $0x10] sm:$0xff] %v7479_v6 }
 0x3ea   :  { %v7481_v54 = vpop.eup %7480 }
 0x3eb   :  { %5923 = vst [vmem:[%s9993_s7 + $0x18] sm:$0xff] %v7481_v54 }
 0x3ec   :  { %v7483_v55 = vpop.eup %7482 }
 0x3ed   :  { %5930 = vst [vmem:[%s9993_s7 + $0x48] sm:$0xff] %v7483_v55 }
 0x3ee   :  { %v7485_v56 = vpop.eup %7484 }
 0x3ef   :  { %5931 = vst [vmem:[%s9993_s7 + $0x50] sm:$0xff] %v7485_v56 }
 0x404   :  { %v5591_v59 = vpop.f32.mrf.mxu1 }
 0x405   :  { %v5634_v0 = vpop.f32.mrf.mxu0  ;;  %v5592_v4 = vadd.f32 %v5591_v59, %v5549_v53 }
 0x406   :  { %v5593_v11 = vpop.f32.mrf.mxu1 }
 0x407   :  { %v5636_v5 = vpop.f32.mrf.mxu0  ;;  %v5594_v7 = vadd.f32 %v5593_v11, %v5551_v3  ;;  %v5635_v14 = vadd.f32 %v5634_v0, %v5592_v4 }
 0x408   :  { %v5595_v1 = vpop.f32.mrf.mxu1 }
 0x409   :  { %v5596_v15 = vadd.f32 %v5595_v1, %v5553_v48  ;;  %v5638_v19 = vpop.f32.mrf.mxu0  ;;  %v5637_v20 = vadd.f32 %v5636_v5, %v5594_v7 }
 0x40a   :  { %v5597_v8 = vpop.f32.mrf.mxu1 }
 0x40b   :  { %v5598_v25 = vadd.f32 %v5597_v8, %v5555_v12  ;;  %v5639_v47 = vadd.f32 %v5638_v19, %v5596_v15  ;;  %v5640_v26 = vpop.f32.mrf.mxu0 }
 0x40d   :  { %v5641_v24 = vadd.f32 %v5640_v26, %v5598_v25 }
 0x425   :  { %v6692_v39 = vpop.f32.mrf.mxu0 }
 0x427   :  { %v6693_v52 = vpop.f32.mrf.mxu0 }
 0x428   :  { %v6694_v51 = vadd.f32 %v6693_v52, %v6692_v39 }
 0x429   :  { %v6695_v30 = vpop.f32.mrf.mxu0 }
 0x42a   :  { %v5721_v11 = vadd.f32 %v6694_v51, %v2858_v58 }
 0x42b   :  { %v6696_v54 = vpop.f32.mrf.mxu0 }
 0x42c   :  { %v6697_v63 = vadd.f32 %v6696_v54, %v6695_v30 }
 0x42e   :  { %v5724_v4 = vadd.f32 %v6697_v63, %v2858_v58 }
 0x444   :  { %v5677_v10 = vpop.f32.mrf.mxu1 }
 0x445   :  { %v5678_v44 = vadd.f32 %v5677_v10, %v5635_v14  ;;  %v6736_v56 = vpop.f32.mrf.mxu0 }
 0x446   :  { %v5679_v21 = vpop.f32.mrf.mxu1 }
 0x447   :  { %v5854_v13 = vsub.f32 0.0, %v5678_v44  ;;  %v5680_v27 = vadd.f32 %v5679_v21, %v5637_v20  ;;  %v6737_v59 = vpop.f32.mrf.mxu0 }
 0x448   :  { %v5681_v46 = vpop.f32.mrf.mxu1  ;;  %v6738_v5 = vadd.f32 %v6737_v59, %v6736_v56 }
 0x449   :  { %v5872_v31 = vmul.f32 1.442695, %v5854_v13  ;;  %v5855_v28 = vsub.f32 0.0, %v5680_v27  ;;  %v5682_v32 = vadd.f32 %v5681_v46, %v5639_v47  ;;  %v6739_v0 = vpop.f32.mrf.mxu0 }
 0x44a   :  { %v5683_v33 = vpop.f32.mrf.mxu1 }
 0x44b   :  { %7486 = vpow2.f32 %v5872_v31  ;;  %v5874_v17 = vmul.f32 1.442695, %v5855_v28  ;;  %v5861_v37 = vsub.f32 0.0, %v5682_v32  ;;  %v5684_v41 = vadd.f32 %v5683_v33, %v5641_v24  ;;  %v6740_v48 = vpop.f32.mrf.mxu0 }
 0x44c   :  { %v6741_v15 = vadd.f32 %v6740_v48, %v6739_v0 }
 0x44d   :  { %7488 = vpow2.f32 %v5874_v17  ;;  %v5886_v62 = vmul.f32 1.442695, %v5861_v37  ;;  %v5862_v29 = vsub.f32 0.0, %v5684_v41 }
 0x44f   :  { %7490 = vpow2.f32 %v5886_v62  ;;  %v5888_v23 = vmul.f32 1.442695, %v5862_v29 }
 0x451   :  { %7492 = vpow2.f32 %v5888_v23 }
 0x458   :  { %v7487_v42 = vpop.eup %7486 }
 0x459   :  { %v5896_v45 = vadd.f32 1.0, %v7487_v42 }
 0x45a   :  { %v7489_v18 = vpop.eup %7488 }
 0x45b   :  { %7494 = vrcp.f32 %v5896_v45  ;;  %v5897_v49 = vadd.f32 1.0, %v7489_v18 }
 0x45c   :  { %v7491_v9 = vpop.eup %7490 }
 0x45d   :  { %7496 = vrcp.f32 %v5897_v49  ;;  %v5903_v50 = vadd.f32 1.0, %v7491_v9 }
 0x45e   :  { %v7493_v34 = vpop.eup %7492 }
 0x45f   :  { %7498 = vrcp.f32 %v5903_v50  ;;  %v5904_v16 = vadd.f32 1.0, %v7493_v34 }
 0x461   :  { %7500 = vrcp.f32 %v5904_v16 }
 0x464   :  { %v6714_v6 = vpop.f32.mrf.mxu1 }
 0x466   :  { %v6715_v55 = vpop.f32.mrf.mxu1 }
 0x467   :  { %v6716_v60 = vadd.f32 %v6715_v55, %v6714_v6 }
 0x468   :  { %v7495_v35 = vpop.eup %7494  ;;  %v6717_v57 = vpop.f32.mrf.mxu1 }
 0x469   :  { %5924 = vst [vmem:[%s9993_s7 + $0x20] sm:$0xff] %v7495_v35  ;;  %v5762_v53 = vadd.f32 %v6716_v60, %v5721_v11 }
 0x46a   :  { %v7497_v36 = vpop.eup %7496  ;;  %v6718_v61 = vpop.f32.mrf.mxu1 }
 0x46b   :  { %5925 = vst [vmem:[%s9993_s7 + $0x28] sm:$0xff] %v7497_v36  ;;  %v6719_v1 = vadd.f32 %v6718_v61, %v6717_v57  ;;  %v5803_v12 = vadd.f32 %v6738_v5, %v5762_v53 }
 0x46c   :  { %v7499_v38 = vpop.eup %7498 }
 0x46d   :  { %5932 = vst [vmem:[%s9993_s7 + $0x58] sm:$0xff] %v7499_v38  ;;  %v5765_v8 = vadd.f32 %v6719_v1, %v5724_v4 }
 0x46e   :  { %v7501_v40 = vpop.eup %7500 }
 0x46f   :  { %5933 = vst [vmem:[%s9993_s7 + $0x60] sm:$0xff] %v7501_v40  ;;  %v5806_v10 = vadd.f32 %v6741_v15, %v5765_v8 }
 0x484   :  { %v6758_v3 = vpop.f32.mrf.mxu1 }
 0x486   :  { %v6759_v7 = vpop.f32.mrf.mxu1 }
 0x487   :  { %v6760_v14 = vadd.f32 %v6759_v7, %v6758_v3 }
 0x488   :  { %v6761_v43 = vpop.f32.mrf.mxu1 }
 0x489   :  { %v5844_v22 = vadd.f32 %v6760_v14, %v5803_v12 }
 0x48a   :  { %v6762_v2 = vpop.f32.mrf.mxu1 }
 0x48b   :  { %v5856_v19 = vsub.f32 0.0, %v5844_v22  ;;  %v6763_v20 = vadd.f32 %v6762_v2, %v6761_v43 }
 0x48d   :  { %v5876_v25 = vmul.f32 1.442695, %v5856_v19  ;;  %v5847_v44 = vadd.f32 %v6763_v20, %v5806_v10 }
 0x48f   :  { %7502 = vpow2.f32 %v5876_v25  ;;  %v5863_v21 = vsub.f32 0.0, %v5847_v44 }
 0x491   :  { %v5890_v47 = vmul.f32 1.442695, %v5863_v21 }
 0x493   :  { %7504 = vpow2.f32 %v5890_v47 }
 0x49c   :  { %v7503_v13 = vpop.eup %7502 }
 0x49d   :  { %v5898_v27 = vadd.f32 1.0, %v7503_v13 }
 0x49f   :  { %7506 = vrcp.f32 %v5898_v27 }
 0x4a0   :  { %v7505_v26 = vpop.eup %7504 }
 0x4a1   :  { %v5905_v46 = vadd.f32 1.0, %v7505_v26 }
 0x4a3   :  { %7508 = vrcp.f32 %v5905_v46 }
 0x4ac   :  { %v7507_v24 = vpop.eup %7506 }
 0x4ad   :  { %5927 = vst.msk [vmem:[%s9993_s7 + $0x30] sm:$0xff] %vm5926_vm0, %v7507_v24 }
 0x4b0   :  { %v7509_v31 = vpop.eup %7508 }
 0x4b1   :  { %5934 = vst.msk [vmem:[%s9993_s7 + $0x68] sm:$0xff] %vm5926_vm0, %v7509_v31 }

</bundles_post_ra>
